<compile_context>
chip_gen: v5e
topology: v5e:2x2
jax: 0.10.0
libtpu: 0.0.40
codegen_flags: <defaults>
</compile_context>

<pallas_src>
import jax
import jax.numpy as jnp
from jax import lax
from jax.experimental import pallas as pl
from jax.experimental.pallas import tpu as pltpu

# 3x3 one-hot kernel positions (row, col), centre excluded — same order as the
# PyTorch `kernel` buffer (order is irrelevant to the result, kept for clarity).
_KPOS = ((0, 0), (0, 1), (0, 2), (1, 0), (1, 2), (2, 0), (2, 1), (2, 2))


def _neighbor_offsets(dilations):
    offs = []
    for d in dilations:
        for ky, kx in _KPOS:
            offs.append(((ky - 1) * d, (kx - 1) * d))
    return tuple(offs)


# --------------------------- pltpu.roll self-probe ----------------------------
_ROLL_DIR = None


def _probe_roll_direction():
    """Returns +1 if pltpu.roll matches np.roll (positive shift -> higher indices),
    -1 if the direction is reversed, 0 if rolls are unusable (slice fallback)."""
    C, H, W = 2, 16, 128

    def kernel(lane_ref, sub_ref):
        col = lax.broadcasted_iota(jnp.int32, (C, H, W), 2)
        row = lax.broadcasted_iota(jnp.int32, (C, H, W), 1)
        lane_ref[...] = pltpu.roll(col, 1, 2)
        sub_ref[...] = pltpu.roll(row, 1, 1)

    try:
        lane, sub = pl.pallas_call(
            kernel,
            out_shape=(jax.ShapeDtypeStruct((C, H, W), jnp.int32),
                       jax.ShapeDtypeStruct((C, H, W), jnp.int32)))()
        lane, sub = jax.block_until_ready((lane, sub))
        col = jnp.broadcast_to(jnp.arange(W, dtype=jnp.int32)[None, None, :], (C, H, W))
        row = jnp.broadcast_to(jnp.arange(H, dtype=jnp.int32)[None, :, None], (C, H, W))
        if (bool(jnp.array_equal(lane, jnp.roll(col, 1, axis=2)))
                and bool(jnp.array_equal(sub, jnp.roll(row, 1, axis=1)))):
            return 1
        if (bool(jnp.array_equal(lane, jnp.roll(col, -1, axis=2)))
                and bool(jnp.array_equal(sub, jnp.roll(row, -1, axis=1)))):
            return -1
        return 0
    except Exception:
        return 0


def _roll_direction():
    global _ROLL_DIR
    if _ROLL_DIR is None:
        _ROLL_DIR = _probe_roll_direction()
    return _ROLL_DIR


# --------------------------------- kernel -------------------------------------

def _make_kernel(dilations, num_iter, alpha, C, H, W, K, roll_dir, approx_recip):
    offsets = _neighbor_offsets(dilations)
    shifts = sorted({s for d in dilations for s in (-d, d)})
    # Roll fast path only when the spatial dims are native-tile aligned.
    use_roll = (roll_dir != 0) and (H % 8 == 0) and (W % 128 == 0)
    neg_inv = -1.0 / (float(alpha) ** 2 * C)        # folds the minus sign, 1/C, 1/alpha^2

    def kernel(img_ref, phi_ref, out_ref, aff_scr):
        # ---- hoisted edge-replication masks (one per distinct shift) ----------
        col_idx = lax.broadcasted_iota(jnp.int32, (1, H, W), 2)
        row_idx = lax.broadcasted_iota(jnp.int32, (1, H, W), 1)
        col_fix = {s: (col_idx >= W - s) if s > 0 else (col_idx < -s) for s in shifts}
        row_fix = {s: (row_idx >= H - s) if s > 0 else (row_idx < -s) for s in shifts}

        def shift_w(x, s):          # y[..., i, j] = x[..., i, clamp(j + s)]
            if s == 0:
                return x
            edge = x[..., W - 1:W] if s > 0 else x[..., 0:1]
            if use_roll:
                r = pltpu.roll(x, (roll_dir * (-s)) % W, x.ndim - 1)
                return jnp.where(col_fix[s], edge, r)
            pad = jnp.broadcast_to(edge, x.shape[:-1] + (abs(s),))
            if s > 0:
                return jnp.concatenate([x[..., s:], pad], axis=-1)
            return jnp.concatenate([pad, x[..., :W + s]], axis=-1)

        def shift_h(x, s):          # y[..., i, j] = x[..., clamp(i + s), j]
            if s == 0:
                return x
            edge = x[..., H - 1:H, :] if s > 0 else x[..., 0:1, :]
            if use_roll:
                r = pltpu.roll(x, (roll_dir * (-s)) % H, x.ndim - 2)
                return jnp.where(row_fix[s], edge, r)
            pad = jnp.broadcast_to(edge, x.shape[:-2] + (abs(s), W))
            if s > 0:
                return jnp.concatenate([x[..., s:, :], pad], axis=-2)
            return jnp.concatenate([pad, x[..., :H + s, :]], axis=-2)

        def col_copies(x):          # de-duplicated column shifts (reused per row shift)
            cc = {0: x}
            for s in shifts:
                cc[s] = shift_w(x, s)
            return cc

        def recip(x):
            if approx_recip:
                return pl.reciprocal(x, approx=True)   # EUP slot
            return 1.0 / x

        # ---- affinity: compute only on the first CP tile of each image --------
        @pl.when(pl.program_id(1) == 0)
        def _():
            img = img_ref[0].astype(jnp.float32)                 # (C, H, W)
            icols = col_copies(img)

            # fused single-pass unbiased variance over the K neighbours
            s1 = jnp.zeros_like(img)
            s2 = jnp.zeros_like(img)
            for dy, dx in offsets:
                n = shift_h(icols[dx], dy)
                s1 = s1 + n
                s2 = s2 + n * n
            var = (s2 - s1 * s1 * (1.0 / K)) * (1.0 / (K - 1))
            std = jnp.sqrt(jnp.maximum(var, 0.0))
            den = std + 1e-4
            negw = neg_inv * recip(den * den)                    # (C, H, W)

            # logits (channel mean folded into negw) + stable softmax over K
            logits = []
            for dy, dx in offsets:
                d = shift_h(icols[dx], dy) - img
                logits.append(jnp.sum(d * d * negw, axis=0))     # (H, W)
            m = logits[0]
            for k in range(1, K):
                m = jnp.maximum(m, logits[k])
            exps = [jnp.exp(l - m) for l in logits]
            tot = exps[0]
            for k in range(1, K):
                tot = tot + exps[k]
            inv_tot = recip(tot)
            for k in range(K):
                aff_scr[k] = exps[k] * inv_tot

        # ---- iterative affinity propagation of the phi tile -------------------
        affs = [aff_scr[k] for k in range(K)]                    # hoisted (H, W) views
        phi = phi_ref[0].astype(jnp.float32)                     # (cp_tile, H, W)
        for _ in range(num_iter):
            pcols = col_copies(phi)
            acc = jnp.zeros_like(phi)
            for k, (dy, dx) in enumerate(offsets):
                acc = acc + shift_h(pcols[dx], dy) * affs[k]
            phi = acc
        out_ref[...] = phi[None].astype(out_ref.dtype)

    return kernel


def _choose_cp_tile(CP, per_cp_bytes, fixed_bytes, budget_bytes):
    """Largest divisor of CP whose working set fits the VMEM budget (>= 1)."""
    best = 1
    for t in range(1, CP + 1):
        if CP % t == 0 and fixed_bytes + t * per_cp_bytes <= budget_bytes:
            best = t
    return best


def local_consistency_forward(imgs, pred_phis, dilations=(1, 2), num_iter=2,
                              alpha=0.3, *, cp_tile=None, approx_reciprocal=False):
    """Pallas implementation of LocalConsistencyModule.forward.

    imgs:      (N, C, H, W)
    pred_phis: (N, CP, H, W)
    returns refined pred_phis (N, CP, H, W) in pred_phis.dtype.
    """
    dilations = tuple(int(d) for d in dilations)
    assert len(dilations) >= 1 and all(d >= 1 for d in dilations)
    N, C, H, W = imgs.shape
    Np, CP, Hh, Ww = pred_phis.shape
    assert (N, H, W) == (Np, Hh, Ww)
    K = 8 * len(dilations)
    roll_dir = _roll_direction()

    # ---- per-generation VMEM budget, CP tiling, scoped-VMEM limit -------------
    try:
        vmem_cap = int(pltpu.get_tpu_info().vmem_capacity_bytes)
    except Exception:
        vmem_cap = 64 << 20                                     # v7x-safe default
    budget = min(48 << 20, int(vmem_cap * 0.6))

    ncs = 2 * len(dilations)                                    # non-zero column shifts
    img_it = imgs.dtype.itemsize
    phi_it = pred_phis.dtype.itemsize
    # per-image fixed footprint: double-buffered img block, f32 img + column copies
    # + stats temporaries, (K,H,W) affinity scratch + softmax temporaries.
    fixed = (2 * C * H * W * img_it
             + (ncs + 4) * C * H * W * 4
             + 3 * K * H * W * 4)
    # per phi-channel footprint: double-buffered in/out blocks, f32 copy + column
    # copies + accumulator / row-shift temporary.
    per_cp = 4 * H * W * phi_it + (ncs + 3) * H * W * 4

    if cp_tile is None:
        cp_t = _choose_cp_tile(CP, per_cp, fixed, budget)
    else:
        cp_t = int(cp_tile)
        assert 1 <= cp_t <= CP and CP % cp_t == 0, "cp_tile must divide CP"
    vmem_limit = int(min(max((fixed + cp_t * per_cp) * 5 // 4, 32 << 20),
                         96 << 20, vmem_cap))

    kernel = _make_kernel(dilations, num_iter, alpha, C, H, W, K,
                          roll_dir, approx_reciprocal)

    flops = N * (K * C * H * W * 8 + K * H * W * 8
                 + num_iter * K * CP * H * W * 2)
    cost = pl.CostEstimate(flops=flops,
                           transcendentals=N * (K * H * W + C * H * W),
                           bytes_accessed=(imgs.size * img_it
                                           + 2 * pred_phis.size * phi_it))

    return pl.pallas_call(
        kernel,
        out_shape=jax.ShapeDtypeStruct((N, CP, H, W), pred_phis.dtype),
        grid=(N, CP // cp_t),
        in_specs=[
            pl.BlockSpec((1, C, H, W), lambda n, p: (n, 0, 0, 0)),
            pl.BlockSpec((1, cp_t, H, W), lambda n, p: (n, p, 0, 0)),
        ],
        out_specs=pl.BlockSpec((1, cp_t, H, W), lambda n, p: (n, p, 0, 0)),
        scratch_shapes=[pltpu.VMEM((K, H, W), jnp.float32)],
        compiler_params=pltpu.CompilerParams(
            dimension_semantics=("parallel", "arbitrary"),
            vmem_limit_bytes=vmem_limit),
        cost_estimate=cost,
    )(imgs, pred_phis)


# ----------------------------- pure-JAX reference ------------------------------

def _dilated_neighbors_ref(x, dilations):
    b, c, h, w = x.shape
    outs = []
    for d in dilations:
        xp = jnp.pad(x, ((0, 0), (0, 0), (d, d), (d, d)), mode="edge")
        for ky, kx in _KPOS:
            outs.append(xp[:, :, ky * d:ky * d + h, kx * d:kx * d + w])
    return jnp.stack(outs, axis=2)                              # (b, c, K, h, w)


def _reference_forward(imgs, pred_phis, dilations=(1, 2), num_iter=2, alpha=0.3):
    _imgs = _dilated_neighbors_ref(imgs, dilations)
    _rep = imgs[:, :, None]
    _abs = jnp.abs(_imgs - _rep)
    _std = jnp.std(_imgs, axis=2, keepdims=True, ddof=1)        # torch.std: unbiased
    aff = -((_abs / (_std + 1e-4)) / alpha) ** 2
    aff = jnp.mean(aff, axis=1, keepdims=True)
    aff = jax.nn.softmax(aff, axis=2)
    phis = pred_phis
    for _ in range(num_iter):
        _p = _dilated_neighbors_ref(phis, dilations)
        phis = jnp.sum(_p * aff, axis=2)
    return phis


if __name__ == "__main__":
    key = jax.random.PRNGKey(0)
    k1, k2, k3, k4 = jax.random.split(key, 4)

    # Case 1: lane-dense spatial dims -> roll-based shift fast path.
    N, C, CP, H, W = 2, 4, 2, 16, 128
    imgs = jax.random.normal(k1, (N, C, H, W), jnp.float32)
    phis = jax.random.normal(k2, (N, CP, H, W), jnp.float32)
    out = jax.block_until_ready(local_consistency_forward(imgs, phis, (1, 2), 2))
    ref = _reference_forward(imgs, phis, (1, 2), 2)
    err = float(jnp.max(jnp.abs(out - ref)))
    assert out.shape == ref.shape
    assert jnp.allclose(out, ref, rtol=1e-4, atol=1e-4), err

    # Case 2: non-tile-aligned spatial dims + multiple CP tiles (affinity reuse
    # across the CP grid axis via pl.when + scratch) -> slice fallback path.
    N, C, CP, H, W = 1, 3, 6, 12, 20
    imgs = jax.random.normal(k3, (N, C, H, W), jnp.float32)
    phis = jax.random.normal(k4, (N, CP, H, W), jnp.float32)
    out = jax.block_until_ready(
        local_consistency_forward(imgs, phis, (1, 2), 2, cp_tile=3))
    ref = _reference_forward(imgs, phis, (1, 2), 2)
    err = float(jnp.max(jnp.abs(out - ref)))
    assert out.shape == ref.shape
    assert jnp.allclose(out, ref, rtol=1e-4, atol=1e-4), err

    print("KERNEL_OK")
</pallas_src>

<mosaic_0001>
module attributes {stable_mosaic.version = 11 : i64} {
  func.func @kernel(%arg0: i32, %arg1: i32, %arg2: memref<1x4x16x128xf32, #tpu.memory_space<vmem>>, %arg3: memref<1x2x16x128xf32, #tpu.memory_space<vmem>>, %arg4: memref<1x2x16x128xf32, #tpu.memory_space<vmem>>, %arg5: memref<16x16x128xf32, #tpu.memory_space<vmem>>) attributes {dimension_semantics = [#tpu.dimension_semantics<parallel>, #tpu.dimension_semantics<arbitrary>], iteration_bounds = array<i64: 2, 1>, scalar_prefetch = 0 : i64, scratch_operands = 1 : i64, tpu.core_type = #tpu.core_type<tc>, window_params = [{transform_indices = @transform_0, window_bounds = array<i64: 1, 4, 16, 128>}, {transform_indices = @transform_1, window_bounds = array<i64: 1, 2, 16, 128>}, {transform_indices = @transform_2, window_bounds = array<i64: 1, 2, 16, 128>}]} {
    %c0_i32 = arith.constant 0 : i32
    %0 = arith.cmpi eq, %arg1, %c0_i32 : i32
    %1 = arith.extui %0 : i1 to i32
    %c0_i32_0 = arith.constant 0 : i32
    %2 = arith.cmpi ne, %1, %c0_i32_0 : i32
    scf.if %2 {
      %c0_42 = arith.constant 0 : index
      %c0_43 = arith.constant 0 : index
      %c0_44 = arith.constant 0 : index
      %c0_45 = arith.constant 0 : index
      %297 = vector.load %arg2[%c0_42, %c0_43, %c0_44, %c0_45] : memref<1x4x16x128xf32, #tpu.memory_space<vmem>>, vector<1x4x16x128xf32>
      %298 = vector.shape_cast %297 : vector<1x4x16x128xf32> to vector<4x16x128xf32>
      %299 = vector.extract_strided_slice %298 {offsets = [0, 0, 0], sizes = [4, 16, 1], strides = [1, 1, 1]} : vector<4x16x128xf32> to vector<4x16x1xf32>
      %300 = vector.shape_cast %299 : vector<4x16x1xf32> to vector<4x16x1xf32>
      %301 = vector.broadcast %300 : vector<4x16x1xf32> to vector<4x16x2xf32>
      %302 = vector.extract_strided_slice %298 {offsets = [0, 0, 0], sizes = [4, 16, 126], strides = [1, 1, 1]} : vector<4x16x128xf32> to vector<4x16x126xf32>
      %303 = tpu.concatenate %301, %302 in 2 : vector<4x16x2xf32>, vector<4x16x126xf32> -> vector<4x16x128xf32>
      %304 = vector.extract_strided_slice %298 {offsets = [0, 0, 0], sizes = [4, 16, 1], strides = [1, 1, 1]} : vector<4x16x128xf32> to vector<4x16x1xf32>
      %305 = vector.extract_strided_slice %298 {offsets = [0, 0, 0], sizes = [4, 16, 127], strides = [1, 1, 1]} : vector<4x16x128xf32> to vector<4x16x127xf32>
      %306 = tpu.concatenate %304, %305 in 2 : vector<4x16x1xf32>, vector<4x16x127xf32> -> vector<4x16x128xf32>
      %307 = vector.extract_strided_slice %298 {offsets = [0, 0, 127], sizes = [4, 16, 1], strides = [1, 1, 1]} : vector<4x16x128xf32> to vector<4x16x1xf32>
      %308 = vector.extract_strided_slice %298 {offsets = [0, 0, 1], sizes = [4, 16, 127], strides = [1, 1, 1]} : vector<4x16x128xf32> to vector<4x16x127xf32>
      %309 = tpu.concatenate %308, %307 in 2 : vector<4x16x127xf32>, vector<4x16x1xf32> -> vector<4x16x128xf32>
      %310 = vector.extract_strided_slice %298 {offsets = [0, 0, 127], sizes = [4, 16, 1], strides = [1, 1, 1]} : vector<4x16x128xf32> to vector<4x16x1xf32>
      %311 = vector.shape_cast %310 : vector<4x16x1xf32> to vector<4x16x1xf32>
      %312 = vector.broadcast %311 : vector<4x16x1xf32> to vector<4x16x2xf32>
      %313 = vector.extract_strided_slice %298 {offsets = [0, 0, 2], sizes = [4, 16, 126], strides = [1, 1, 1]} : vector<4x16x128xf32> to vector<4x16x126xf32>
      %314 = tpu.concatenate %313, %312 in 2 : vector<4x16x126xf32>, vector<4x16x2xf32> -> vector<4x16x128xf32>
      %cst_46 = arith.constant 0.000000e+00 : f32
      %315 = vector.broadcast %cst_46 : f32 to vector<4x16x128xf32>
      %cst_47 = arith.constant 0.000000e+00 : f32
      %316 = vector.broadcast %cst_47 : f32 to vector<4x16x128xf32>
      %317 = vector.extract_strided_slice %306 {offsets = [0, 0, 0], sizes = [4, 1, 128], strides = [1, 1, 1]} : vector<4x16x128xf32> to vector<4x1x128xf32>
      %318 = vector.extract_strided_slice %306 {offsets = [0, 0, 0], sizes = [4, 15, 128], strides = [1, 1, 1]} : vector<4x16x128xf32> to vector<4x15x128xf32>
      %319 = tpu.concatenate %317, %318 in 1 : vector<4x1x128xf32>, vector<4x15x128xf32> -> vector<4x16x128xf32>
      %320 = arith.addf %315, %319 : vector<4x16x128xf32>
      %321 = arith.mulf %319, %319 : vector<4x16x128xf32>
      %322 = arith.addf %316, %321 : vector<4x16x128xf32>
      %323 = vector.extract_strided_slice %298 {offsets = [0, 0, 0], sizes = [4, 1, 128], strides = [1, 1, 1]} : vector<4x16x128xf32> to vector<4x1x128xf32>
      %324 = vector.extract_strided_slice %298 {offsets = [0, 0, 0], sizes = [4, 15, 128], strides = [1, 1, 1]} : vector<4x16x128xf32> to vector<4x15x128xf32>
      %325 = tpu.concatenate %323, %324 in 1 : vector<4x1x128xf32>, vector<4x15x128xf32> -> vector<4x16x128xf32>
      %326 = arith.addf %320, %325 : vector<4x16x128xf32>
      %327 = arith.mulf %325, %325 : vector<4x16x128xf32>
      %328 = arith.addf %322, %327 : vector<4x16x128xf32>
      %329 = vector.extract_strided_slice %309 {offsets = [0, 0, 0], sizes = [4, 1, 128], strides = [1, 1, 1]} : vector<4x16x128xf32> to vector<4x1x128xf32>
      %330 = vector.extract_strided_slice %309 {offsets = [0, 0, 0], sizes = [4, 15, 128], strides = [1, 1, 1]} : vector<4x16x128xf32> to vector<4x15x128xf32>
      %331 = tpu.concatenate %329, %330 in 1 : vector<4x1x128xf32>, vector<4x15x128xf32> -> vector<4x16x128xf32>
      %332 = arith.addf %326, %331 : vector<4x16x128xf32>
      %333 = arith.mulf %331, %331 : vector<4x16x128xf32>
      %334 = arith.addf %328, %333 : vector<4x16x128xf32>
      %335 = arith.addf %332, %306 : vector<4x16x128xf32>
      %336 = arith.mulf %306, %306 : vector<4x16x128xf32>
      %337 = arith.addf %334, %336 : vector<4x16x128xf32>
      %338 = arith.addf %335, %309 : vector<4x16x128xf32>
      %339 = arith.mulf %309, %309 : vector<4x16x128xf32>
      %340 = arith.addf %337, %339 : vector<4x16x128xf32>
      %341 = vector.extract_strided_slice %306 {offsets = [0, 15, 0], sizes = [4, 1, 128], strides = [1, 1, 1]} : vector<4x16x128xf32> to vector<4x1x128xf32>
      %342 = vector.extract_strided_slice %306 {offsets = [0, 1, 0], sizes = [4, 15, 128], strides = [1, 1, 1]} : vector<4x16x128xf32> to vector<4x15x128xf32>
      %343 = tpu.concatenate %342, %341 in 1 : vector<4x15x128xf32>, vector<4x1x128xf32> -> vector<4x16x128xf32>
      %344 = arith.addf %338, %343 : vector<4x16x128xf32>
      %345 = arith.mulf %343, %343 : vector<4x16x128xf32>
      %346 = arith.addf %340, %345 : vector<4x16x128xf32>
      %347 = vector.extract_strided_slice %298 {offsets = [0, 15, 0], sizes = [4, 1, 128], strides = [1, 1, 1]} : vector<4x16x128xf32> to vector<4x1x128xf32>
      %348 = vector.extract_strided_slice %298 {offsets = [0, 1, 0], sizes = [4, 15, 128], strides = [1, 1, 1]} : vector<4x16x128xf32> to vector<4x15x128xf32>
      %349 = tpu.concatenate %348, %347 in 1 : vector<4x15x128xf32>, vector<4x1x128xf32> -> vector<4x16x128xf32>
      %350 = arith.addf %344, %349 : vector<4x16x128xf32>
      %351 = arith.mulf %349, %349 : vector<4x16x128xf32>
      %352 = arith.addf %346, %351 : vector<4x16x128xf32>
      %353 = vector.extract_strided_slice %309 {offsets = [0, 15, 0], sizes = [4, 1, 128], strides = [1, 1, 1]} : vector<4x16x128xf32> to vector<4x1x128xf32>
      %354 = vector.extract_strided_slice %309 {offsets = [0, 1, 0], sizes = [4, 15, 128], strides = [1, 1, 1]} : vector<4x16x128xf32> to vector<4x15x128xf32>
      %355 = tpu.concatenate %354, %353 in 1 : vector<4x15x128xf32>, vector<4x1x128xf32> -> vector<4x16x128xf32>
      %356 = arith.addf %350, %355 : vector<4x16x128xf32>
      %357 = arith.mulf %355, %355 : vector<4x16x128xf32>
      %358 = arith.addf %352, %357 : vector<4x16x128xf32>
      %359 = vector.extract_strided_slice %303 {offsets = [0, 0, 0], sizes = [4, 1, 128], strides = [1, 1, 1]} : vector<4x16x128xf32> to vector<4x1x128xf32>
      %360 = vector.shape_cast %359 : vector<4x1x128xf32> to vector<4x1x128xf32>
      %361 = vector.broadcast %360 : vector<4x1x128xf32> to vector<4x2x128xf32>
      %362 = vector.extract_strided_slice %303 {offsets = [0, 0, 0], sizes = [4, 14, 128], strides = [1, 1, 1]} : vector<4x16x128xf32> to vector<4x14x128xf32>
      %363 = tpu.concatenate %361, %362 in 1 : vector<4x2x128xf32>, vector<4x14x128xf32> -> vector<4x16x128xf32>
      %364 = arith.addf %356, %363 : vector<4x16x128xf32>
      %365 = arith.mulf %363, %363 : vector<4x16x128xf32>
      %366 = arith.addf %358, %365 : vector<4x16x128xf32>
      %367 = vector.extract_strided_slice %298 {offsets = [0, 0, 0], sizes = [4, 1, 128], strides = [1, 1, 1]} : vector<4x16x128xf32> to vector<4x1x128xf32>
      %368 = vector.shape_cast %367 : vector<4x1x128xf32> to vector<4x1x128xf32>
      %369 = vector.broadcast %368 : vector<4x1x128xf32> to vector<4x2x128xf32>
      %370 = vector.extract_strided_slice %298 {offsets = [0, 0, 0], sizes = [4, 14, 128], strides = [1, 1, 1]} : vector<4x16x128xf32> to vector<4x14x128xf32>
      %371 = tpu.concatenate %369, %370 in 1 : vector<4x2x128xf32>, vector<4x14x128xf32> -> vector<4x16x128xf32>
      %372 = arith.addf %364, %371 : vector<4x16x128xf32>
      %373 = arith.mulf %371, %371 : vector<4x16x128xf32>
      %374 = arith.addf %366, %373 : vector<4x16x128xf32>
      %375 = vector.extract_strided_slice %314 {offsets = [0, 0, 0], sizes = [4, 1, 128], strides = [1, 1, 1]} : vector<4x16x128xf32> to vector<4x1x128xf32>
      %376 = vector.shape_cast %375 : vector<4x1x128xf32> to vector<4x1x128xf32>
      %377 = vector.broadcast %376 : vector<4x1x128xf32> to vector<4x2x128xf32>
      %378 = vector.extract_strided_slice %314 {offsets = [0, 0, 0], sizes = [4, 14, 128], strides = [1, 1, 1]} : vector<4x16x128xf32> to vector<4x14x128xf32>
      %379 = tpu.concatenate %377, %378 in 1 : vector<4x2x128xf32>, vector<4x14x128xf32> -> vector<4x16x128xf32>
      %380 = arith.addf %372, %379 : vector<4x16x128xf32>
      %381 = arith.mulf %379, %379 : vector<4x16x128xf32>
      %382 = arith.addf %374, %381 : vector<4x16x128xf32>
      %383 = arith.addf %380, %303 : vector<4x16x128xf32>
      %384 = arith.mulf %303, %303 : vector<4x16x128xf32>
      %385 = arith.addf %382, %384 : vector<4x16x128xf32>
      %386 = arith.addf %383, %314 : vector<4x16x128xf32>
      %387 = arith.mulf %314, %314 : vector<4x16x128xf32>
      %388 = arith.addf %385, %387 : vector<4x16x128xf32>
      %389 = vector.extract_strided_slice %303 {offsets = [0, 15, 0], sizes = [4, 1, 128], strides = [1, 1, 1]} : vector<4x16x128xf32> to vector<4x1x128xf32>
      %390 = vector.shape_cast %389 : vector<4x1x128xf32> to vector<4x1x128xf32>
      %391 = vector.broadcast %390 : vector<4x1x128xf32> to vector<4x2x128xf32>
      %392 = vector.extract_strided_slice %303 {offsets = [0, 2, 0], sizes = [4, 14, 128], strides = [1, 1, 1]} : vector<4x16x128xf32> to vector<4x14x128xf32>
      %393 = tpu.concatenate %392, %391 in 1 : vector<4x14x128xf32>, vector<4x2x128xf32> -> vector<4x16x128xf32>
      %394 = arith.addf %386, %393 : vector<4x16x128xf32>
      %395 = arith.mulf %393, %393 : vector<4x16x128xf32>
      %396 = arith.addf %388, %395 : vector<4x16x128xf32>
      %397 = vector.extract_strided_slice %298 {offsets = [0, 15, 0], sizes = [4, 1, 128], strides = [1, 1, 1]} : vector<4x16x128xf32> to vector<4x1x128xf32>
      %398 = vector.shape_cast %397 : vector<4x1x128xf32> to vector<4x1x128xf32>
      %399 = vector.broadcast %398 : vector<4x1x128xf32> to vector<4x2x128xf32>
      %400 = vector.extract_strided_slice %298 {offsets = [0, 2, 0], sizes = [4, 14, 128], strides = [1, 1, 1]} : vector<4x16x128xf32> to vector<4x14x128xf32>
      %401 = tpu.concatenate %400, %399 in 1 : vector<4x14x128xf32>, vector<4x2x128xf32> -> vector<4x16x128xf32>
      %402 = arith.addf %394, %401 : vector<4x16x128xf32>
      %403 = arith.mulf %401, %401 : vector<4x16x128xf32>
      %404 = arith.addf %396, %403 : vector<4x16x128xf32>
      %405 = vector.extract_strided_slice %314 {offsets = [0, 15, 0], sizes = [4, 1, 128], strides = [1, 1, 1]} : vector<4x16x128xf32> to vector<4x1x128xf32>
      %406 = vector.shape_cast %405 : vector<4x1x128xf32> to vector<4x1x128xf32>
      %407 = vector.broadcast %406 : vector<4x1x128xf32> to vector<4x2x128xf32>
      %408 = vector.extract_strided_slice %314 {offsets = [0, 2, 0], sizes = [4, 14, 128], strides = [1, 1, 1]} : vector<4x16x128xf32> to vector<4x14x128xf32>
      %409 = tpu.concatenate %408, %407 in 1 : vector<4x14x128xf32>, vector<4x2x128xf32> -> vector<4x16x128xf32>
      %410 = arith.addf %402, %409 : vector<4x16x128xf32>
      %411 = arith.mulf %409, %409 : vector<4x16x128xf32>
      %412 = arith.addf %404, %411 : vector<4x16x128xf32>
      %413 = arith.mulf %410, %410 : vector<4x16x128xf32>
      %cst_48 = arith.constant 6.250000e-02 : f32
      %414 = vector.broadcast %cst_48 : f32 to vector<4x16x128xf32>
      %415 = arith.mulf %413, %414 : vector<4x16x128xf32>
      %416 = arith.subf %412, %415 : vector<4x16x128xf32>
      %cst_49 = arith.constant 0.0666666701 : f32
      %417 = vector.broadcast %cst_49 : f32 to vector<4x16x128xf32>
      %418 = arith.mulf %416, %417 : vector<4x16x128xf32>
      %cst_50 = arith.constant 0.000000e+00 : f32
      %419 = vector.broadcast %cst_50 : f32 to vector<4x16x128xf32>
      %420 = arith.maximumf %418, %419 : vector<4x16x128xf32>
      %421 = math.sqrt %420 : vector<4x16x128xf32>
      %cst_51 = arith.constant 9.99999974E-5 : f32
      %422 = vector.broadcast %cst_51 : f32 to vector<4x16x128xf32>
      %423 = arith.addf %421, %422 : vector<4x16x128xf32>
      %424 = arith.mulf %423, %423 : vector<4x16x128xf32>
      %cst_52 = arith.constant 1.000000e+00 : f32
      %425 = vector.broadcast %cst_52 : f32 to vector<4x16x128xf32>
      %426 = arith.divf %425, %424 : vector<4x16x128xf32>
      %cst_53 = arith.constant -2.77777767 : f32
      %427 = vector.broadcast %cst_53 : f32 to vector<4x16x128xf32>
      %428 = arith.mulf %427, %426 : vector<4x16x128xf32>
      %429 = vector.extract_strided_slice %306 {offsets = [0, 0, 0], sizes = [4, 1, 128], strides = [1, 1, 1]} : vector<4x16x128xf32> to vector<4x1x128xf32>
      %430 = vector.extract_strided_slice %306 {offsets = [0, 0, 0], sizes = [4, 15, 128], strides = [1, 1, 1]} : vector<4x16x128xf32> to vector<4x15x128xf32>
      %431 = tpu.concatenate %429, %430 in 1 : vector<4x1x128xf32>, vector<4x15x128xf32> -> vector<4x16x128xf32>
      %432 = arith.subf %431, %298 : vector<4x16x128xf32>
      %433 = arith.mulf %432, %432 : vector<4x16x128xf32>
      %434 = arith.mulf %433, %428 : vector<4x16x128xf32>
      %cst_54 = arith.constant dense<0.000000e+00> : vector<16x128xf32>
      %435 = vector.multi_reduction <add>, %434, %cst_54 [0] : vector<4x16x128xf32> to vector<16x128xf32>
      %436 = vector.extract_strided_slice %298 {offsets = [0, 0, 0], sizes = [4, 1, 128], strides = [1, 1, 1]} : vector<4x16x128xf32> to vector<4x1x128xf32>
      %437 = vector.extract_strided_slice %298 {offsets = [0, 0, 0], sizes = [4, 15, 128], strides = [1, 1, 1]} : vector<4x16x128xf32> to vector<4x15x128xf32>
      %438 = tpu.concatenate %436, %437 in 1 : vector<4x1x128xf32>, vector<4x15x128xf32> -> vector<4x16x128xf32>
      %439 = arith.subf %438, %298 : vector<4x16x128xf32>
      %440 = arith.mulf %439, %439 : vector<4x16x128xf32>
      %441 = arith.mulf %440, %428 : vector<4x16x128xf32>
      %cst_55 = arith.constant dense<0.000000e+00> : vector<16x128xf32>
      %442 = vector.multi_reduction <add>, %441, %cst_55 [0] : vector<4x16x128xf32> to vector<16x128xf32>
      %443 = vector.extract_strided_slice %309 {offsets = [0, 0, 0], sizes = [4, 1, 128], strides = [1, 1, 1]} : vector<4x16x128xf32> to vector<4x1x128xf32>
      %444 = vector.extract_strided_slice %309 {offsets = [0, 0, 0], sizes = [4, 15, 128], strides = [1, 1, 1]} : vector<4x16x128xf32> to vector<4x15x128xf32>
      %445 = tpu.concatenate %443, %444 in 1 : vector<4x1x128xf32>, vector<4x15x128xf32> -> vector<4x16x128xf32>
      %446 = arith.subf %445, %298 : vector<4x16x128xf32>
      %447 = arith.mulf %446, %446 : vector<4x16x128xf32>
      %448 = arith.mulf %447, %428 : vector<4x16x128xf32>
      %cst_56 = arith.constant dense<0.000000e+00> : vector<16x128xf32>
      %449 = vector.multi_reduction <add>, %448, %cst_56 [0] : vector<4x16x128xf32> to vector<16x128xf32>
      %450 = arith.subf %306, %298 : vector<4x16x128xf32>
      %451 = arith.mulf %450, %450 : vector<4x16x128xf32>
      %452 = arith.mulf %451, %428 : vector<4x16x128xf32>
      %cst_57 = arith.constant dense<0.000000e+00> : vector<16x128xf32>
      %453 = vector.multi_reduction <add>, %452, %cst_57 [0] : vector<4x16x128xf32> to vector<16x128xf32>
      %454 = arith.subf %309, %298 : vector<4x16x128xf32>
      %455 = arith.mulf %454, %454 : vector<4x16x128xf32>
      %456 = arith.mulf %455, %428 : vector<4x16x128xf32>
      %cst_58 = arith.constant dense<0.000000e+00> : vector<16x128xf32>
      %457 = vector.multi_reduction <add>, %456, %cst_58 [0] : vector<4x16x128xf32> to vector<16x128xf32>
      %458 = vector.extract_strided_slice %306 {offsets = [0, 15, 0], sizes = [4, 1, 128], strides = [1, 1, 1]} : vector<4x16x128xf32> to vector<4x1x128xf32>
      %459 = vector.extract_strided_slice %306 {offsets = [0, 1, 0], sizes = [4, 15, 128], strides = [1, 1, 1]} : vector<4x16x128xf32> to vector<4x15x128xf32>
      %460 = tpu.concatenate %459, %458 in 1 : vector<4x15x128xf32>, vector<4x1x128xf32> -> vector<4x16x128xf32>
      %461 = arith.subf %460, %298 : vector<4x16x128xf32>
      %462 = arith.mulf %461, %461 : vector<4x16x128xf32>
      %463 = arith.mulf %462, %428 : vector<4x16x128xf32>
      %cst_59 = arith.constant dense<0.000000e+00> : vector<16x128xf32>
      %464 = vector.multi_reduction <add>, %463, %cst_59 [0] : vector<4x16x128xf32> to vector<16x128xf32>
      %465 = vector.extract_strided_slice %298 {offsets = [0, 15, 0], sizes = [4, 1, 128], strides = [1, 1, 1]} : vector<4x16x128xf32> to vector<4x1x128xf32>
      %466 = vector.extract_strided_slice %298 {offsets = [0, 1, 0], sizes = [4, 15, 128], strides = [1, 1, 1]} : vector<4x16x128xf32> to vector<4x15x128xf32>
      %467 = tpu.concatenate %466, %465 in 1 : vector<4x15x128xf32>, vector<4x1x128xf32> -> vector<4x16x128xf32>
      %468 = arith.subf %467, %298 : vector<4x16x128xf32>
      %469 = arith.mulf %468, %468 : vector<4x16x128xf32>
      %470 = arith.mulf %469, %428 : vector<4x16x128xf32>
      %cst_60 = arith.constant dense<0.000000e+00> : vector<16x128xf32>
      %471 = vector.multi_reduction <add>, %470, %cst_60 [0] : vector<4x16x128xf32> to vector<16x128xf32>
      %472 = vector.extract_strided_slice %309 {offsets = [0, 15, 0], sizes = [4, 1, 128], strides = [1, 1, 1]} : vector<4x16x128xf32> to vector<4x1x128xf32>
      %473 = vector.extract_strided_slice %309 {offsets = [0, 1, 0], sizes = [4, 15, 128], strides = [1, 1, 1]} : vector<4x16x128xf32> to vector<4x15x128xf32>
      %474 = tpu.concatenate %473, %472 in 1 : vector<4x15x128xf32>, vector<4x1x128xf32> -> vector<4x16x128xf32>
      %475 = arith.subf %474, %298 : vector<4x16x128xf32>
      %476 = arith.mulf %475, %475 : vector<4x16x128xf32>
      %477 = arith.mulf %476, %428 : vector<4x16x128xf32>
      %cst_61 = arith.constant dense<0.000000e+00> : vector<16x128xf32>
      %478 = vector.multi_reduction <add>, %477, %cst_61 [0] : vector<4x16x128xf32> to vector<16x128xf32>
      %479 = vector.extract_strided_slice %303 {offsets = [0, 0, 0], sizes = [4, 1, 128], strides = [1, 1, 1]} : vector<4x16x128xf32> to vector<4x1x128xf32>
      %480 = vector.shape_cast %479 : vector<4x1x128xf32> to vector<4x1x128xf32>
      %481 = vector.broadcast %480 : vector<4x1x128xf32> to vector<4x2x128xf32>
      %482 = vector.extract_strided_slice %303 {offsets = [0, 0, 0], sizes = [4, 14, 128], strides = [1, 1, 1]} : vector<4x16x128xf32> to vector<4x14x128xf32>
      %483 = tpu.concatenate %481, %482 in 1 : vector<4x2x128xf32>, vector<4x14x128xf32> -> vector<4x16x128xf32>
      %484 = arith.subf %483, %298 : vector<4x16x128xf32>
      %485 = arith.mulf %484, %484 : vector<4x16x128xf32>
      %486 = arith.mulf %485, %428 : vector<4x16x128xf32>
      %cst_62 = arith.constant dense<0.000000e+00> : vector<16x128xf32>
      %487 = vector.multi_reduction <add>, %486, %cst_62 [0] : vector<4x16x128xf32> to vector<16x128xf32>
      %488 = vector.extract_strided_slice %298 {offsets = [0, 0, 0], sizes = [4, 1, 128], strides = [1, 1, 1]} : vector<4x16x128xf32> to vector<4x1x128xf32>
      %489 = vector.shape_cast %488 : vector<4x1x128xf32> to vector<4x1x128xf32>
      %490 = vector.broadcast %489 : vector<4x1x128xf32> to vector<4x2x128xf32>
      %491 = vector.extract_strided_slice %298 {offsets = [0, 0, 0], sizes = [4, 14, 128], strides = [1, 1, 1]} : vector<4x16x128xf32> to vector<4x14x128xf32>
      %492 = tpu.concatenate %490, %491 in 1 : vector<4x2x128xf32>, vector<4x14x128xf32> -> vector<4x16x128xf32>
      %493 = arith.subf %492, %298 : vector<4x16x128xf32>
      %494 = arith.mulf %493, %493 : vector<4x16x128xf32>
      %495 = arith.mulf %494, %428 : vector<4x16x128xf32>
      %cst_63 = arith.constant dense<0.000000e+00> : vector<16x128xf32>
      %496 = vector.multi_reduction <add>, %495, %cst_63 [0] : vector<4x16x128xf32> to vector<16x128xf32>
      %497 = vector.extract_strided_slice %314 {offsets = [0, 0, 0], sizes = [4, 1, 128], strides = [1, 1, 1]} : vector<4x16x128xf32> to vector<4x1x128xf32>
      %498 = vector.shape_cast %497 : vector<4x1x128xf32> to vector<4x1x128xf32>
      %499 = vector.broadcast %498 : vector<4x1x128xf32> to vector<4x2x128xf32>
      %500 = vector.extract_strided_slice %314 {offsets = [0, 0, 0], sizes = [4, 14, 128], strides = [1, 1, 1]} : vector<4x16x128xf32> to vector<4x14x128xf32>
      %501 = tpu.concatenate %499, %500 in 1 : vector<4x2x128xf32>, vector<4x14x128xf32> -> vector<4x16x128xf32>
      %502 = arith.subf %501, %298 : vector<4x16x128xf32>
      %503 = arith.mulf %502, %502 : vector<4x16x128xf32>
      %504 = arith.mulf %503, %428 : vector<4x16x128xf32>
      %cst_64 = arith.constant dense<0.000000e+00> : vector<16x128xf32>
      %505 = vector.multi_reduction <add>, %504, %cst_64 [0] : vector<4x16x128xf32> to vector<16x128xf32>
      %506 = arith.subf %303, %298 : vector<4x16x128xf32>
      %507 = arith.mulf %506, %506 : vector<4x16x128xf32>
      %508 = arith.mulf %507, %428 : vector<4x16x128xf32>
      %cst_65 = arith.constant dense<0.000000e+00> : vector<16x128xf32>
      %509 = vector.multi_reduction <add>, %508, %cst_65 [0] : vector<4x16x128xf32> to vector<16x128xf32>
      %510 = arith.subf %314, %298 : vector<4x16x128xf32>
      %511 = arith.mulf %510, %510 : vector<4x16x128xf32>
      %512 = arith.mulf %511, %428 : vector<4x16x128xf32>
      %cst_66 = arith.constant dense<0.000000e+00> : vector<16x128xf32>
      %513 = vector.multi_reduction <add>, %512, %cst_66 [0] : vector<4x16x128xf32> to vector<16x128xf32>
      %514 = vector.extract_strided_slice %303 {offsets = [0, 15, 0], sizes = [4, 1, 128], strides = [1, 1, 1]} : vector<4x16x128xf32> to vector<4x1x128xf32>
      %515 = vector.shape_cast %514 : vector<4x1x128xf32> to vector<4x1x128xf32>
      %516 = vector.broadcast %515 : vector<4x1x128xf32> to vector<4x2x128xf32>
      %517 = vector.extract_strided_slice %303 {offsets = [0, 2, 0], sizes = [4, 14, 128], strides = [1, 1, 1]} : vector<4x16x128xf32> to vector<4x14x128xf32>
      %518 = tpu.concatenate %517, %516 in 1 : vector<4x14x128xf32>, vector<4x2x128xf32> -> vector<4x16x128xf32>
      %519 = arith.subf %518, %298 : vector<4x16x128xf32>
      %520 = arith.mulf %519, %519 : vector<4x16x128xf32>
      %521 = arith.mulf %520, %428 : vector<4x16x128xf32>
      %cst_67 = arith.constant dense<0.000000e+00> : vector<16x128xf32>
      %522 = vector.multi_reduction <add>, %521, %cst_67 [0] : vector<4x16x128xf32> to vector<16x128xf32>
      %523 = vector.extract_strided_slice %298 {offsets = [0, 15, 0], sizes = [4, 1, 128], strides = [1, 1, 1]} : vector<4x16x128xf32> to vector<4x1x128xf32>
      %524 = vector.shape_cast %523 : vector<4x1x128xf32> to vector<4x1x128xf32>
      %525 = vector.broadcast %524 : vector<4x1x128xf32> to vector<4x2x128xf32>
      %526 = vector.extract_strided_slice %298 {offsets = [0, 2, 0], sizes = [4, 14, 128], strides = [1, 1, 1]} : vector<4x16x128xf32> to vector<4x14x128xf32>
      %527 = tpu.concatenate %526, %525 in 1 : vector<4x14x128xf32>, vector<4x2x128xf32> -> vector<4x16x128xf32>
      %528 = arith.subf %527, %298 : vector<4x16x128xf32>
      %529 = arith.mulf %528, %528 : vector<4x16x128xf32>
      %530 = arith.mulf %529, %428 : vector<4x16x128xf32>
      %cst_68 = arith.constant dense<0.000000e+00> : vector<16x128xf32>
      %531 = vector.multi_reduction <add>, %530, %cst_68 [0] : vector<4x16x128xf32> to vector<16x128xf32>
      %532 = vector.extract_strided_slice %314 {offsets = [0, 15, 0], sizes = [4, 1, 128], strides = [1, 1, 1]} : vector<4x16x128xf32> to vector<4x1x128xf32>
      %533 = vector.shape_cast %532 : vector<4x1x128xf32> to vector<4x1x128xf32>
      %534 = vector.broadcast %533 : vector<4x1x128xf32> to vector<4x2x128xf32>
      %535 = vector.extract_strided_slice %314 {offsets = [0, 2, 0], sizes = [4, 14, 128], strides = [1, 1, 1]} : vector<4x16x128xf32> to vector<4x14x128xf32>
      %536 = tpu.concatenate %535, %534 in 1 : vector<4x14x128xf32>, vector<4x2x128xf32> -> vector<4x16x128xf32>
      %537 = arith.subf %536, %298 : vector<4x16x128xf32>
      %538 = arith.mulf %537, %537 : vector<4x16x128xf32>
      %539 = arith.mulf %538, %428 : vector<4x16x128xf32>
      %cst_69 = arith.constant dense<0.000000e+00> : vector<16x128xf32>
      %540 = vector.multi_reduction <add>, %539, %cst_69 [0] : vector<4x16x128xf32> to vector<16x128xf32>
      %541 = arith.maximumf %435, %442 : vector<16x128xf32>
      %542 = arith.maximumf %541, %449 : vector<16x128xf32>
      %543 = arith.maximumf %542, %453 : vector<16x128xf32>
      %544 = arith.maximumf %543, %457 : vector<16x128xf32>
      %545 = arith.maximumf %544, %464 : vector<16x128xf32>
      %546 = arith.maximumf %545, %471 : vector<16x128xf32>
      %547 = arith.maximumf %546, %478 : vector<16x128xf32>
      %548 = arith.maximumf %547, %487 : vector<16x128xf32>
      %549 = arith.maximumf %548, %496 : vector<16x128xf32>
      %550 = arith.maximumf %549, %505 : vector<16x128xf32>
      %551 = arith.maximumf %550, %509 : vector<16x128xf32>
      %552 = arith.maximumf %551, %513 : vector<16x128xf32>
      %553 = arith.maximumf %552, %522 : vector<16x128xf32>
      %554 = arith.maximumf %553, %531 : vector<16x128xf32>
      %555 = arith.maximumf %554, %540 : vector<16x128xf32>
      %556 = arith.subf %435, %555 : vector<16x128xf32>
      %557 = math.exp %556 : vector<16x128xf32>
      %558 = arith.subf %442, %555 : vector<16x128xf32>
      %559 = math.exp %558 : vector<16x128xf32>
      %560 = arith.subf %449, %555 : vector<16x128xf32>
      %561 = math.exp %560 : vector<16x128xf32>
      %562 = arith.subf %453, %555 : vector<16x128xf32>
      %563 = math.exp %562 : vector<16x128xf32>
      %564 = arith.subf %457, %555 : vector<16x128xf32>
      %565 = math.exp %564 : vector<16x128xf32>
      %566 = arith.subf %464, %555 : vector<16x128xf32>
      %567 = math.exp %566 : vector<16x128xf32>
      %568 = arith.subf %471, %555 : vector<16x128xf32>
      %569 = math.exp %568 : vector<16x128xf32>
      %570 = arith.subf %478, %555 : vector<16x128xf32>
      %571 = math.exp %570 : vector<16x128xf32>
      %572 = arith.subf %487, %555 : vector<16x128xf32>
      %573 = math.exp %572 : vector<16x128xf32>
      %574 = arith.subf %496, %555 : vector<16x128xf32>
      %575 = math.exp %574 : vector<16x128xf32>
      %576 = arith.subf %505, %555 : vector<16x128xf32>
      %577 = math.exp %576 : vector<16x128xf32>
      %578 = arith.subf %509, %555 : vector<16x128xf32>
      %579 = math.exp %578 : vector<16x128xf32>
      %580 = arith.subf %513, %555 : vector<16x128xf32>
      %581 = math.exp %580 : vector<16x128xf32>
      %582 = arith.subf %522, %555 : vector<16x128xf32>
      %583 = math.exp %582 : vector<16x128xf32>
      %584 = arith.subf %531, %555 : vector<16x128xf32>
      %585 = math.exp %584 : vector<16x128xf32>
      %586 = arith.subf %540, %555 : vector<16x128xf32>
      %587 = math.exp %586 : vector<16x128xf32>
      %588 = arith.addf %557, %559 : vector<16x128xf32>
      %589 = arith.addf %588, %561 : vector<16x128xf32>
      %590 = arith.addf %589, %563 : vector<16x128xf32>
      %591 = arith.addf %590, %565 : vector<16x128xf32>
      %592 = arith.addf %591, %567 : vector<16x128xf32>
      %593 = arith.addf %592, %569 : vector<16x128xf32>
      %594 = arith.addf %593, %571 : vector<16x128xf32>
      %595 = arith.addf %594, %573 : vector<16x128xf32>
      %596 = arith.addf %595, %575 : vector<16x128xf32>
      %597 = arith.addf %596, %577 : vector<16x128xf32>
      %598 = arith.addf %597, %579 : vector<16x128xf32>
      %599 = arith.addf %598, %581 : vector<16x128xf32>
      %600 = arith.addf %599, %583 : vector<16x128xf32>
      %601 = arith.addf %600, %585 : vector<16x128xf32>
      %602 = arith.addf %601, %587 : vector<16x128xf32>
      %cst_70 = arith.constant 1.000000e+00 : f32
      %603 = vector.broadcast %cst_70 : f32 to vector<16x128xf32>
      %604 = arith.divf %603, %602 : vector<16x128xf32>
      %605 = arith.mulf %557, %604 : vector<16x128xf32>
      %c0_71 = arith.constant 0 : index
      %c0_72 = arith.constant 0 : index
      %c0_73 = arith.constant 0 : index
      %606 = vector.load %arg5[%c0_71, %c0_72, %c0_73] : memref<16x16x128xf32, #tpu.memory_space<vmem>>, vector<1x16x128xf32>
      %607 = vector.shape_cast %606 : vector<1x16x128xf32> to vector<16x128xf32>
      %608 = vector.shape_cast %605 : vector<16x128xf32> to vector<1x16x128xf32>
      tpu.vector_store %arg5[%c0_71, %c0_72, %c0_73], %608 {strides = array<i32>} : memref<16x16x128xf32, #tpu.memory_space<vmem>>, vector<1x16x128xf32>,
      %609 = arith.mulf %559, %604 : vector<16x128xf32>
      %c1_74 = arith.constant 1 : index
      %c0_75 = arith.constant 0 : index
      %c0_76 = arith.constant 0 : index
      %610 = vector.load %arg5[%c1_74, %c0_75, %c0_76] : memref<16x16x128xf32, #tpu.memory_space<vmem>>, vector<1x16x128xf32>
      %611 = vector.shape_cast %610 : vector<1x16x128xf32> to vector<16x128xf32>
      %612 = vector.shape_cast %609 : vector<16x128xf32> to vector<1x16x128xf32>
      tpu.vector_store %arg5[%c1_74, %c0_75, %c0_76], %612 {strides = array<i32>} : memref<16x16x128xf32, #tpu.memory_space<vmem>>, vector<1x16x128xf32>,
      %613 = arith.mulf %561, %604 : vector<16x128xf32>
      %c2_77 = arith.constant 2 : index
      %c0_78 = arith.constant 0 : index
      %c0_79 = arith.constant 0 : index
      %614 = vector.load %arg5[%c2_77, %c0_78, %c0_79] : memref<16x16x128xf32, #tpu.memory_space<vmem>>, vector<1x16x128xf32>
      %615 = vector.shape_cast %614 : vector<1x16x128xf32> to vector<16x128xf32>
      %616 = vector.shape_cast %613 : vector<16x128xf32> to vector<1x16x128xf32>
      tpu.vector_store %arg5[%c2_77, %c0_78, %c0_79], %616 {strides = array<i32>} : memref<16x16x128xf32, #tpu.memory_space<vmem>>, vector<1x16x128xf32>,
      %617 = arith.mulf %563, %604 : vector<16x128xf32>
      %c3_80 = arith.constant 3 : index
      %c0_81 = arith.constant 0 : index
      %c0_82 = arith.constant 0 : index
      %618 = vector.load %arg5[%c3_80, %c0_81, %c0_82] : memref<16x16x128xf32, #tpu.memory_space<vmem>>, vector<1x16x128xf32>
      %619 = vector.shape_cast %618 : vector<1x16x128xf32> to vector<16x128xf32>
      %620 = vector.shape_cast %617 : vector<16x128xf32> to vector<1x16x128xf32>
      tpu.vector_store %arg5[%c3_80, %c0_81, %c0_82], %620 {strides = array<i32>} : memref<16x16x128xf32, #tpu.memory_space<vmem>>, vector<1x16x128xf32>,
      %621 = arith.mulf %565, %604 : vector<16x128xf32>
      %c4_83 = arith.constant 4 : index
      %c0_84 = arith.constant 0 : index
      %c0_85 = arith.constant 0 : index
      %622 = vector.load %arg5[%c4_83, %c0_84, %c0_85] : memref<16x16x128xf32, #tpu.memory_space<vmem>>, vector<1x16x128xf32>
      %623 = vector.shape_cast %622 : vector<1x16x128xf32> to vector<16x128xf32>
      %624 = vector.shape_cast %621 : vector<16x128xf32> to vector<1x16x128xf32>
      tpu.vector_store %arg5[%c4_83, %c0_84, %c0_85], %624 {strides = array<i32>} : memref<16x16x128xf32, #tpu.memory_space<vmem>>, vector<1x16x128xf32>,
      %625 = arith.mulf %567, %604 : vector<16x128xf32>
      %c5_86 = arith.constant 5 : index
      %c0_87 = arith.constant 0 : index
      %c0_88 = arith.constant 0 : index
      %626 = vector.load %arg5[%c5_86, %c0_87, %c0_88] : memref<16x16x128xf32, #tpu.memory_space<vmem>>, vector<1x16x128xf32>
      %627 = vector.shape_cast %626 : vector<1x16x128xf32> to vector<16x128xf32>
      %628 = vector.shape_cast %625 : vector<16x128xf32> to vector<1x16x128xf32>
      tpu.vector_store %arg5[%c5_86, %c0_87, %c0_88], %628 {strides = array<i32>} : memref<16x16x128xf32, #tpu.memory_space<vmem>>, vector<1x16x128xf32>,
      %629 = arith.mulf %569, %604 : vector<16x128xf32>
      %c6_89 = arith.constant 6 : index
      %c0_90 = arith.constant 0 : index
      %c0_91 = arith.constant 0 : index
      %630 = vector.load %arg5[%c6_89, %c0_90, %c0_91] : memref<16x16x128xf32, #tpu.memory_space<vmem>>, vector<1x16x128xf32>
      %631 = vector.shape_cast %630 : vector<1x16x128xf32> to vector<16x128xf32>
      %632 = vector.shape_cast %629 : vector<16x128xf32> to vector<1x16x128xf32>
      tpu.vector_store %arg5[%c6_89, %c0_90, %c0_91], %632 {strides = array<i32>} : memref<16x16x128xf32, #tpu.memory_space<vmem>>, vector<1x16x128xf32>,
      %633 = arith.mulf %571, %604 : vector<16x128xf32>
      %c7_92 = arith.constant 7 : index
      %c0_93 = arith.constant 0 : index
      %c0_94 = arith.constant 0 : index
      %634 = vector.load %arg5[%c7_92, %c0_93, %c0_94] : memref<16x16x128xf32, #tpu.memory_space<vmem>>, vector<1x16x128xf32>
      %635 = vector.shape_cast %634 : vector<1x16x128xf32> to vector<16x128xf32>
      %636 = vector.shape_cast %633 : vector<16x128xf32> to vector<1x16x128xf32>
      tpu.vector_store %arg5[%c7_92, %c0_93, %c0_94], %636 {strides = array<i32>} : memref<16x16x128xf32, #tpu.memory_space<vmem>>, vector<1x16x128xf32>,
      %637 = arith.mulf %573, %604 : vector<16x128xf32>
      %c8_95 = arith.constant 8 : index
      %c0_96 = arith.constant 0 : index
      %c0_97 = arith.constant 0 : index
      %638 = vector.load %arg5[%c8_95, %c0_96, %c0_97] : memref<16x16x128xf32, #tpu.memory_space<vmem>>, vector<1x16x128xf32>
      %639 = vector.shape_cast %638 : vector<1x16x128xf32> to vector<16x128xf32>
      %640 = vector.shape_cast %637 : vector<16x128xf32> to vector<1x16x128xf32>
      tpu.vector_store %arg5[%c8_95, %c0_96, %c0_97], %640 {strides = array<i32>} : memref<16x16x128xf32, #tpu.memory_space<vmem>>, vector<1x16x128xf32>,
      %641 = arith.mulf %575, %604 : vector<16x128xf32>
      %c9_98 = arith.constant 9 : index
      %c0_99 = arith.constant 0 : index
      %c0_100 = arith.constant 0 : index
      %642 = vector.load %arg5[%c9_98, %c0_99, %c0_100] : memref<16x16x128xf32, #tpu.memory_space<vmem>>, vector<1x16x128xf32>
      %643 = vector.shape_cast %642 : vector<1x16x128xf32> to vector<16x128xf32>
      %644 = vector.shape_cast %641 : vector<16x128xf32> to vector<1x16x128xf32>
      tpu.vector_store %arg5[%c9_98, %c0_99, %c0_100], %644 {strides = array<i32>} : memref<16x16x128xf32, #tpu.memory_space<vmem>>, vector<1x16x128xf32>,
      %645 = arith.mulf %577, %604 : vector<16x128xf32>
      %c10_101 = arith.constant 10 : index
      %c0_102 = arith.constant 0 : index
      %c0_103 = arith.constant 0 : index
      %646 = vector.load %arg5[%c10_101, %c0_102, %c0_103] : memref<16x16x128xf32, #tpu.memory_space<vmem>>, vector<1x16x128xf32>
      %647 = vector.shape_cast %646 : vector<1x16x128xf32> to vector<16x128xf32>
      %648 = vector.shape_cast %645 : vector<16x128xf32> to vector<1x16x128xf32>
      tpu.vector_store %arg5[%c10_101, %c0_102, %c0_103], %648 {strides = array<i32>} : memref<16x16x128xf32, #tpu.memory_space<vmem>>, vector<1x16x128xf32>,
      %649 = arith.mulf %579, %604 : vector<16x128xf32>
      %c11_104 = arith.constant 11 : index
      %c0_105 = arith.constant 0 : index
      %c0_106 = arith.constant 0 : index
      %650 = vector.load %arg5[%c11_104, %c0_105, %c0_106] : memref<16x16x128xf32, #tpu.memory_space<vmem>>, vector<1x16x128xf32>
      %651 = vector.shape_cast %650 : vector<1x16x128xf32> to vector<16x128xf32>
      %652 = vector.shape_cast %649 : vector<16x128xf32> to vector<1x16x128xf32>
      tpu.vector_store %arg5[%c11_104, %c0_105, %c0_106], %652 {strides = array<i32>} : memref<16x16x128xf32, #tpu.memory_space<vmem>>, vector<1x16x128xf32>,
      %653 = arith.mulf %581, %604 : vector<16x128xf32>
      %c12_107 = arith.constant 12 : index
      %c0_108 = arith.constant 0 : index
      %c0_109 = arith.constant 0 : index
      %654 = vector.load %arg5[%c12_107, %c0_108, %c0_109] : memref<16x16x128xf32, #tpu.memory_space<vmem>>, vector<1x16x128xf32>
      %655 = vector.shape_cast %654 : vector<1x16x128xf32> to vector<16x128xf32>
      %656 = vector.shape_cast %653 : vector<16x128xf32> to vector<1x16x128xf32>
      tpu.vector_store %arg5[%c12_107, %c0_108, %c0_109], %656 {strides = array<i32>} : memref<16x16x128xf32, #tpu.memory_space<vmem>>, vector<1x16x128xf32>,
      %657 = arith.mulf %583, %604 : vector<16x128xf32>
      %c13_110 = arith.constant 13 : index
      %c0_111 = arith.constant 0 : index
      %c0_112 = arith.constant 0 : index
      %658 = vector.load %arg5[%c13_110, %c0_111, %c0_112] : memref<16x16x128xf32, #tpu.memory_space<vmem>>, vector<1x16x128xf32>
      %659 = vector.shape_cast %658 : vector<1x16x128xf32> to vector<16x128xf32>
      %660 = vector.shape_cast %657 : vector<16x128xf32> to vector<1x16x128xf32>
      tpu.vector_store %arg5[%c13_110, %c0_111, %c0_112], %660 {strides = array<i32>} : memref<16x16x128xf32, #tpu.memory_space<vmem>>, vector<1x16x128xf32>,
      %661 = arith.mulf %585, %604 : vector<16x128xf32>
      %c14_113 = arith.constant 14 : index
      %c0_114 = arith.constant 0 : index
      %c0_115 = arith.constant 0 : index
      %662 = vector.load %arg5[%c14_113, %c0_114, %c0_115] : memref<16x16x128xf32, #tpu.memory_space<vmem>>, vector<1x16x128xf32>
      %663 = vector.shape_cast %662 : vector<1x16x128xf32> to vector<16x128xf32>
      %664 = vector.shape_cast %661 : vector<16x128xf32> to vector<1x16x128xf32>
      tpu.vector_store %arg5[%c14_113, %c0_114, %c0_115], %664 {strides = array<i32>} : memref<16x16x128xf32, #tpu.memory_space<vmem>>, vector<1x16x128xf32>,
      %665 = arith.mulf %587, %604 : vector<16x128xf32>
      %c15_116 = arith.constant 15 : index
      %c0_117 = arith.constant 0 : index
      %c0_118 = arith.constant 0 : index
      %666 = vector.load %arg5[%c15_116, %c0_117, %c0_118] : memref<16x16x128xf32, #tpu.memory_space<vmem>>, vector<1x16x128xf32>
      %667 = vector.shape_cast %666 : vector<1x16x128xf32> to vector<16x128xf32>
      %668 = vector.shape_cast %665 : vector<16x128xf32> to vector<1x16x128xf32>
      tpu.vector_store %arg5[%c15_116, %c0_117, %c0_118], %668 {strides = array<i32>} : memref<16x16x128xf32, #tpu.memory_space<vmem>>, vector<1x16x128xf32>,
    } else {
    }
    %c0 = arith.constant 0 : index
    %c0_1 = arith.constant 0 : index
    %c0_2 = arith.constant 0 : index
    %3 = vector.load %arg5[%c0, %c0_1, %c0_2] : memref<16x16x128xf32, #tpu.memory_space<vmem>>, vector<1x16x128xf32>
    %4 = vector.shape_cast %3 : vector<1x16x128xf32> to vector<16x128xf32>
    %c1 = arith.constant 1 : index
    %c0_3 = arith.constant 0 : index
    %c0_4 = arith.constant 0 : index
    %5 = vector.load %arg5[%c1, %c0_3, %c0_4] : memref<16x16x128xf32, #tpu.memory_space<vmem>>, vector<1x16x128xf32>
    %6 = vector.shape_cast %5 : vector<1x16x128xf32> to vector<16x128xf32>
    %c2 = arith.constant 2 : index
    %c0_5 = arith.constant 0 : index
    %c0_6 = arith.constant 0 : index
    %7 = vector.load %arg5[%c2, %c0_5, %c0_6] : memref<16x16x128xf32, #tpu.memory_space<vmem>>, vector<1x16x128xf32>
    %8 = vector.shape_cast %7 : vector<1x16x128xf32> to vector<16x128xf32>
    %c3 = arith.constant 3 : index
    %c0_7 = arith.constant 0 : index
    %c0_8 = arith.constant 0 : index
    %9 = vector.load %arg5[%c3, %c0_7, %c0_8] : memref<16x16x128xf32, #tpu.memory_space<vmem>>, vector<1x16x128xf32>
    %10 = vector.shape_cast %9 : vector<1x16x128xf32> to vector<16x128xf32>
    %c4 = arith.constant 4 : index
    %c0_9 = arith.constant 0 : index
    %c0_10 = arith.constant 0 : index
    %11 = vector.load %arg5[%c4, %c0_9, %c0_10] : memref<16x16x128xf32, #tpu.memory_space<vmem>>, vector<1x16x128xf32>
    %12 = vector.shape_cast %11 : vector<1x16x128xf32> to vector<16x128xf32>
    %c5 = arith.constant 5 : index
    %c0_11 = arith.constant 0 : index
    %c0_12 = arith.constant 0 : index
    %13 = vector.load %arg5[%c5, %c0_11, %c0_12] : memref<16x16x128xf32, #tpu.memory_space<vmem>>, vector<1x16x128xf32>
    %14 = vector.shape_cast %13 : vector<1x16x128xf32> to vector<16x128xf32>
    %c6 = arith.constant 6 : index
    %c0_13 = arith.constant 0 : index
    %c0_14 = arith.constant 0 : index
    %15 = vector.load %arg5[%c6, %c0_13, %c0_14] : memref<16x16x128xf32, #tpu.memory_space<vmem>>, vector<1x16x128xf32>
    %16 = vector.shape_cast %15 : vector<1x16x128xf32> to vector<16x128xf32>
    %c7 = arith.constant 7 : index
    %c0_15 = arith.constant 0 : index
    %c0_16 = arith.constant 0 : index
    %17 = vector.load %arg5[%c7, %c0_15, %c0_16] : memref<16x16x128xf32, #tpu.memory_space<vmem>>, vector<1x16x128xf32>
    %18 = vector.shape_cast %17 : vector<1x16x128xf32> to vector<16x128xf32>
    %c8 = arith.constant 8 : index
    %c0_17 = arith.constant 0 : index
    %c0_18 = arith.constant 0 : index
    %19 = vector.load %arg5[%c8, %c0_17, %c0_18] : memref<16x16x128xf32, #tpu.memory_space<vmem>>, vector<1x16x128xf32>
    %20 = vector.shape_cast %19 : vector<1x16x128xf32> to vector<16x128xf32>
    %c9 = arith.constant 9 : index
    %c0_19 = arith.constant 0 : index
    %c0_20 = arith.constant 0 : index
    %21 = vector.load %arg5[%c9, %c0_19, %c0_20] : memref<16x16x128xf32, #tpu.memory_space<vmem>>, vector<1x16x128xf32>
    %22 = vector.shape_cast %21 : vector<1x16x128xf32> to vector<16x128xf32>
    %c10 = arith.constant 10 : index
    %c0_21 = arith.constant 0 : index
    %c0_22 = arith.constant 0 : index
    %23 = vector.load %arg5[%c10, %c0_21, %c0_22] : memref<16x16x128xf32, #tpu.memory_space<vmem>>, vector<1x16x128xf32>
    %24 = vector.shape_cast %23 : vector<1x16x128xf32> to vector<16x128xf32>
    %c11 = arith.constant 11 : index
    %c0_23 = arith.constant 0 : index
    %c0_24 = arith.constant 0 : index
    %25 = vector.load %arg5[%c11, %c0_23, %c0_24] : memref<16x16x128xf32, #tpu.memory_space<vmem>>, vector<1x16x128xf32>
    %26 = vector.shape_cast %25 : vector<1x16x128xf32> to vector<16x128xf32>
    %c12 = arith.constant 12 : index
    %c0_25 = arith.constant 0 : index
    %c0_26 = arith.constant 0 : index
    %27 = vector.load %arg5[%c12, %c0_25, %c0_26] : memref<16x16x128xf32, #tpu.memory_space<vmem>>, vector<1x16x128xf32>
    %28 = vector.shape_cast %27 : vector<1x16x128xf32> to vector<16x128xf32>
    %c13 = arith.constant 13 : index
    %c0_27 = arith.constant 0 : index
    %c0_28 = arith.constant 0 : index
    %29 = vector.load %arg5[%c13, %c0_27, %c0_28] : memref<16x16x128xf32, #tpu.memory_space<vmem>>, vector<1x16x128xf32>
    %30 = vector.shape_cast %29 : vector<1x16x128xf32> to vector<16x128xf32>
    %c14 = arith.constant 14 : index
    %c0_29 = arith.constant 0 : index
    %c0_30 = arith.constant 0 : index
    %31 = vector.load %arg5[%c14, %c0_29, %c0_30] : memref<16x16x128xf32, #tpu.memory_space<vmem>>, vector<1x16x128xf32>
    %32 = vector.shape_cast %31 : vector<1x16x128xf32> to vector<16x128xf32>
    %c15 = arith.constant 15 : index
    %c0_31 = arith.constant 0 : index
    %c0_32 = arith.constant 0 : index
    %33 = vector.load %arg5[%c15, %c0_31, %c0_32] : memref<16x16x128xf32, #tpu.memory_space<vmem>>, vector<1x16x128xf32>
    %34 = vector.shape_cast %33 : vector<1x16x128xf32> to vector<16x128xf32>
    %c0_33 = arith.constant 0 : index
    %c0_34 = arith.constant 0 : index
    %c0_35 = arith.constant 0 : index
    %c0_36 = arith.constant 0 : index
    %35 = vector.load %arg3[%c0_33, %c0_34, %c0_35, %c0_36] : memref<1x2x16x128xf32, #tpu.memory_space<vmem>>, vector<1x2x16x128xf32>
    %36 = vector.shape_cast %35 : vector<1x2x16x128xf32> to vector<2x16x128xf32>
    %37 = vector.extract_strided_slice %36 {offsets = [0, 0, 0], sizes = [2, 16, 1], strides = [1, 1, 1]} : vector<2x16x128xf32> to vector<2x16x1xf32>
    %38 = vector.shape_cast %37 : vector<2x16x1xf32> to vector<2x16x1xf32>
    %39 = vector.broadcast %38 : vector<2x16x1xf32> to vector<2x16x2xf32>
    %40 = vector.extract_strided_slice %36 {offsets = [0, 0, 0], sizes = [2, 16, 126], strides = [1, 1, 1]} : vector<2x16x128xf32> to vector<2x16x126xf32>
    %41 = tpu.concatenate %39, %40 in 2 : vector<2x16x2xf32>, vector<2x16x126xf32> -> vector<2x16x128xf32>
    %42 = vector.extract_strided_slice %36 {offsets = [0, 0, 0], sizes = [2, 16, 1], strides = [1, 1, 1]} : vector<2x16x128xf32> to vector<2x16x1xf32>
    %43 = vector.extract_strided_slice %36 {offsets = [0, 0, 0], sizes = [2, 16, 127], strides = [1, 1, 1]} : vector<2x16x128xf32> to vector<2x16x127xf32>
    %44 = tpu.concatenate %42, %43 in 2 : vector<2x16x1xf32>, vector<2x16x127xf32> -> vector<2x16x128xf32>
    %45 = vector.extract_strided_slice %36 {offsets = [0, 0, 127], sizes = [2, 16, 1], strides = [1, 1, 1]} : vector<2x16x128xf32> to vector<2x16x1xf32>
    %46 = vector.extract_strided_slice %36 {offsets = [0, 0, 1], sizes = [2, 16, 127], strides = [1, 1, 1]} : vector<2x16x128xf32> to vector<2x16x127xf32>
    %47 = tpu.concatenate %46, %45 in 2 : vector<2x16x127xf32>, vector<2x16x1xf32> -> vector<2x16x128xf32>
    %48 = vector.extract_strided_slice %36 {offsets = [0, 0, 127], sizes = [2, 16, 1], strides = [1, 1, 1]} : vector<2x16x128xf32> to vector<2x16x1xf32>
    %49 = vector.shape_cast %48 : vector<2x16x1xf32> to vector<2x16x1xf32>
    %50 = vector.broadcast %49 : vector<2x16x1xf32> to vector<2x16x2xf32>
    %51 = vector.extract_strided_slice %36 {offsets = [0, 0, 2], sizes = [2, 16, 126], strides = [1, 1, 1]} : vector<2x16x128xf32> to vector<2x16x126xf32>
    %52 = tpu.concatenate %51, %50 in 2 : vector<2x16x126xf32>, vector<2x16x2xf32> -> vector<2x16x128xf32>
    %cst = arith.constant 0.000000e+00 : f32
    %53 = vector.broadcast %cst : f32 to vector<2x16x128xf32>
    %54 = vector.extract_strided_slice %44 {offsets = [0, 0, 0], sizes = [2, 1, 128], strides = [1, 1, 1]} : vector<2x16x128xf32> to vector<2x1x128xf32>
    %55 = vector.extract_strided_slice %44 {offsets = [0, 0, 0], sizes = [2, 15, 128], strides = [1, 1, 1]} : vector<2x16x128xf32> to vector<2x15x128xf32>
    %56 = tpu.concatenate %54, %55 in 1 : vector<2x1x128xf32>, vector<2x15x128xf32> -> vector<2x16x128xf32>
    %57 = vector.shape_cast %4 : vector<16x128xf32> to vector<1x16x128xf32>
    %58 = vector.broadcast %57 : vector<1x16x128xf32> to vector<2x16x128xf32>
    %59 = arith.mulf %56, %58 : vector<2x16x128xf32>
    %60 = arith.addf %53, %59 : vector<2x16x128xf32>
    %61 = vector.extract_strided_slice %36 {offsets = [0, 0, 0], sizes = [2, 1, 128], strides = [1, 1, 1]} : vector<2x16x128xf32> to vector<2x1x128xf32>
    %62 = vector.extract_strided_slice %36 {offsets = [0, 0, 0], sizes = [2, 15, 128], strides = [1, 1, 1]} : vector<2x16x128xf32> to vector<2x15x128xf32>
    %63 = tpu.concatenate %61, %62 in 1 : vector<2x1x128xf32>, vector<2x15x128xf32> -> vector<2x16x128xf32>
    %64 = vector.shape_cast %6 : vector<16x128xf32> to vector<1x16x128xf32>
    %65 = vector.broadcast %64 : vector<1x16x128xf32> to vector<2x16x128xf32>
    %66 = arith.mulf %63, %65 : vector<2x16x128xf32>
    %67 = arith.addf %60, %66 : vector<2x16x128xf32>
    %68 = vector.extract_strided_slice %47 {offsets = [0, 0, 0], sizes = [2, 1, 128], strides = [1, 1, 1]} : vector<2x16x128xf32> to vector<2x1x128xf32>
    %69 = vector.extract_strided_slice %47 {offsets = [0, 0, 0], sizes = [2, 15, 128], strides = [1, 1, 1]} : vector<2x16x128xf32> to vector<2x15x128xf32>
    %70 = tpu.concatenate %68, %69 in 1 : vector<2x1x128xf32>, vector<2x15x128xf32> -> vector<2x16x128xf32>
    %71 = vector.shape_cast %8 : vector<16x128xf32> to vector<1x16x128xf32>
    %72 = vector.broadcast %71 : vector<1x16x128xf32> to vector<2x16x128xf32>
    %73 = arith.mulf %70, %72 : vector<2x16x128xf32>
    %74 = arith.addf %67, %73 : vector<2x16x128xf32>
    %75 = vector.shape_cast %10 : vector<16x128xf32> to vector<1x16x128xf32>
    %76 = vector.broadcast %75 : vector<1x16x128xf32> to vector<2x16x128xf32>
    %77 = arith.mulf %44, %76 : vector<2x16x128xf32>
    %78 = arith.addf %74, %77 : vector<2x16x128xf32>
    %79 = vector.shape_cast %12 : vector<16x128xf32> to vector<1x16x128xf32>
    %80 = vector.broadcast %79 : vector<1x16x128xf32> to vector<2x16x128xf32>
    %81 = arith.mulf %47, %80 : vector<2x16x128xf32>
    %82 = arith.addf %78, %81 : vector<2x16x128xf32>
    %83 = vector.extract_strided_slice %44 {offsets = [0, 15, 0], sizes = [2, 1, 128], strides = [1, 1, 1]} : vector<2x16x128xf32> to vector<2x1x128xf32>
    %84 = vector.extract_strided_slice %44 {offsets = [0, 1, 0], sizes = [2, 15, 128], strides = [1, 1, 1]} : vector<2x16x128xf32> to vector<2x15x128xf32>
    %85 = tpu.concatenate %84, %83 in 1 : vector<2x15x128xf32>, vector<2x1x128xf32> -> vector<2x16x128xf32>
    %86 = vector.shape_cast %14 : vector<16x128xf32> to vector<1x16x128xf32>
    %87 = vector.broadcast %86 : vector<1x16x128xf32> to vector<2x16x128xf32>
    %88 = arith.mulf %85, %87 : vector<2x16x128xf32>
    %89 = arith.addf %82, %88 : vector<2x16x128xf32>
    %90 = vector.extract_strided_slice %36 {offsets = [0, 15, 0], sizes = [2, 1, 128], strides = [1, 1, 1]} : vector<2x16x128xf32> to vector<2x1x128xf32>
    %91 = vector.extract_strided_slice %36 {offsets = [0, 1, 0], sizes = [2, 15, 128], strides = [1, 1, 1]} : vector<2x16x128xf32> to vector<2x15x128xf32>
    %92 = tpu.concatenate %91, %90 in 1 : vector<2x15x128xf32>, vector<2x1x128xf32> -> vector<2x16x128xf32>
    %93 = vector.shape_cast %16 : vector<16x128xf32> to vector<1x16x128xf32>
    %94 = vector.broadcast %93 : vector<1x16x128xf32> to vector<2x16x128xf32>
    %95 = arith.mulf %92, %94 : vector<2x16x128xf32>
    %96 = arith.addf %89, %95 : vector<2x16x128xf32>
    %97 = vector.extract_strided_slice %47 {offsets = [0, 15, 0], sizes = [2, 1, 128], strides = [1, 1, 1]} : vector<2x16x128xf32> to vector<2x1x128xf32>
    %98 = vector.extract_strided_slice %47 {offsets = [0, 1, 0], sizes = [2, 15, 128], strides = [1, 1, 1]} : vector<2x16x128xf32> to vector<2x15x128xf32>
    %99 = tpu.concatenate %98, %97 in 1 : vector<2x15x128xf32>, vector<2x1x128xf32> -> vector<2x16x128xf32>
    %100 = vector.shape_cast %18 : vector<16x128xf32> to vector<1x16x128xf32>
    %101 = vector.broadcast %100 : vector<1x16x128xf32> to vector<2x16x128xf32>
    %102 = arith.mulf %99, %101 : vector<2x16x128xf32>
    %103 = arith.addf %96, %102 : vector<2x16x128xf32>
    %104 = vector.extract_strided_slice %41 {offsets = [0, 0, 0], sizes = [2, 1, 128], strides = [1, 1, 1]} : vector<2x16x128xf32> to vector<2x1x128xf32>
    %105 = vector.shape_cast %104 : vector<2x1x128xf32> to vector<2x1x128xf32>
    %106 = vector.broadcast %105 : vector<2x1x128xf32> to vector<2x2x128xf32>
    %107 = vector.extract_strided_slice %41 {offsets = [0, 0, 0], sizes = [2, 14, 128], strides = [1, 1, 1]} : vector<2x16x128xf32> to vector<2x14x128xf32>
    %108 = tpu.concatenate %106, %107 in 1 : vector<2x2x128xf32>, vector<2x14x128xf32> -> vector<2x16x128xf32>
    %109 = vector.shape_cast %20 : vector<16x128xf32> to vector<1x16x128xf32>
    %110 = vector.broadcast %109 : vector<1x16x128xf32> to vector<2x16x128xf32>
    %111 = arith.mulf %108, %110 : vector<2x16x128xf32>
    %112 = arith.addf %103, %111 : vector<2x16x128xf32>
    %113 = vector.extract_strided_slice %36 {offsets = [0, 0, 0], sizes = [2, 1, 128], strides = [1, 1, 1]} : vector<2x16x128xf32> to vector<2x1x128xf32>
    %114 = vector.shape_cast %113 : vector<2x1x128xf32> to vector<2x1x128xf32>
    %115 = vector.broadcast %114 : vector<2x1x128xf32> to vector<2x2x128xf32>
    %116 = vector.extract_strided_slice %36 {offsets = [0, 0, 0], sizes = [2, 14, 128], strides = [1, 1, 1]} : vector<2x16x128xf32> to vector<2x14x128xf32>
    %117 = tpu.concatenate %115, %116 in 1 : vector<2x2x128xf32>, vector<2x14x128xf32> -> vector<2x16x128xf32>
    %118 = vector.shape_cast %22 : vector<16x128xf32> to vector<1x16x128xf32>
    %119 = vector.broadcast %118 : vector<1x16x128xf32> to vector<2x16x128xf32>
    %120 = arith.mulf %117, %119 : vector<2x16x128xf32>
    %121 = arith.addf %112, %120 : vector<2x16x128xf32>
    %122 = vector.extract_strided_slice %52 {offsets = [0, 0, 0], sizes = [2, 1, 128], strides = [1, 1, 1]} : vector<2x16x128xf32> to vector<2x1x128xf32>
    %123 = vector.shape_cast %122 : vector<2x1x128xf32> to vector<2x1x128xf32>
    %124 = vector.broadcast %123 : vector<2x1x128xf32> to vector<2x2x128xf32>
    %125 = vector.extract_strided_slice %52 {offsets = [0, 0, 0], sizes = [2, 14, 128], strides = [1, 1, 1]} : vector<2x16x128xf32> to vector<2x14x128xf32>
    %126 = tpu.concatenate %124, %125 in 1 : vector<2x2x128xf32>, vector<2x14x128xf32> -> vector<2x16x128xf32>
    %127 = vector.shape_cast %24 : vector<16x128xf32> to vector<1x16x128xf32>
    %128 = vector.broadcast %127 : vector<1x16x128xf32> to vector<2x16x128xf32>
    %129 = arith.mulf %126, %128 : vector<2x16x128xf32>
    %130 = arith.addf %121, %129 : vector<2x16x128xf32>
    %131 = vector.shape_cast %26 : vector<16x128xf32> to vector<1x16x128xf32>
    %132 = vector.broadcast %131 : vector<1x16x128xf32> to vector<2x16x128xf32>
    %133 = arith.mulf %41, %132 : vector<2x16x128xf32>
    %134 = arith.addf %130, %133 : vector<2x16x128xf32>
    %135 = vector.shape_cast %28 : vector<16x128xf32> to vector<1x16x128xf32>
    %136 = vector.broadcast %135 : vector<1x16x128xf32> to vector<2x16x128xf32>
    %137 = arith.mulf %52, %136 : vector<2x16x128xf32>
    %138 = arith.addf %134, %137 : vector<2x16x128xf32>
    %139 = vector.extract_strided_slice %41 {offsets = [0, 15, 0], sizes = [2, 1, 128], strides = [1, 1, 1]} : vector<2x16x128xf32> to vector<2x1x128xf32>
    %140 = vector.shape_cast %139 : vector<2x1x128xf32> to vector<2x1x128xf32>
    %141 = vector.broadcast %140 : vector<2x1x128xf32> to vector<2x2x128xf32>
    %142 = vector.extract_strided_slice %41 {offsets = [0, 2, 0], sizes = [2, 14, 128], strides = [1, 1, 1]} : vector<2x16x128xf32> to vector<2x14x128xf32>
    %143 = tpu.concatenate %142, %141 in 1 : vector<2x14x128xf32>, vector<2x2x128xf32> -> vector<2x16x128xf32>
    %144 = vector.shape_cast %30 : vector<16x128xf32> to vector<1x16x128xf32>
    %145 = vector.broadcast %144 : vector<1x16x128xf32> to vector<2x16x128xf32>
    %146 = arith.mulf %143, %145 : vector<2x16x128xf32>
    %147 = arith.addf %138, %146 : vector<2x16x128xf32>
    %148 = vector.extract_strided_slice %36 {offsets = [0, 15, 0], sizes = [2, 1, 128], strides = [1, 1, 1]} : vector<2x16x128xf32> to vector<2x1x128xf32>
    %149 = vector.shape_cast %148 : vector<2x1x128xf32> to vector<2x1x128xf32>
    %150 = vector.broadcast %149 : vector<2x1x128xf32> to vector<2x2x128xf32>
    %151 = vector.extract_strided_slice %36 {offsets = [0, 2, 0], sizes = [2, 14, 128], strides = [1, 1, 1]} : vector<2x16x128xf32> to vector<2x14x128xf32>
    %152 = tpu.concatenate %151, %150 in 1 : vector<2x14x128xf32>, vector<2x2x128xf32> -> vector<2x16x128xf32>
    %153 = vector.shape_cast %32 : vector<16x128xf32> to vector<1x16x128xf32>
    %154 = vector.broadcast %153 : vector<1x16x128xf32> to vector<2x16x128xf32>
    %155 = arith.mulf %152, %154 : vector<2x16x128xf32>
    %156 = arith.addf %147, %155 : vector<2x16x128xf32>
    %157 = vector.extract_strided_slice %52 {offsets = [0, 15, 0], sizes = [2, 1, 128], strides = [1, 1, 1]} : vector<2x16x128xf32> to vector<2x1x128xf32>
    %158 = vector.shape_cast %157 : vector<2x1x128xf32> to vector<2x1x128xf32>
    %159 = vector.broadcast %158 : vector<2x1x128xf32> to vector<2x2x128xf32>
    %160 = vector.extract_strided_slice %52 {offsets = [0, 2, 0], sizes = [2, 14, 128], strides = [1, 1, 1]} : vector<2x16x128xf32> to vector<2x14x128xf32>
    %161 = tpu.concatenate %160, %159 in 1 : vector<2x14x128xf32>, vector<2x2x128xf32> -> vector<2x16x128xf32>
    %162 = vector.shape_cast %34 : vector<16x128xf32> to vector<1x16x128xf32>
    %163 = vector.broadcast %162 : vector<1x16x128xf32> to vector<2x16x128xf32>
    %164 = arith.mulf %161, %163 : vector<2x16x128xf32>
    %165 = arith.addf %156, %164 : vector<2x16x128xf32>
    %166 = vector.extract_strided_slice %165 {offsets = [0, 0, 0], sizes = [2, 16, 1], strides = [1, 1, 1]} : vector<2x16x128xf32> to vector<2x16x1xf32>
    %167 = vector.shape_cast %166 : vector<2x16x1xf32> to vector<2x16x1xf32>
    %168 = vector.broadcast %167 : vector<2x16x1xf32> to vector<2x16x2xf32>
    %169 = vector.extract_strided_slice %165 {offsets = [0, 0, 0], sizes = [2, 16, 126], strides = [1, 1, 1]} : vector<2x16x128xf32> to vector<2x16x126xf32>
    %170 = tpu.concatenate %168, %169 in 2 : vector<2x16x2xf32>, vector<2x16x126xf32> -> vector<2x16x128xf32>
    %171 = vector.extract_strided_slice %165 {offsets = [0, 0, 0], sizes = [2, 16, 1], strides = [1, 1, 1]} : vector<2x16x128xf32> to vector<2x16x1xf32>
    %172 = vector.extract_strided_slice %165 {offsets = [0, 0, 0], sizes = [2, 16, 127], strides = [1, 1, 1]} : vector<2x16x128xf32> to vector<2x16x127xf32>
    %173 = tpu.concatenate %171, %172 in 2 : vector<2x16x1xf32>, vector<2x16x127xf32> -> vector<2x16x128xf32>
    %174 = vector.extract_strided_slice %165 {offsets = [0, 0, 127], sizes = [2, 16, 1], strides = [1, 1, 1]} : vector<2x16x128xf32> to vector<2x16x1xf32>
    %175 = vector.extract_strided_slice %165 {offsets = [0, 0, 1], sizes = [2, 16, 127], strides = [1, 1, 1]} : vector<2x16x128xf32> to vector<2x16x127xf32>
    %176 = tpu.concatenate %175, %174 in 2 : vector<2x16x127xf32>, vector<2x16x1xf32> -> vector<2x16x128xf32>
    %177 = vector.extract_strided_slice %165 {offsets = [0, 0, 127], sizes = [2, 16, 1], strides = [1, 1, 1]} : vector<2x16x128xf32> to vector<2x16x1xf32>
    %178 = vector.shape_cast %177 : vector<2x16x1xf32> to vector<2x16x1xf32>
    %179 = vector.broadcast %178 : vector<2x16x1xf32> to vector<2x16x2xf32>
    %180 = vector.extract_strided_slice %165 {offsets = [0, 0, 2], sizes = [2, 16, 126], strides = [1, 1, 1]} : vector<2x16x128xf32> to vector<2x16x126xf32>
    %181 = tpu.concatenate %180, %179 in 2 : vector<2x16x126xf32>, vector<2x16x2xf32> -> vector<2x16x128xf32>
    %cst_37 = arith.constant 0.000000e+00 : f32
    %182 = vector.broadcast %cst_37 : f32 to vector<2x16x128xf32>
    %183 = vector.extract_strided_slice %173 {offsets = [0, 0, 0], sizes = [2, 1, 128], strides = [1, 1, 1]} : vector<2x16x128xf32> to vector<2x1x128xf32>
    %184 = vector.extract_strided_slice %173 {offsets = [0, 0, 0], sizes = [2, 15, 128], strides = [1, 1, 1]} : vector<2x16x128xf32> to vector<2x15x128xf32>
    %185 = tpu.concatenate %183, %184 in 1 : vector<2x1x128xf32>, vector<2x15x128xf32> -> vector<2x16x128xf32>
    %186 = vector.shape_cast %4 : vector<16x128xf32> to vector<1x16x128xf32>
    %187 = vector.broadcast %186 : vector<1x16x128xf32> to vector<2x16x128xf32>
    %188 = arith.mulf %185, %187 : vector<2x16x128xf32>
    %189 = arith.addf %182, %188 : vector<2x16x128xf32>
    %190 = vector.extract_strided_slice %165 {offsets = [0, 0, 0], sizes = [2, 1, 128], strides = [1, 1, 1]} : vector<2x16x128xf32> to vector<2x1x128xf32>
    %191 = vector.extract_strided_slice %165 {offsets = [0, 0, 0], sizes = [2, 15, 128], strides = [1, 1, 1]} : vector<2x16x128xf32> to vector<2x15x128xf32>
    %192 = tpu.concatenate %190, %191 in 1 : vector<2x1x128xf32>, vector<2x15x128xf32> -> vector<2x16x128xf32>
    %193 = vector.shape_cast %6 : vector<16x128xf32> to vector<1x16x128xf32>
    %194 = vector.broadcast %193 : vector<1x16x128xf32> to vector<2x16x128xf32>
    %195 = arith.mulf %192, %194 : vector<2x16x128xf32>
    %196 = arith.addf %189, %195 : vector<2x16x128xf32>
    %197 = vector.extract_strided_slice %176 {offsets = [0, 0, 0], sizes = [2, 1, 128], strides = [1, 1, 1]} : vector<2x16x128xf32> to vector<2x1x128xf32>
    %198 = vector.extract_strided_slice %176 {offsets = [0, 0, 0], sizes = [2, 15, 128], strides = [1, 1, 1]} : vector<2x16x128xf32> to vector<2x15x128xf32>
    %199 = tpu.concatenate %197, %198 in 1 : vector<2x1x128xf32>, vector<2x15x128xf32> -> vector<2x16x128xf32>
    %200 = vector.shape_cast %8 : vector<16x128xf32> to vector<1x16x128xf32>
    %201 = vector.broadcast %200 : vector<1x16x128xf32> to vector<2x16x128xf32>
    %202 = arith.mulf %199, %201 : vector<2x16x128xf32>
    %203 = arith.addf %196, %202 : vector<2x16x128xf32>
    %204 = vector.shape_cast %10 : vector<16x128xf32> to vector<1x16x128xf32>
    %205 = vector.broadcast %204 : vector<1x16x128xf32> to vector<2x16x128xf32>
    %206 = arith.mulf %173, %205 : vector<2x16x128xf32>
    %207 = arith.addf %203, %206 : vector<2x16x128xf32>
    %208 = vector.shape_cast %12 : vector<16x128xf32> to vector<1x16x128xf32>
    %209 = vector.broadcast %208 : vector<1x16x128xf32> to vector<2x16x128xf32>
    %210 = arith.mulf %176, %209 : vector<2x16x128xf32>
    %211 = arith.addf %207, %210 : vector<2x16x128xf32>
    %212 = vector.extract_strided_slice %173 {offsets = [0, 15, 0], sizes = [2, 1, 128], strides = [1, 1, 1]} : vector<2x16x128xf32> to vector<2x1x128xf32>
    %213 = vector.extract_strided_slice %173 {offsets = [0, 1, 0], sizes = [2, 15, 128], strides = [1, 1, 1]} : vector<2x16x128xf32> to vector<2x15x128xf32>
    %214 = tpu.concatenate %213, %212 in 1 : vector<2x15x128xf32>, vector<2x1x128xf32> -> vector<2x16x128xf32>
    %215 = vector.shape_cast %14 : vector<16x128xf32> to vector<1x16x128xf32>
    %216 = vector.broadcast %215 : vector<1x16x128xf32> to vector<2x16x128xf32>
    %217 = arith.mulf %214, %216 : vector<2x16x128xf32>
    %218 = arith.addf %211, %217 : vector<2x16x128xf32>
    %219 = vector.extract_strided_slice %165 {offsets = [0, 15, 0], sizes = [2, 1, 128], strides = [1, 1, 1]} : vector<2x16x128xf32> to vector<2x1x128xf32>
    %220 = vector.extract_strided_slice %165 {offsets = [0, 1, 0], sizes = [2, 15, 128], strides = [1, 1, 1]} : vector<2x16x128xf32> to vector<2x15x128xf32>
    %221 = tpu.concatenate %220, %219 in 1 : vector<2x15x128xf32>, vector<2x1x128xf32> -> vector<2x16x128xf32>
    %222 = vector.shape_cast %16 : vector<16x128xf32> to vector<1x16x128xf32>
    %223 = vector.broadcast %222 : vector<1x16x128xf32> to vector<2x16x128xf32>
    %224 = arith.mulf %221, %223 : vector<2x16x128xf32>
    %225 = arith.addf %218, %224 : vector<2x16x128xf32>
    %226 = vector.extract_strided_slice %176 {offsets = [0, 15, 0], sizes = [2, 1, 128], strides = [1, 1, 1]} : vector<2x16x128xf32> to vector<2x1x128xf32>
    %227 = vector.extract_strided_slice %176 {offsets = [0, 1, 0], sizes = [2, 15, 128], strides = [1, 1, 1]} : vector<2x16x128xf32> to vector<2x15x128xf32>
    %228 = tpu.concatenate %227, %226 in 1 : vector<2x15x128xf32>, vector<2x1x128xf32> -> vector<2x16x128xf32>
    %229 = vector.shape_cast %18 : vector<16x128xf32> to vector<1x16x128xf32>
    %230 = vector.broadcast %229 : vector<1x16x128xf32> to vector<2x16x128xf32>
    %231 = arith.mulf %228, %230 : vector<2x16x128xf32>
    %232 = arith.addf %225, %231 : vector<2x16x128xf32>
    %233 = vector.extract_strided_slice %170 {offsets = [0, 0, 0], sizes = [2, 1, 128], strides = [1, 1, 1]} : vector<2x16x128xf32> to vector<2x1x128xf32>
    %234 = vector.shape_cast %233 : vector<2x1x128xf32> to vector<2x1x128xf32>
    %235 = vector.broadcast %234 : vector<2x1x128xf32> to vector<2x2x128xf32>
    %236 = vector.extract_strided_slice %170 {offsets = [0, 0, 0], sizes = [2, 14, 128], strides = [1, 1, 1]} : vector<2x16x128xf32> to vector<2x14x128xf32>
    %237 = tpu.concatenate %235, %236 in 1 : vector<2x2x128xf32>, vector<2x14x128xf32> -> vector<2x16x128xf32>
    %238 = vector.shape_cast %20 : vector<16x128xf32> to vector<1x16x128xf32>
    %239 = vector.broadcast %238 : vector<1x16x128xf32> to vector<2x16x128xf32>
    %240 = arith.mulf %237, %239 : vector<2x16x128xf32>
    %241 = arith.addf %232, %240 : vector<2x16x128xf32>
    %242 = vector.extract_strided_slice %165 {offsets = [0, 0, 0], sizes = [2, 1, 128], strides = [1, 1, 1]} : vector<2x16x128xf32> to vector<2x1x128xf32>
    %243 = vector.shape_cast %242 : vector<2x1x128xf32> to vector<2x1x128xf32>
    %244 = vector.broadcast %243 : vector<2x1x128xf32> to vector<2x2x128xf32>
    %245 = vector.extract_strided_slice %165 {offsets = [0, 0, 0], sizes = [2, 14, 128], strides = [1, 1, 1]} : vector<2x16x128xf32> to vector<2x14x128xf32>
    %246 = tpu.concatenate %244, %245 in 1 : vector<2x2x128xf32>, vector<2x14x128xf32> -> vector<2x16x128xf32>
    %247 = vector.shape_cast %22 : vector<16x128xf32> to vector<1x16x128xf32>
    %248 = vector.broadcast %247 : vector<1x16x128xf32> to vector<2x16x128xf32>
    %249 = arith.mulf %246, %248 : vector<2x16x128xf32>
    %250 = arith.addf %241, %249 : vector<2x16x128xf32>
    %251 = vector.extract_strided_slice %181 {offsets = [0, 0, 0], sizes = [2, 1, 128], strides = [1, 1, 1]} : vector<2x16x128xf32> to vector<2x1x128xf32>
    %252 = vector.shape_cast %251 : vector<2x1x128xf32> to vector<2x1x128xf32>
    %253 = vector.broadcast %252 : vector<2x1x128xf32> to vector<2x2x128xf32>
    %254 = vector.extract_strided_slice %181 {offsets = [0, 0, 0], sizes = [2, 14, 128], strides = [1, 1, 1]} : vector<2x16x128xf32> to vector<2x14x128xf32>
    %255 = tpu.concatenate %253, %254 in 1 : vector<2x2x128xf32>, vector<2x14x128xf32> -> vector<2x16x128xf32>
    %256 = vector.shape_cast %24 : vector<16x128xf32> to vector<1x16x128xf32>
    %257 = vector.broadcast %256 : vector<1x16x128xf32> to vector<2x16x128xf32>
    %258 = arith.mulf %255, %257 : vector<2x16x128xf32>
    %259 = arith.addf %250, %258 : vector<2x16x128xf32>
    %260 = vector.shape_cast %26 : vector<16x128xf32> to vector<1x16x128xf32>
    %261 = vector.broadcast %260 : vector<1x16x128xf32> to vector<2x16x128xf32>
    %262 = arith.mulf %170, %261 : vector<2x16x128xf32>
    %263 = arith.addf %259, %262 : vector<2x16x128xf32>
    %264 = vector.shape_cast %28 : vector<16x128xf32> to vector<1x16x128xf32>
    %265 = vector.broadcast %264 : vector<1x16x128xf32> to vector<2x16x128xf32>
    %266 = arith.mulf %181, %265 : vector<2x16x128xf32>
    %267 = arith.addf %263, %266 : vector<2x16x128xf32>
    %268 = vector.extract_strided_slice %170 {offsets = [0, 15, 0], sizes = [2, 1, 128], strides = [1, 1, 1]} : vector<2x16x128xf32> to vector<2x1x128xf32>
    %269 = vector.shape_cast %268 : vector<2x1x128xf32> to vector<2x1x128xf32>
    %270 = vector.broadcast %269 : vector<2x1x128xf32> to vector<2x2x128xf32>
    %271 = vector.extract_strided_slice %170 {offsets = [0, 2, 0], sizes = [2, 14, 128], strides = [1, 1, 1]} : vector<2x16x128xf32> to vector<2x14x128xf32>
    %272 = tpu.concatenate %271, %270 in 1 : vector<2x14x128xf32>, vector<2x2x128xf32> -> vector<2x16x128xf32>
    %273 = vector.shape_cast %30 : vector<16x128xf32> to vector<1x16x128xf32>
    %274 = vector.broadcast %273 : vector<1x16x128xf32> to vector<2x16x128xf32>
    %275 = arith.mulf %272, %274 : vector<2x16x128xf32>
    %276 = arith.addf %267, %275 : vector<2x16x128xf32>
    %277 = vector.extract_strided_slice %165 {offsets = [0, 15, 0], sizes = [2, 1, 128], strides = [1, 1, 1]} : vector<2x16x128xf32> to vector<2x1x128xf32>
    %278 = vector.shape_cast %277 : vector<2x1x128xf32> to vector<2x1x128xf32>
    %279 = vector.broadcast %278 : vector<2x1x128xf32> to vector<2x2x128xf32>
    %280 = vector.extract_strided_slice %165 {offsets = [0, 2, 0], sizes = [2, 14, 128], strides = [1, 1, 1]} : vector<2x16x128xf32> to vector<2x14x128xf32>
    %281 = tpu.concatenate %280, %279 in 1 : vector<2x14x128xf32>, vector<2x2x128xf32> -> vector<2x16x128xf32>
    %282 = vector.shape_cast %32 : vector<16x128xf32> to vector<1x16x128xf32>
    %283 = vector.broadcast %282 : vector<1x16x128xf32> to vector<2x16x128xf32>
    %284 = arith.mulf %281, %283 : vector<2x16x128xf32>
    %285 = arith.addf %276, %284 : vector<2x16x128xf32>
    %286 = vector.extract_strided_slice %181 {offsets = [0, 15, 0], sizes = [2, 1, 128], strides = [1, 1, 1]} : vector<2x16x128xf32> to vector<2x1x128xf32>
    %287 = vector.shape_cast %286 : vector<2x1x128xf32> to vector<2x1x128xf32>
    %288 = vector.broadcast %287 : vector<2x1x128xf32> to vector<2x2x128xf32>
    %289 = vector.extract_strided_slice %181 {offsets = [0, 2, 0], sizes = [2, 14, 128], strides = [1, 1, 1]} : vector<2x16x128xf32> to vector<2x14x128xf32>
    %290 = tpu.concatenate %289, %288 in 1 : vector<2x14x128xf32>, vector<2x2x128xf32> -> vector<2x16x128xf32>
    %291 = vector.shape_cast %34 : vector<16x128xf32> to vector<1x16x128xf32>
    %292 = vector.broadcast %291 : vector<1x16x128xf32> to vector<2x16x128xf32>
    %293 = arith.mulf %290, %292 : vector<2x16x128xf32>
    %294 = arith.addf %285, %293 : vector<2x16x128xf32>
    %295 = vector.shape_cast %294 : vector<2x16x128xf32> to vector<1x2x16x128xf32>
    %c0_38 = arith.constant 0 : index
    %c0_39 = arith.constant 0 : index
    %c0_40 = arith.constant 0 : index
    %c0_41 = arith.constant 0 : index
    %296 = vector.load %arg4[%c0_38, %c0_39, %c0_40, %c0_41] : memref<1x2x16x128xf32, #tpu.memory_space<vmem>>, vector<1x2x16x128xf32>
    tpu.vector_store %arg4[%c0_38, %c0_39, %c0_40, %c0_41], %295 {strides = array<i32>} : memref<1x2x16x128xf32, #tpu.memory_space<vmem>>, vector<1x2x16x128xf32>,
    return
  }
  func.func @transform_0(%arg0: i32, %arg1: i32) -> (i32, i32, i32, i32) {
    %c0_i32 = arith.constant 0 : i32
    %c0_i32_0 = arith.constant 0 : i32
    %c0_i32_1 = arith.constant 0 : i32
    %c0_i32_2 = arith.constant 0 : i32
    return %arg0, %c0_i32, %c0_i32_0, %c0_i32_1 : i32, i32, i32, i32
  }
  func.func @transform_1(%arg0: i32, %arg1: i32) -> (i32, i32, i32, i32) {
    %c0_i32 = arith.constant 0 : i32
    %c0_i32_0 = arith.constant 0 : i32
    %c0_i32_1 = arith.constant 0 : i32
    return %arg0, %arg1, %c0_i32, %c0_i32_0 : i32, i32, i32, i32
  }
  func.func @transform_2(%arg0: i32, %arg1: i32) -> (i32, i32, i32, i32) {
    %c0_i32 = arith.constant 0 : i32
    %c0_i32_0 = arith.constant 0 : i32
    %c0_i32_1 = arith.constant 0 : i32
    return %arg0, %arg1, %c0_i32, %c0_i32_0 : i32, i32, i32, i32
  }
}

</mosaic_0001>

<bundles_post_ra>
// kernel: tpu_custom_call.1
= control target key start
LH: loop header
LB: loop body
LE: loop exit
PB: predicated region body
PF: predicated region fallthrough
CT: control target
= control target key end

     0   :  { %7 = vsyncpa [#allocation4], 0  ;;  %s7688_s0 = inlined_call_operand.hbm [shape: f32[2,4,16,128], index: 0, kind: input, shape index: {}]   ;;  %s7689_s1 = inlined_call_operand.hbm [shape: f32[2,2,16,128], index: 1, kind: input, shape index: {}]   ;;  %s7690_s2 = inlined_call_operand.hbm [shape: f32[2,2,16,128], index: 2, kind: output, shape index: {}]  }
   0x1   :  { %9 = vsyncpa [#allocation4 + $0x1], 0 }
   0x2   :  { %10 = vsyncpa [#allocation7], 0 }
   0x3   :  { %12 = vsyncpa [#allocation7 + $0x1], 0 }
   0x4   :  { %13 = vsyncpa [#allocation5], 0 }
   0x5   :  { %15 = vsyncpa [#allocation5 + $0x1], 0  ;;  %s3598_s9 = smov 0   ;;  %s3600_s10 = smov 0  }
   0x6   :  { %s3602_s11 = smov 0   ;;  %s3604_s12 = smov 0  }
   0x7   :  { %s3606_s13 = smov 0   ;;  %s3608_s14 = smov 0  }
   0x8 LB: > { %s3192_s15 = sadd.s32 4294967295, %s3571_s14   ;;  %s3193_s16 = sadd.s32 4294967294, %s3571_s14   ;;  %s3571_s14 = sphi %s3608_s14, %s21_s14   ;;  %s3567_s13 = sphi %s3606_s13, %s8356_s13   ;;  %s3563_s12 = sphi %s3604_s12, %s8355_s12   ;;  %s3559_s11 = sphi %s3602_s11, %s8354_s11   ;;  %s3555_s10 = sphi %s3600_s10, %s8353_s10   ;;  %s3551_s9 = sphi %s3598_s9, %s8352_s9  }
   0x9   : > { %s33_s17 = sadd.s32 1, %s3567_s13  ;;  %s40_s18 = sadd.s32 1, %s3559_s11 }
   0xa   : > { %p35_p0 = scmp.ge.s32.totalorder %s33_s17, 2  ;;  %p47_p1 = scmp.ne.s32.totalorder %s3559_s11, %s3555_s10 }
   0xb   : > { %p48_p2 = scmp.eq.s32.totalorder %s3571_s14, 0  ;;  %p53_p3 = scmp.ne.s32.totalorder %s3555_s10, %s3551_s9 }
   0xc   : > { %s8358_s17 = smov (%p35_p0, %s33_s17), 0  ;;  %p54_p5 = scmp.eq.s32.totalorder %s3192_s15, 0 }
   0xd   : > { %p3639_p4 = por %p48_p2, %p47_p1  ;;  %s37_s20 = ssub.s32 %s3567_s13, %s8358_s17 }
   0xe   : > { %p107_p6 = scmp.eq.s32.totalorder %s3192_s15, 1  ;;  %p38_p7 = scmp.eq.s32.totalorder %s37_s20, 0 }
   0xf   : > { %p3645_p8 = por %p54_p5, %p53_p3  ;;  %p113_p10 = scmp.eq.s32.totalorder %s3193_s16, 1 }
  0x10   : > { %p3649_p9 = por %p107_p6, %p47_p1  ;;  %p3195_p12 = scmp.ge.s32.totalorder %s3571_s14, 2 }
  0x11   : > { %s3654_s23 = scalar_select %p38_p7, %s3559_s11, %s40_s18  }
  0x12   : > { %p3656_p11 = por %p113_p10, %p53_p3  ;;  %p3231_p13 = scmp.lt.s32.totalorder %s3571_s14, 2 }
  0x13   : > { %s3663_s25 = sand.u32 1, %s3559_s11   ;;  %s3211_s27 = sshll.u32 %s3567_s13, 6 }
  0x14   : > { %s3196_s26 = sshll.u32 %s3663_s25, 6  ;;  %s142_s30 = scalar_lea.hbm %s7688_s0, %s3211_s27 }
  0x15   : > { %s137_s3 = scalar_lea.vmem [#allocation3], %s3196_s26  ;;  %s143_s5 = sshll.u32 %s142_s30, 4  ;;  %s144_s5 = int_to_ptr.hbm [resolvable:$true] %s143_s5 }
  0x16   : > { %s145_s4 = sshll.u32 %s137_s3, 4  ;;  %p3672_p0 = pnand %p3231_p13, %p3639_p4  ;;  %s146_s4 = int_to_ptr.vmem [resolvable:$true] %s145_s4 }
  0x17   : > { %p3202_p1 = scmp.ge.s32.totalorder %s3571_s14, 1  ;;  %s134_s7 = scalar_lea.sflag [#allocation4], %s3663_s25 }
  0x18   : > { %s3573_s8 = smov 128   ;;  %s3574_s15 = smov 8  }
  0x19   : > { %3223 = dma.hbm_to_vmem [thread:$0]  (!%p3672_p0), %s144_s5, 1024, %s146_s4, %s134_s7, %s3573_s8, %s3573_s8, %s3574_s15  }
  0x1a   : > { %p178_p2 = scmp.lt.s32.totalorder %s3571_s14, 3  ;;  %s3199_s16 = sshll.u32 %s3663_s25, 5 }
  0x1b   : > { %s3212_s18 = sshll.u32 %s3567_s13, 5  ;;  %s159_s27 = scalar_lea.vmem [#allocation6], %s3199_s16 }
  0x1c   : > { %p179_p3 = pnand %p3202_p1, %p178_p2  ;;  %s167_s19 = scalar_lea.hbm %s7689_s1, %s3212_s18 }
  0x1d   : > { %s170_s28 = sshll.u32 %s159_s27, 4  ;;  %s168_s29 = sshll.u32 %s167_s19, 4  ;;  %s171_s28 = int_to_ptr.vmem [resolvable:$true] %s170_s28  ;;  %s169_s29 = int_to_ptr.hbm [resolvable:$true] %s168_s29 }
  0x1e   : > { %s156_s30 = scalar_lea.sflag [#allocation7], %s3663_s25  ;;  %182 = sbr.rel (%p179_p3) target bundleno = 875 (0x36b), region = 28 }
  0x1f   : > { %3226 = dma.hbm_to_vmem [thread:$0]  (!%p3672_p0), %s169_s29, 512, %s171_s28, %s156_s30, %s3573_s8, %s3573_s8, %s3574_s15  }
  0x23   : > { %s3690_s3 = sand.u32 1, %s3555_s10  }
  0x24   : > { %s3203_s4 = sshll.u32 %s3690_s3, 6  ;;  %s185_s5 = scalar_lea.sflag [#allocation4], %s3690_s3 }
  0x25   : > { %s3694_s7 = scalar_lea.vmem [#allocation3], %s3203_s4 }
  0x26   : > { %3538 = dma.done.wait (%p3645_p8), %s185_s5, 1024  }
  0x27   : > { %3540 = vsyncadd (%p3645_p8), %s185_s5, 4294966272  ;;  %s3204_s25 = sshll.u32 %s3690_s3, 5  ;;  %s195_s6 = scalar_lea.sflag [#allocation7], %s3690_s3 }
  0x28   : > { %s3704_s8 = scalar_lea.vmem [#allocation6], %s3204_s25 }
  0x29   : > { %3542 = dma.done.wait (%p3645_p8), %s195_s6, 512  }
  0x2a   : > { %3544 = vsyncadd (%p3645_p8), %s195_s6, 4294966784  ;;  %v7698_v0 = vmov 0   ;;  %v3714_v1 = vld [vmem:[%s3694_s7 + $0x20] sm:$0xff]  ;;  %v3717_v2 = vld [vmem:[%s3694_s7 + $0x10] sm:$0xff]  ;;  %s3576_s21 = smov 2   ;;  %s3577_s15 = smov 1  }
  0x2b   : > { %3293 = vset.pattern.permute.xlu2 %v7698_v0  ;;  %3292 = vset.pattern.permute.xlu1 %v7698_v0  ;;  %v3720_v3 = vld [vmem:[%s3694_s7] sm:$0xff]  ;;  %v3726_v4 = vld [vmem:[%s3694_s7 + $0x28] sm:$0xff]  ;;  %v3729_v5 = vld [vmem:[%s3694_s7 + $0x18] sm:$0xff]  ;;  %s3578_s16 = smov 127   ;;  %v7691_v9 = vmov 127   ;;  %s3580_s18 = smov 126  }
  0x2c   : > { %3291 = vset.pattern.permute.xlu0 %v7698_v0  ;;  %261 = vperm.xlu2 %3293, %v3714_v1   ;;  %v3732_v6 = vld [vmem:[%s3694_s7 + $0x8] sm:$0xff]  ;;  %v3738_v7 = vld [vmem:[%s3694_s7 + $0x38] sm:$0xff]  ;;  %v3741_v8 = vld [vmem:[%s3694_s7 + $0x30] sm:$0xff]  ;;  %vm303_vm0 = vcmask 15360   ;;  %vm336_vm1 = vcmask 7168   ;;  %vm369_vm2 = vcmask 1039360  }
  0x2d   : > { %251 = vperm.xlu1 %3292, %v3717_v2   ;;  %241 = vperm.xlu0 %3291, %v3720_v3   ;;  %v3835_v19 = vld [vmem:[%s3704_s8 + $0x8] sm:$0xff]  ;;  %v3838_v21 = vld [vmem:[%s3704_s8 + $0x18] sm:$0xff]  ;;  %v3841_v22 = vld [vmem:[%s3704_s8] sm:$0xff]  ;;  %v7696_v27 = vrot.slane %v3717_v2, 7  ;;  %vm451_vm3 = vcmask 1040384   ;;  %v500_v43 = vrot.slane %v3720_v3, 7 }
  0x2e   : > { %v3857_v26 = vld [vmem:[%s3704_s8 + $0x10] sm:$0xff]  ;;  %v501_v45 = vrot.slane %v3732_v6, 7  ;;  %vm809_vm4 = vcmask 1041408   ;;  %vm652_vm5 = vcmask 1046528   ;;  %vm1022_vm6 = vcmask 1045504   ;;  %s3213_s20 = sshll.u32 %s3563_s12, 5 }
  0x2f   : > { %v521_v34 = vsel %vm451_vm3, %v3717_v2, %v7696_v27  ;;  %v3915_v50 = vsel %vm451_vm3, %v3720_v3, %v500_v43  ;;  %vm434_vm7 = vcmask 1031168   ;;  %s224_s26 = scalar_lea.vmem [#allocation8], %s3204_s25  ;;  %s3078_s12 = scalar_lea.hbm %s7690_s2, %s3213_s20 }
  0x30   : > { %v534_v39 = vmul.f32 %v521_v34, %v521_v34  ;;  %v1487_v47 = vsub.f32 %v521_v34, %v3717_v2  ;;  %v3921_v54 = vsel %vm451_vm3, %v500_v43, %v501_v45  ;;  %v1485_v58 = vsub.f32 %v3915_v50, %v3720_v3  ;;  %s3079_s28 = sshll.u32 %s224_s26, 4  ;;  %s3081_s29 = sshll.u32 %s3078_s12, 4  ;;  %s3080_s28 = int_to_ptr.vmem [resolvable:$true] %s3079_s28  ;;  %s3082_s29 = int_to_ptr.hbm [resolvable:$true] %s3081_s29 }
  0x31   : > { %v3935_v61 = vmul.f32 %v3915_v50, %v3915_v50  ;;  %s3064_s30 = scalar_lea.sflag [#allocation5], %s3690_s3  ;;  %s3499_s4 = sshra.s32 %s3082_s29, 4  ;;  %s3500_s4 = int_to_ptr.hbm [resolvable:$true] %s3499_s4 }
  0x32   : > { %v3925_v56 = vmul.f32 %v1487_v47, %v1487_v47  ;;  %s3501_s5 = scalar_lea.hbm %s3500_s4, 32  ;;  %s3505_s6 = scalar_lea.hbm %s7690_s2, 64 }
  0x33   : > { %p3502_p4 = scmp.ne.s32.totalorder %s3500_s4, %s3501_s5  ;;  %p3506_p7 = scmp.lt.s32.totalorder %s3500_s4, %s7690_s2 }
  0x34   : > { %266 = vperm.xlu2 %3293, %v3726_v4   ;;  %7819 = vst [vmem:[#allocation18_spill] sm:$0xff] %v3925_v56  ;;  %p3507_p8 = scmp.lt.s32.totalorder %s3505_s6, %s3501_s5 }
  0x35   : > { %256 = vperm.xlu1 %3292, %v3729_v5   ;;  %246 = vperm.xlu0 %3291, %v3732_v6   ;;  %p3503_p5 = pnand %p3502_p4, %p3649_p9 }
  0x36   : > { %p3508_p10 = por %p3507_p8, %p3506_p7 }
  0x37   : > { %p3504_p6 = pneg %p3503_p5 }
  0x39   : > { %p3509_p13 = pnand %p3508_p10, %p3504_p6 }
  0x3c   : > { %279 = vrot.lane.b32.xlu2 %v3720_v3, %s3576_s21 }
  0x3d   : > { %276 = vperm.xlu1 %3292, %v3738_v7   ;;  %271 = vperm.xlu0 %3291, %v3741_v8  }
  0x3e   : > { %3294 = vset.pattern.permute.xlu2 %v7691_v9 }
  0x44   : > { %316 = vrot.lane.b32.xlu2 %v3717_v2, %s3577_s15 }
  0x45   : > { %314 = vrot.lane.b32.xlu1 %v3732_v6, %s3577_s15  ;;  %312 = vrot.lane.b32.xlu0 %v3720_v3, %s3577_s15 }
  0x46   : > { %3296 = vset.pattern.permute.xlu1 %v7691_v9  ;;  %3295 = vset.pattern.permute.xlu0 %v7691_v9 }
  0x4c   : > { %322 = vrot.lane.b32.xlu2 %v3726_v4, %s3577_s15 }
  0x4d   : > { %320 = vrot.lane.b32.xlu1 %v3714_v1, %s3577_s15  ;;  %318 = vrot.lane.b32.xlu0 %v3729_v5, %s3577_s15 }
  0x54   : > { %349 = vrot.lane.b32.xlu2 %v3717_v2, %s3578_s16 }
  0x55   : > { %347 = vrot.lane.b32.xlu1 %v3732_v6, %s3578_s16  ;;  %345 = vrot.lane.b32.xlu0 %v3720_v3, %s3578_s16 }
  0x5c   : > { %326 = vrot.lane.b32.xlu2 %v3738_v7, %s3577_s15 }
  0x5d   : > { %324 = vrot.lane.b32.xlu1 %v3741_v8, %s3577_s15  ;;  %351 = vrot.lane.b32.xlu0 %v3729_v5, %s3578_s16 }
  0x64   : > { %357 = vrot.lane.b32.xlu2 %v3741_v8, %s3578_s16 }
  0x65   : > { %355 = vrot.lane.b32.xlu1 %v3726_v4, %s3578_s16  ;;  %353 = vrot.lane.b32.xlu0 %v3714_v1, %s3578_s16 }
  0x6c   : > { %283 = vrot.lane.b32.xlu2 %v3717_v2, %s3576_s21 }
  0x6d   : > { %281 = vrot.lane.b32.xlu1 %v3732_v6, %s3576_s21  ;;  %359 = vrot.lane.b32.xlu0 %v3738_v7, %s3578_s16 }
  0x74   : > { %289 = vrot.lane.b32.xlu2 %v3726_v4, %s3576_s21 }
  0x75   : > { %287 = vrot.lane.b32.xlu1 %v3714_v1, %s3576_s21  ;;  %285 = vrot.lane.b32.xlu0 %v3729_v5, %s3576_s21 }
  0x7c   : > { %379 = vperm.xlu2 %3294, %v3720_v3  }
  0x7d   : > { %293 = vrot.lane.b32.xlu1 %v3738_v7, %s3576_s21  ;;  %291 = vrot.lane.b32.xlu0 %v3741_v8, %s3576_s21 }
  0x84   : > { %391 = vperm.xlu2 %3294, %v3729_v5  }
  0x85   : > { %387 = vperm.xlu1 %3296, %v3717_v2   ;;  %383 = vperm.xlu0 %3295, %v3732_v6  }
  0x86   : > { %v3800_v10 = vpop.permute.xlu2 %261 }
  0x87   : > { %7813 = vst [vmem:[#allocation12_spill] sm:$0xff] %v3800_v10 }
  0x8c   : > { %412 = vrot.lane.b32.xlu2 %v3732_v6, %s3580_s18 }
  0x8d   : > { %410 = vrot.lane.b32.xlu1 %v3720_v3, %s3580_s18  ;;  %414 = vrot.lane.b32.xlu0 %v3717_v2, %s3580_s18 }
  0x8e   : > { %v3808_v11 = vpop.permute.xlu2 %266 }
  0x94   : > { %395 = vperm.xlu2 %3294, %v3714_v1  }
  0x95   : > { %416 = vrot.lane.b32.xlu1 %v3729_v5, %s3580_s18  ;;  %399 = vperm.xlu0 %3295, %v3726_v4  }
  0x96   : > { %v280_v12 = vpop.permute.xlu2 %279 }
  0x9c   : > { %420 = vrot.lane.b32.xlu2 %v3726_v4, %s3580_s18 }
  0x9d   : > { %418 = vrot.lane.b32.xlu1 %v3714_v1, %s3580_s18  ;;  %403 = vperm.xlu0 %3295, %v3741_v8  }
  0x9e   : > { %3298 = vset.pattern.permute.xlu2 %v7698_v0  ;;  %v317_v15 = vpop.permute.xlu2 %316 }
  0x9f   : > { %v3820_v13 = vpop.permute.xlu1 %251  ;;  %v242_v14 = vpop.permute.xlu0 %241  ;;  %v3854_v25 = vsel %vm336_vm1, %v3717_v2, %v317_v15 }
  0xa0   : > { %v3823_v16 = vsel %vm303_vm0, %v242_v14, %v280_v12  ;;  %v455_v28 = vrot.slane %v3854_v25, 7  ;;  %v1547_v57 = vsub.f32 %v3854_v25, %v3717_v2  ;;  %v614_v59 = vmul.f32 %v3854_v25, %v3854_v25 }
  0xa1   : > { %7814 = vst [vmem:[#allocation13_spill] sm:$0xff] %v3823_v16  ;;  %v797_v51 = vperm.slane %v3823_v16, 0  ;;  %v7693_v52 = vrot.slane %v3823_v16, 6  ;;  %v656_v62 = vrot.slane %v3854_v25, 1  ;;  %v3944_v12 = vmul.f32 %v3921_v54, %v3921_v54 }
  0xa2   : > { %v473_v35 = vsel %vm451_vm3, %v3854_v25, %v455_v28  ;;  %v1486_v14 = vsub.f32 %v3921_v54, %v3732_v6 }
  0xa3   : > { %v486_v40 = vmul.f32 %v473_v35, %v473_v35  ;;  %v526_v44 = vadd.f32 %v521_v34, %v473_v35  ;;  %v3960_v34 = vmul.f32 %v1547_v57, %v1547_v57 }
  0xa4   : > { %422 = vrot.lane.b32.xlu2 %v3741_v8, %s3580_s18 }
  0xa5   : > { %407 = vperm.xlu1 %3296, %v3738_v7   ;;  %424 = vrot.lane.b32.xlu0 %v3738_v7, %s3580_s18  ;;  %v542_v48 = vadd.f32 %v534_v39, %v486_v40  ;;  %7821 = vst [vmem:[#allocation20_spill] sm:$0xff] %v3960_v34  ;;  %v3966_v39 = vmul.f32 %v1485_v58, %v1485_v58 }
  0xa6   : > { %v323_v20 = vpop.permute.xlu2 %322 }
  0xa7   : > { %v3830_v17 = vpop.permute.xlu1 %256  ;;  %v3832_v18 = vpop.permute.xlu0 %246  ;;  %v3940_v63 = vsel %vm336_vm1, %v3726_v4, %v323_v20  ;;  %v1785_v20 = vsub.f32 %v3823_v16, %v3720_v3  ;;  %7823 = vst [vmem:[#allocation22_spill] sm:$0xff] %v3966_v39 }
  0xa8   : > { %7815 = vst [vmem:[#allocation14_spill] sm:$0xff] %v3830_v17  ;;  %v7694_v40 = vrot.slane %v3940_v63, 1 }
  0xa9   : > { %7816 = vst [vmem:[#allocation15_spill] sm:$0xff] %v3832_v18  ;;  %v3989_v58 = vmul.f32 %v1785_v20, %v1785_v20 }
  0xab   : > { %7826 = vst [vmem:[#allocation25_spill] sm:$0xff] %v3989_v58 }
  0xac   : > { %2258 = vperm.xlu2 %3298, %v3835_v19  }
  0xad   : > { %3297 = vset.pattern.permute.xlu1 %v7698_v0  ;;  %2277 = vrot.lane.b32.xlu0 %v3838_v21, %s3576_s21 }
  0xae   : > { %2253 = vperm.xlu1 %3297, %v3841_v22   ;;  %v350_v29 = vpop.permute.xlu2 %349 }
  0xaf   : > { %v3848_v23 = vpop.permute.xlu1 %276  ;;  %v3850_v24 = vpop.permute.xlu0 %271  ;;  %v3865_v30 = vsel %vm369_vm2, %v350_v29, %v3717_v2  ;;  %v1457_v29 = vsub.f32 %v473_v35, %v3717_v2  ;;  %v506_v35 = vrot.slane %v3714_v1, 7 }
  0xb0   : > { %7817 = vst [vmem:[#allocation16_spill] sm:$0xff] %v3848_v23  ;;  %v7695_v36 = vrot.slane %v3865_v30, 7 }
  0xb1   : > { %7818 = vst [vmem:[#allocation17_spill] sm:$0xff] %v3850_v24 }
  0xb2   : > { %v3894_v42 = vsel %vm451_vm3, %v3865_v30, %v7695_v36 }
  0xb3   : > { %v590_v49 = vmul.f32 %v3894_v42, %v3894_v42  ;;  %v582_v53 = vadd.f32 %v3894_v42, %v526_v44  ;;  %v638_v44 = vmul.f32 %v3865_v30, %v3865_v30 }
  0xb4   : > { %2271 = vrot.lane.b32.xlu2 %v3841_v22, %s3576_s21 }
  0xb5   : > { %2292 = vrot.lane.b32.xlu0 %v3857_v26, %s3577_s15  ;;  %3301 = vset.pattern.permute.xlu2 %v7691_v9  ;;  %v598_v60 = vadd.f32 %v590_v49, %v542_v48  ;;  %v507_v48 = vrot.slane %v3726_v4, 7 }
  0xb6   : > { %2268 = vperm.xlu1 %3297, %v3838_v21  }
  0xb7   : > { %v315_v31 = vpop.permute.xlu1 %314  ;;  %v313_v33 = vpop.permute.xlu0 %312  ;;  %v622_v43 = vadd.f32 %v614_v59, %v598_v60  ;;  %v3992_v60 = vmul.f32 %v1486_v14, %v1486_v14  ;;  %v4012_v14 = vsel %vm652_vm5, %v7694_v40, %v3940_v63 }
  0xb8   : > { %v3873_v32 = vsel %vm336_vm1, %v3732_v6, %v315_v31  ;;  %v3887_v38 = vsel %vm336_vm1, %v3720_v3, %v313_v33  ;;  %v3954_v31 = vsel %vm809_vm4, %v797_v51, %v7693_v52  ;;  %v606_v33 = vadd.f32 %v582_v53, %v3854_v25  ;;  %7828 = vst [vmem:[#allocation27_spill] sm:$0xff] %v4012_v14 }
  0xb9   : > { %v453_v37 = vrot.slane %v3873_v32, 7  ;;  %v452_v41 = vrot.slane %v3887_v38, 7  ;;  %7820 = vst [vmem:[#allocation19_spill] sm:$0xff] %v3954_v31  ;;  %v1695_v47 = vsub.f32 %v3954_v31, %v3720_v3  ;;  %v3983_v53 = vmul.f32 %v1457_v29, %v1457_v29 }
  0xba   : > { %v3987_v57 = vmul.f32 %v3954_v31, %v3954_v31  ;;  %v630_v59 = vadd.f32 %v606_v33, %v3865_v30  ;;  %7827 = vst [vmem:[#allocation26_spill] sm:$0xff] %v3992_v60  ;;  %v646_v20 = vadd.f32 %v638_v44, %v622_v43  ;;  %v4024_v52 = vsel %vm451_vm3, %v506_v35, %v507_v48 }
  0xbb   : > { %v3903_v46 = vsel %vm451_vm3, %v452_v41, %v453_v37  ;;  %v3964_v37 = vmul.f32 %v3823_v16, %v3823_v16  ;;  %7824 = vst [vmem:[#allocation23_spill] sm:$0xff] %v3983_v53  ;;  %v654_v43 = vrot.slane %v3873_v32, 1  ;;  %v4035_v44 = vsel %vm451_vm3, %v3887_v38, %v452_v41 }
  0xbc   : > { %2275 = vrot.lane.b32.xlu2 %v3857_v26, %s3576_s21  ;;  %7825 = vst [vmem:[#allocation24_spill] sm:$0xff] %v3987_v57  ;;  %v1610_v48 = vsub.f32 %v4012_v14, %v3726_v4  ;;  %v1490_v36 = vsub.f32 %v4024_v52, %v3726_v4  ;;  %v484_v58 = vmul.f32 %v4035_v44, %v4035_v44 }
  0xbd   : > { %2307 = vrot.lane.b32.xlu0 %v3835_v19, %s3578_s16  ;;  %7822 = vst [vmem:[#allocation21_spill] sm:$0xff] %v3964_v37  ;;  %v485_v60 = vmul.f32 %v3903_v46, %v3903_v46  ;;  %v1517_v53 = vsub.f32 %v3894_v42, %v3717_v2  ;;  %v4104_v57 = vsel %vm652_vm5, %v654_v43, %v3873_v32 }
  0xbe   : > { %2273 = vrot.lane.b32.xlu1 %v3835_v19, %s3576_s21  ;;  %v4088_v56 = vmul.f32 %v1610_v48, %v1610_v48  ;;  %7837 = vst [vmem:[#allocation36_spill] sm:$0xff] %v4104_v57  ;;  %v524_v48 = vadd.f32 %v3915_v50, %v4035_v44  ;;  %v540_v42 = vadd.f32 %v3935_v61, %v484_v58 }
  0xbf   : > { %3300 = vset.pattern.permute.xlu1 %v7691_v9  ;;  %v3923_v55 = vpop.permute.xlu1 %320  ;;  %v319_v15 = vpop.permute.xlu0 %318 }
  0xc0   : > { %v3976_v45 = vsel %vm336_vm1, %v3729_v5, %v319_v15  ;;  %v3996_v15 = vsel %vm451_vm3, %v3714_v1, %v506_v35  ;;  %v1577_v35 = vsub.f32 %v3865_v30, %v3717_v2  ;;  %7834 = vst [vmem:[#allocation33_spill] sm:$0xff] %v4088_v56 }
  0xc1   : > { %v456_v49 = vrot.slane %v3976_v45, 7  ;;  %v7697_v51 = vrot.slane %v3976_v45, 1  ;;  %v1489_v40 = vsub.f32 %v3996_v15, %v3714_v1 }
  0xc2   : > { %v4095_v37 = vmul.f32 %v1577_v35, %v1577_v35  ;;  %v4117_v35 = vsel %vm336_vm1, %v3714_v1, %v3923_v55  ;;  %v613_v55 = vmul.f32 %v3873_v32, %v3873_v32 }
  0xc3   : > { %v4001_v9 = vsel %vm451_vm3, %v455_v28, %v456_v49  ;;  %v4006_v29 = vsel %vm652_vm5, %v656_v62, %v7697_v51  ;;  %v4019_v49 = vmul.f32 %v1695_v47, %v1695_v47  ;;  %v1550_v62 = vsub.f32 %v3940_v63, %v3726_v4 }
  0xc4   : > { %2290 = vrot.lane.b32.xlu2 %v3835_v19, %s3577_s15  ;;  %v4015_v33 = vadd.f32 %v4006_v29, %v630_v59  ;;  %v687_v25 = vmul.f32 %v4006_v29, %v4006_v29  ;;  %v653_v47 = vrot.slane %v3887_v38, 1  ;;  %v4062_v51 = vmul.f32 %v3996_v15, %v3996_v15  ;;  %7836 = vst [vmem:[#allocation35_spill] sm:$0xff] %v4095_v37 }
  0xc5   : > { %2323 = vperm.xlu0 %3295, %v3841_v22   ;;  %7829 = vst [vmem:[#allocation28_spill] sm:$0xff] %v4019_v49  ;;  %v4072_v49 = vmul.f32 %v1489_v40, %v1489_v40  ;;  %v1549_v17 = vsub.f32 %v4117_v35, %v3714_v1 }
  0xc6   : > { %2288 = vrot.lane.b32.xlu1 %v3841_v22, %s3577_s15  ;;  %v4038_v59 = vadd.f32 %v687_v25, %v646_v20  ;;  %v4056_v25 = vmul.f32 %v3940_v63, %v3940_v63  ;;  %v4070_v20 = vmul.f32 %v4024_v52, %v4024_v52  ;;  %v4078_v34 = vsel %vm652_vm5, %v653_v47, %v654_v43 }
  0xc7   : > { %v348_v28 = vpop.permute.xlu1 %347  ;;  %v346_v41 = vpop.permute.xlu0 %345  ;;  %7832 = vst [vmem:[#allocation31_spill] sm:$0xff] %v4072_v49  ;;  %v4091_v49 = vmul.f32 %v1490_v36, %v1490_v36  ;;  %v525_v36 = vadd.f32 %v3921_v54, %v3903_v46 }
  0xc8   : > { %v4048_v27 = vsel %vm369_vm2, %v348_v28, %v3732_v6  ;;  %7830 = vst [vmem:[#allocation29_spill] sm:$0xff] %v4056_v25  ;;  %v4064_v28 = vmul.f32 %v1550_v62, %v1550_v62  ;;  %v4082_v62 = vsel %vm369_vm2, %v346_v41, %v3720_v3 }
  0xc9   : > { %v557_v39 = vrot.slane %v4048_v27, 7  ;;  %7835 = vst [vmem:[#allocation34_spill] sm:$0xff] %v4091_v49  ;;  %v556_v41 = vrot.slane %v4082_v62, 7  ;;  %v1546_v49 = vsub.f32 %v3873_v32, %v3732_v6 }
  0xca   : > { %7831 = vst [vmem:[#allocation30_spill] sm:$0xff] %v4064_v28  ;;  %v4086_v28 = vmul.f32 %v4012_v14, %v4012_v14 }
  0xcb   : > { %v4120_v43 = vsel %vm451_vm3, %v556_v41, %v557_v39  ;;  %v4124_v50 = vsel %vm451_vm3, %v4082_v62, %v556_v41  ;;  %v1606_v39 = vsub.f32 %v4104_v57, %v3732_v6  ;;  %v458_v41 = vrot.slane %v4117_v35, 7 }
  0xcc   : > { %2305 = vrot.lane.b32.xlu2 %v3841_v22, %s3578_s16  ;;  %7833 = vst [vmem:[#allocation32_spill] sm:$0xff] %v4086_v28  ;;  %v580_v54 = vadd.f32 %v4124_v50, %v524_v48  ;;  %v581_v61 = vadd.f32 %v4120_v43, %v525_v36  ;;  %v588_v58 = vmul.f32 %v4124_v50, %v4124_v50 }
  0xcd   : > { %3299 = vset.pattern.permute.xlu0 %v7698_v0  ;;  %v327_v0 = vpop.permute.xlu2 %326 }
  0xce   : > { %2294 = vrot.lane.b32.xlu1 %v3838_v21, %s3577_s15  ;;  %2263 = vperm.xlu0 %3299, %v3857_v26   ;;  %v4099_v47 = vsel %vm336_vm1, %v3738_v7, %v327_v0  ;;  %v541_v0 = vadd.f32 %v3944_v12, %v485_v60  ;;  %v589_v12 = vmul.f32 %v4120_v43, %v4120_v43 }
  0xcf   : > { %v612_v60 = vmul.f32 %v3887_v38, %v3887_v38  ;;  %v596_v48 = vadd.f32 %v588_v58, %v540_v42  ;;  %v604_v40 = vadd.f32 %v580_v54, %v3887_v38  ;;  %v4144_v56 = vadd.f32 %v581_v61, %v3873_v32 }
  0xd0   : > { %v597_v36 = vadd.f32 %v589_v12, %v541_v0  ;;  %v1552_v37 = vsub.f32 %v4099_v47, %v3738_v7  ;;  %v636_v54 = vmul.f32 %v4082_v62, %v4082_v62  ;;  %v7838_v32 = vrot.slane %v4099_v47, 1 }
  0xd1   : > { %v620_v24 = vadd.f32 %v612_v60, %v596_v48  ;;  %v628_v0 = vadd.f32 %v604_v40, %v4082_v62  ;;  %v1455_v58 = vsub.f32 %v4035_v44, %v3720_v3  ;;  %v1456_v12 = vsub.f32 %v3903_v46, %v3732_v6 }
  0xd2   : > { %v4153_v42 = vadd.f32 %v613_v55, %v597_v36  ;;  %v4162_v61 = vsel %vm652_vm5, %v7838_v32, %v4099_v47  ;;  %v1545_v40 = vsub.f32 %v3887_v38, %v3720_v3  ;;  %v685_v60 = vmul.f32 %v4078_v34, %v4078_v34 }
  0xd3   : > { %7839 = vst [vmem:[#allocation37_spill] sm:$0xff] %v4162_v61  ;;  %v644_v48 = vadd.f32 %v636_v54, %v620_v24  ;;  %v4177_v36 = vadd.f32 %v4078_v34, %v628_v0  ;;  %v4180_v44 = vmul.f32 %v1517_v53, %v1517_v53  ;;  %v4182_v32 = vmul.f32 %v1546_v49, %v1546_v49  ;;  %v325_v53 = vpop.permute.xlu1 %324 }
  0xd4   : > { %2311 = vrot.lane.b32.xlu2 %v3838_v21, %s3578_s16  ;;  %v7843_v38 = vrot.slane %v3940_v63, 7  ;;  %v474_v24 = vsel %vm451_vm3, %v4117_v35, %v458_v41  ;;  %v4200_v49 = vmul.f32 %v4104_v57, %v4104_v57  ;;  %v4204_v46 = vmul.f32 %v4162_v61, %v4162_v61 }
  0xd5   : > { %v358_v31 = vpop.permute.xlu2 %357  ;;  %7840 = vst [vmem:[#allocation38_spill] sm:$0xff] %v4180_v44  ;;  %v4195_v54 = vadd.f32 %v685_v60, %v644_v48  ;;  %v4214_v60 = vmul.f32 %v1455_v58, %v1455_v58  ;;  %v4216_v48 = vmul.f32 %v1456_v12, %v1456_v12  ;;  %v488_v0 = vmul.f32 %v474_v24, %v474_v24 }
  0xd6   : > { %2309 = vrot.lane.b32.xlu1 %v3857_v26, %s3578_s16  ;;  %2340 = vrot.lane.b32.xlu0 %v3835_v19, %s3580_s18  ;;  %v4170_v55 = vsel %vm369_vm2, %v358_v31, %v3741_v8  ;;  %7841 = vst [vmem:[#allocation39_spill] sm:$0xff] %v4182_v32  ;;  %v4187_v31 = vmul.f32 %v4099_v47, %v4099_v47 }
  0xd7   : > { %v460_v23 = vsel %vm451_vm3, %v458_v41, %v7843_v38  ;;  %7844 = vst [vmem:[#allocation41_spill] sm:$0xff] %v4200_v49  ;;  %v4206_v32 = vmul.f32 %v1552_v37, %v1552_v37  ;;  %v4210_v41 = vsub.f32 %v4162_v61, %v3738_v7  ;;  %v4212_v38 = vmul.f32 %v1606_v39, %v1606_v39 }
  0xd8   : > { %7842 = vst [vmem:[#allocation40_spill] sm:$0xff] %v4187_v31  ;;  %v489_v44 = vmul.f32 %v460_v23, %v460_v23  ;;  %v4224_v37 = vsel %vm336_vm1, %v3741_v8, %v325_v53  ;;  %v1459_v39 = vsub.f32 %v474_v24, %v3714_v1  ;;  %v1460_v58 = vsub.f32 %v460_v23, %v3726_v4 }
  0xd9   : > { %7845 = vst [vmem:[#allocation42_spill] sm:$0xff] %v4204_v46  ;;  %v7853_v12 = vrot.slane %v4170_v55, 7  ;;  %v4241_v53 = vmul.f32 %v4170_v55, %v4170_v55  ;;  %v4259_v61 = vadd.f32 %v4062_v51, %v488_v0  ;;  %v352_v46 = vpop.permute.xlu0 %351 }
  0xda   : > { %7846 = vst [vmem:[#allocation43_spill] sm:$0xff] %v4206_v32  ;;  %v4256_v32 = vadd.f32 %v4024_v52, %v460_v23  ;;  %v4262_v28 = vadd.f32 %v4070_v20, %v489_v44  ;;  %v7861_v44 = vrot.slane %v3976_v45, 1 }
  0xdb   : > { %7847 = vst [vmem:[#allocation44_spill] sm:$0xff] %v4210_v41  ;;  %v4228_v41 = vmul.f32 %v4117_v35, %v4117_v35 }
  0xdc   : > { %2331 = vperm.xlu2 %3301, %v3857_v26   ;;  %7848 = vst [vmem:[#allocation45_spill] sm:$0xff] %v4212_v38  ;;  %v4285_v0 = vsel %vm652_vm5, %v7861_v44, %v3976_v45  ;;  %v487_v44 = vmul.f32 %v4001_v9, %v4001_v9 }
  0xdd   : > { %7849 = vst [vmem:[#allocation46_spill] sm:$0xff] %v4214_v60  ;;  %v4267_v60 = vmul.f32 %v1459_v39, %v1459_v39  ;;  %v284_v52 = vpop.permute.xlu2 %283  ;;  %v1548_v39 = vsub.f32 %v3976_v45, %v3729_v5 }
  0xde   : > { %2327 = vperm.xlu1 %3300, %v3835_v19   ;;  %7850 = vst [vmem:[#allocation47_spill] sm:$0xff] %v4216_v48  ;;  %v4218_v19 = vmul.f32 %v1545_v40, %v1545_v40  ;;  %v4236_v40 = vsel %vm451_vm3, %v4170_v55, %v7853_v12  ;;  %v4248_v48 = vadd.f32 %v3996_v15, %v474_v24  ;;  %v7856_v24 = vmov 0  }
  0xdf   : > { %7852 = vst [vmem:[#allocation49_spill] sm:$0xff] %v4224_v37  ;;  %v1521_v38 = vsub.f32 %v4236_v40, %v3741_v8  ;;  %v4264_v15 = vmul.f32 %v1549_v17, %v1549_v17  ;;  %v4269_v12 = vmul.f32 %v1460_v58, %v1460_v58  ;;  %v615_v17 = vmul.f32 %v3976_v45, %v3976_v45 }
  0xe0   : > { %7851 = vst [vmem:[#allocation48_spill] sm:$0xff] %v4218_v19  ;;  %v1581_v19 = vsub.f32 %v4170_v55, %v3741_v8  ;;  %v7862_v58 = vrot.slane %v3741_v8, 7  ;;  %v4338_v31 = vmul.f32 %v1548_v39, %v1548_v39 }
  0xe1   : > { %7854 = vst [vmem:[#allocation50_spill] sm:$0xff] %v4262_v28  ;;  %v4275_v51 = vmul.f32 %v1521_v38, %v1521_v38 }
  0xe2   : > { %7855 = vst [vmem:[#allocation51_spill] sm:$0xff] %v4264_v15  ;;  %v4277_v20 = vmul.f32 %v1581_v19, %v1581_v19  ;;  %v4293_v38 = vsel %vm451_vm3, %v3741_v8, %v7862_v58  ;;  %v7864_v19 = vrot.slane %v4224_v37, 7  ;;  %v4308_v15 = vsel %vm303_vm0, %v3820_v13, %v284_v52 }
  0xe3   : > { %7857 = vst [vmem:[#allocation52_spill] sm:$0xff] %v4267_v60  ;;  %v4312_v58 = vsel %vm369_vm2, %v352_v46, %v3729_v5  ;;  %v7866_v60 = vrot.slane %v4048_v27, 1  ;;  %v1576_v13 = vsub.f32 %v4048_v27, %v3732_v6  ;;  %v538_v52 = vmul.f32 %v4293_v38, %v4293_v38 }
  0xe4   : > { %2338 = vrot.lane.b32.xlu2 %v3841_v22, %s3580_s18  ;;  %7858 = vst [vmem:[#allocation53_spill] sm:$0xff] %v4269_v12  ;;  %v594_v22 = vmul.f32 %v4236_v40, %v4236_v40  ;;  %v4299_v23 = vsel %vm451_vm3, %v4224_v37, %v7864_v19  ;;  %v1607_v19 = vsub.f32 %v4006_v29, %v3717_v2  ;;  %v7867_v29 = vrot.slane %v3717_v2, 7 }
  0xe5   : > { %3303 = vset.pattern.permute.xlu2 %v7856_v24  ;;  %7859 = vst [vmem:[#allocation54_spill] sm:$0xff] %v4275_v51  ;;  %v1458_v51 = vsub.f32 %v4001_v9, %v3729_v5  ;;  %v1608_v12 = vsub.f32 %v4285_v0, %v3729_v5  ;;  %v4322_v14 = vsel %vm652_vm5, %v7866_v60, %v4048_v27  ;;  %v560_v10 = vrot.slane %v4312_v58, 7 }
  0xe6   : > { %2335 = vperm.xlu1 %3300, %v3838_v21   ;;  %7860 = vst [vmem:[#allocation55_spill] sm:$0xff] %v4277_v20  ;;  %v504_v20 = vrot.slane %v3729_v5, 7  ;;  %v490_v46 = vmul.f32 %v4299_v23, %v4299_v23  ;;  %v688_v60 = vmul.f32 %v4285_v0, %v4285_v0  ;;  %v798_v49 = vperm.slane %v4308_v15, 0 }
  0xe7   : > { %7863 = vst [vmem:[#allocation56_spill] sm:$0xff] %v4293_v38  ;;  %v4344_v25 = vmul.f32 %v1458_v51, %v1458_v51  ;;  %v4353_v39 = vmul.f32 %v1607_v19, %v1607_v19  ;;  %v530_v57 = vadd.f32 %v4293_v38, %v4299_v23  ;;  %v4363_v51 = vmul.f32 %v1608_v12, %v1608_v12 }
  0xe8   : > { %7865 = vst [vmem:[#allocation57_spill] sm:$0xff] %v4299_v23  ;;  %v4333_v16 = vsel %vm451_vm3, %v7867_v29, %v504_v20  ;;  %v4348_v20 = vmul.f32 %v4048_v27, %v4048_v27  ;;  %v701_v29 = vrot.slane %v3720_v3, 1  ;;  %v546_v28 = vadd.f32 %v538_v52, %v490_v46 }
  0xe9   : > { %7868 = vst [vmem:[#allocation58_spill] sm:$0xff] %v4338_v31  ;;  %v535_v18 = vmul.f32 %v4333_v16, %v4333_v16  ;;  %v1666_v31 = vsub.f32 %v4322_v14, %v3732_v6  ;;  %v7873_v19 = vrot.slane %v3865_v30, 7  ;;  %v4375_v23 = vmul.f32 %v4322_v14, %v4322_v14 }
  0xea   : > { %7869 = vst [vmem:[#allocation59_spill] sm:$0xff] %v4344_v25  ;;  %v4365_v25 = vmul.f32 %v1576_v13, %v1576_v13  ;;  %v4384_v12 = vmul.f32 %v4308_v15, %v4308_v15  ;;  %v7875_v52 = vrot.slane %v3732_v6, 1 }
  0xeb   : > { %7870 = vst [vmem:[#allocation60_spill] sm:$0xff] %v4353_v39  ;;  %v4370_v39 = vsel %vm451_vm3, %v7873_v19, %v560_v10  ;;  %v543_v46 = vadd.f32 %v535_v18, %v487_v44  ;;  %v602_v44 = vadd.f32 %v594_v22, %v546_v28  ;;  %v639_v28 = vmul.f32 %v4312_v58, %v4312_v58  ;;  %v356_v22 = vpop.permute.xlu1 %355 }
  0xec   : > { %2344 = vrot.lane.b32.xlu2 %v3838_v21, %s3580_s18  ;;  %v527_v21 = vadd.f32 %v4333_v16, %v4001_v9  ;;  %7871 = vst [vmem:[#allocation61_spill] sm:$0xff] %v4363_v51  ;;  %v7874_v9 = vrot.slane %v4308_v15, 6  ;;  %v591_v19 = vmul.f32 %v4370_v39, %v4370_v39  ;;  %v510_v51 = vrot.slane %v3738_v7, 7 }
  0xed   : > { %7872 = vst [vmem:[#allocation62_spill] sm:$0xff] %v4365_v25  ;;  %v4395_v25 = vmul.f32 %v1666_v31, %v1666_v31 }
  0xee   : > { %2342 = vrot.lane.b32.xlu1 %v3857_v26, %s3580_s18  ;;  %v4380_v26 = vsel %vm809_vm4, %v798_v49, %v7874_v9  ;;  %v583_v13 = vadd.f32 %v4370_v39, %v527_v21  ;;  %v4399_v49 = vsub.f32 %v4308_v15, %v3717_v2  ;;  %v586_v9 = vadd.f32 %v4236_v40, %v530_v57  ;;  %v290_v57 = vpop.permute.xlu2 %289 }
  0xef   : > { %3302 = vset.pattern.permute.xlu1 %v7856_v24  ;;  %v4391_v24 = vsel %vm652_vm5, %v701_v29, %v7875_v52  ;;  %7877 = vst [vmem:[#allocation64_spill] sm:$0xff] %v4395_v25  ;;  %v4405_v10 = vmul.f32 %v4380_v26, %v4380_v26  ;;  %v4409_v18 = vsub.f32 %v4380_v26, %v3717_v2  ;;  %v749_v52 = vrot.slane %v4082_v62, 1 }
  0xf0   : > { %7876 = vst [vmem:[#allocation63_spill] sm:$0xff] %v4391_v24  ;;  %v607_v21 = vadd.f32 %v583_v13, %v3976_v45  ;;  %v599_v29 = vadd.f32 %v591_v19, %v543_v46  ;;  %v733_v31 = vmul.f32 %v4391_v24, %v4391_v24  ;;  %v710_v25 = vrot.slane %v3741_v8, 1 }
  0xf1   : > { %7878 = vst [vmem:[#allocation65_spill] sm:$0xff] %v4399_v49  ;;  %v618_v13 = vmul.f32 %v4224_v37, %v4224_v37  ;;  %v4423_v46 = vsub.f32 %v4078_v34, %v3720_v3  ;;  %v610_v19 = vadd.f32 %v586_v9, %v4224_v37  ;;  %v4432_v40 = vsub.f32 %v4082_v62, %v3720_v3 }
  0xf2   : > { %7879 = vst [vmem:[#allocation66_spill] sm:$0xff] %v4409_v18  ;;  %v631_v45 = vadd.f32 %v607_v21, %v4312_v58  ;;  %v623_v38 = vadd.f32 %v615_v17, %v599_v29  ;;  %v662_v18 = vrot.slane %v4224_v37, 1  ;;  %v4436_v29 = vsel %vm303_vm0, %v3808_v11, %v290_v57 }
  0xf3   : > { %7880 = vst [vmem:[#allocation67_spill] sm:$0xff] %v4423_v46  ;;  %v626_v17 = vadd.f32 %v618_v13, %v602_v44  ;;  %v7882_v34 = vrot.slane %v4048_v27, 1  ;;  %v4445_v9 = vsub.f32 %v4124_v50, %v3720_v3  ;;  %v705_v62 = vrot.slane %v3729_v5, 1 }
  0xf4   : > { %v4428_v21 = vadd.f32 %v4285_v0, %v631_v45  ;;  %7881 = vst [vmem:[#allocation68_spill] sm:$0xff] %v4432_v40  ;;  %v647_v49 = vadd.f32 %v639_v28, %v623_v38  ;;  %v704_v0 = vrot.slane %v3717_v2, 1  ;;  %v725_v44 = vadd.f32 %v4391_v24, %v4177_v36  ;;  %v354_v28 = vpop.permute.xlu0 %353 }
  0xf5   : > { %v4441_v46 = vsel %vm652_vm5, %v749_v52, %v7882_v34  ;;  %7884 = vst [vmem:[#allocation70_spill] sm:$0xff] %v4445_v9  ;;  %v741_v11 = vadd.f32 %v733_v31, %v4195_v54  ;;  %v7885_v38 = vrot.slane %v3738_v7, 1  ;;  %v634_v45 = vadd.f32 %v610_v19, %v4170_v55 }
  0xf6   : > { %7883 = vst [vmem:[#allocation69_spill] sm:$0xff] %v4441_v46  ;;  %v4457_v52 = vadd.f32 %v688_v60, %v647_v49  ;;  %v7887_v3 = vrot.slane %v4099_v47, 1  ;;  %v1020_v13 = vperm.slane %v4436_v29, 7  ;;  %v7709_v36 = vrot.slane %v4436_v29, 2 }
  0xf7   : > { %v4455_v57 = vsel %vm652_vm5, %v710_v25, %v7885_v38  ;;  %v781_v54 = vmul.f32 %v4441_v46, %v4441_v46  ;;  %v4471_v25 = vsub.f32 %v4120_v43, %v3732_v6  ;;  %v650_v60 = vadd.f32 %v4241_v53, %v626_v17 }
  0xf8   : > { %7886 = vst [vmem:[#allocation71_spill] sm:$0xff] %v4455_v57  ;;  %v4463_v50 = vsel %vm652_vm5, %v662_v18, %v7887_v3  ;;  %v4476_v49 = vadd.f32 %v4144_v56, %v4048_v27  ;;  %v4480_v18 = vadd.f32 %v4348_v20, %v4153_v42  ;;  %v7890_v31 = vrot.slane %v4099_v47, 7 }
  0xf9   : > { %7888 = vst [vmem:[#allocation72_spill] sm:$0xff] %v4463_v50  ;;  %v7891_v19 = vrot.slane %v4224_v37, 7  ;;  %v706_v43 = vsel %vm652_vm5, %v704_v0, %v705_v62  ;;  %v739_v53 = vmul.f32 %v4455_v57, %v4455_v57  ;;  %v691_v27 = vmul.f32 %v4463_v50, %v4463_v50  ;;  %v4515_v37 = vpop.permute.xlu1 %281 }
  0xfa   : > { %7889 = vst [vmem:[#allocation73_spill] sm:$0xff] %v4471_v25  ;;  %v753_v56 = vrot.slane %v4312_v58, 1  ;;  %v4497_v42 = vsel %vm369_vm2, %v354_v28, %v3714_v1  ;;  %v4500_v20 = vadd.f32 %v4441_v46, %v725_v44  ;;  %v4502_v17 = vadd.f32 %v781_v54, %v741_v11 }
  0xfb   : > { %v4487_v34 = vsel %vm451_vm3, %v7891_v19, %v7890_v31  ;;  %v683_v38 = vadd.f32 %v4463_v50, %v634_v45  ;;  %v4508_v0 = vsel %vm1022_vm6, %v7709_v36, %v1020_v13  ;;  %v699_v31 = vadd.f32 %v691_v27, %v650_v60 }
  0xfc   : > { %7892 = vst [vmem:[#allocation74_spill] sm:$0xff] %v4487_v34  ;;  %v4512_v3 = vmul.f32 %v4487_v34, %v4487_v34  ;;  %v735_v19 = vmul.f32 %v706_v43, %v706_v43  ;;  %v4519_v44 = vmul.f32 %v4436_v29, %v4436_v29  ;;  %v722_v11 = vsel %vm652_vm5, %v705_v62, %v3729_v5 }
  0xfd   : > { %7893 = vst [vmem:[#allocation75_spill] sm:$0xff] %v4508_v0  ;;  %v1488_v45 = vsub.f32 %v4333_v16, %v3729_v5  ;;  %v562_v13 = vrot.slane %v4497_v42, 7  ;;  %v4528_v54 = vmul.f32 %v4508_v0, %v4508_v0  ;;  %v1637_v60 = vsub.f32 %v706_v43, %v3717_v2 }
  0xfe   : > { %7894 = vst [vmem:[#allocation76_spill] sm:$0xff] %v4519_v44  ;;  %v1638_v27 = vsub.f32 %v722_v11, %v3729_v5  ;;  %v7896_v36 = vrot.slane %v3865_v30, 1  ;;  %v4536_v50 = vadd.f32 %v4455_v57, %v683_v38  ;;  %v727_v62 = vadd.f32 %v706_v43, %v4015_v33 }
  0xff   : > { %7895 = vst [vmem:[#allocation77_spill] sm:$0xff] %v4528_v54  ;;  %v1518_v16 = vsub.f32 %v4370_v39, %v3729_v5  ;;  %v4543_v46 = vsel %vm369_vm2, %v356_v22, %v3726_v4  ;;  %v4545_v25 = vadd.f32 %v739_v53, %v699_v31  ;;  %v736_v9 = vmul.f32 %v722_v11, %v722_v11 }
 0x100   : > { %v754_v28 = vsel %vm652_vm5, %v7896_v36, %v753_v56  ;;  %v743_v40 = vadd.f32 %v735_v19, %v4038_v59  ;;  %v770_v30 = vsel %vm652_vm5, %v753_v56, %v4312_v58  ;;  %v4550_v36 = vmul.f32 %v1488_v45, %v1488_v45 }
 0x101   : > { %v783_v38 = vmul.f32 %v754_v28, %v754_v28  ;;  %v1578_v33 = vsub.f32 %v4312_v58, %v3729_v5  ;;  %v578_v39 = vsel %vm451_vm3, %v4497_v42, %v562_v13  ;;  %v4556_v43 = vmul.f32 %v1637_v60, %v1637_v60 }
 0x102   : > { %7897 = vst [vmem:[#allocation78_spill] sm:$0xff] %v4550_v36  ;;  %v4558_v22 = vmul.f32 %v1638_v27, %v1638_v27  ;;  %v1667_v53 = vsub.f32 %v754_v28, %v3717_v2  ;;  %v756_v59 = vrot.slane %v4543_v46, 1  ;;  %v4562_v31 = vmul.f32 %v1518_v16, %v1518_v16 }
 0x103   : > { %7898 = vst [vmem:[#allocation79_spill] sm:$0xff] %v4556_v43  ;;  %v1668_v56 = vsub.f32 %v770_v30, %v3729_v5  ;;  %v7901_v19 = vrot.slane %v3940_v63, 1  ;;  %v7902_v45 = vrot.slane %v4117_v35, 1  ;;  %v707_v60 = vrot.slane %v3714_v1, 1 }
 0x104   : > { %7899 = vst [vmem:[#allocation80_spill] sm:$0xff] %v4558_v22  ;;  %v728_v27 = vadd.f32 %v722_v11, %v4428_v21  ;;  %v4574_v57 = vadd.f32 %v754_v28, %v727_v62  ;;  %v563_v2 = vrot.slane %v4543_v46, 7  ;;  %v592_v24 = vmul.f32 %v578_v39, %v578_v39  ;;  %v360_v11 = vpop.permute.xlu0 %359  ;;  %v4593_v62 = vpop.permute.xlu1 %287 }
 0x105   : > { %7900 = vst [vmem:[#allocation81_spill] sm:$0xff] %v4562_v31  ;;  %v4570_v58 = vsel %vm652_vm5, %v7902_v45, %v7901_v19  ;;  %v784_v16 = vmul.f32 %v770_v30, %v770_v30  ;;  %v4577_v22 = vadd.f32 %v783_v38, %v743_v40  ;;  %v4579_v5 = vmul.f32 %v1578_v33, %v1578_v33 }
 0x106   : > { %v4583_v43 = vmul.f32 %v4543_v46, %v4543_v46  ;;  %v4585_v19 = vmul.f32 %v1667_v53, %v1667_v53  ;;  %v4589_v45 = vsel %vm652_vm5, %v756_v59, %v4543_v46  ;;  %v584_v28 = vadd.f32 %v578_v39, %v4248_v48 }
 0x107   : > { %7903 = vst [vmem:[#allocation82_spill] sm:$0xff] %v4579_v5  ;;  %v4595_v40 = vmul.f32 %v1668_v56, %v1668_v56  ;;  %v1580_v38 = vsub.f32 %v4543_v46, %v3726_v4  ;;  %v689_v33 = vmul.f32 %v4570_v58, %v4570_v58  ;;  %v1609_v53 = vsub.f32 %v4570_v58, %v3714_v1 }
 0x108   : > { %7904 = vst [vmem:[#allocation83_spill] sm:$0xff] %v4585_v19  ;;  %v4603_v19 = vadd.f32 %v770_v30, %v728_v27  ;;  %v564_v21 = vsel %vm451_vm3, %v562_v13, %v563_v2  ;;  %v600_v48 = vadd.f32 %v592_v24, %v4259_v61  ;;  %v744_v56 = vadd.f32 %v736_v9, %v4457_v52 }
 0x109   : > { %7905 = vst [vmem:[#allocation84_spill] sm:$0xff] %v4595_v40  ;;  %v4611_v40 = vmul.f32 %v4589_v45, %v4589_v45  ;;  %v1670_v5 = vsub.f32 %v4589_v45, %v3726_v4  ;;  %v4617_v31 = vsel %vm369_vm2, %v360_v11, %v3738_v7  ;;  %v7907_v30 = vrot.slane %v3726_v4, 1 }
 0x10a   : > { %7906 = vst [vmem:[#allocation85_spill] sm:$0xff] %v4617_v31  ;;  %v608_v61 = vadd.f32 %v584_v28, %v4117_v35  ;;  %v755_v24 = vrot.slane %v4497_v42, 1  ;;  %v7908_v9 = vrot.slane %v3741_v8, 7  ;;  %v4629_v27 = vmul.f32 %v1580_v38, %v1580_v38 }
 0x10b   : > { %v709_v13 = vsel %vm652_vm5, %v707_v60, %v7907_v30  ;;  %v4631_v2 = vmul.f32 %v1609_v53, %v1609_v53  ;;  %v593_v36 = vmul.f32 %v564_v21, %v564_v21  ;;  %v585_v54 = vadd.f32 %v564_v21, %v4256_v32 }
 0x10c   : > { %v4627_v52 = vsel %vm451_vm3, %v7908_v9, %v510_v51  ;;  %7910 = vst [vmem:[#allocation87_spill] sm:$0xff] %v4629_v27  ;;  %v1639_v11 = vsub.f32 %v709_v13, %v3714_v1  ;;  %v624_v60 = vadd.f32 %v4228_v41, %v600_v48  ;;  %v566_v28 = vrot.slane %v4617_v31, 7  ;;  %v4663_v27 = vpop.permute.xlu0 %285 }
 0x10d   : > { %7909 = vst [vmem:[#allocation86_spill] sm:$0xff] %v4627_v52  ;;  %v539_v35 = vmul.f32 %v4627_v52, %v4627_v52  ;;  %v4639_v8 = vadd.f32 %v784_v16, %v744_v56  ;;  %v4641_v51 = vmul.f32 %v1670_v5, %v1670_v5  ;;  %v737_v38 = vmul.f32 %v709_v13, %v709_v13 }
 0x10e   : > { %7911 = vst [vmem:[#allocation88_spill] sm:$0xff] %v4631_v2  ;;  %v640_v53 = vmul.f32 %v4497_v42, %v4497_v42  ;;  %v632_v30 = vadd.f32 %v608_v61, %v4497_v42  ;;  %v757_v9 = vsel %vm652_vm5, %v755_v24, %v756_v59  ;;  %v1519_v32 = vsub.f32 %v578_v39, %v3714_v1  ;;  %v7915_v2 = vld [vmem:[#allocation50_spill] sm:$0xff] }
 0x10f   : > { %7912 = vst [vmem:[#allocation89_spill] sm:$0xff] %v4641_v51  ;;  %v7913_v41 = vrot.slane %v4170_v55, 7  ;;  %v601_v16 = vadd.f32 %v593_v36, %v7915_v2  ;;  %v1520_v5 = vsub.f32 %v564_v21, %v3726_v4  ;;  %v531_v56 = vadd.f32 %v4627_v52, %v4487_v34  ;;  %v7917_v2 = vld [vmem:[#allocation15_spill] sm:$0xff]  ;;  %v4675_v52 = vpop.permute.xlu2 %379 }
 0x110   : > { %v4659_v61 = vmul.f32 %v1639_v11, %v1639_v11  ;;  %v609_v59 = vadd.f32 %v585_v54, %v3940_v63  ;;  %v648_v39 = vadd.f32 %v640_v53, %v624_v60  ;;  %v547_v24 = vadd.f32 %v539_v35, %v4512_v3  ;;  %v7921_v35 = vld [vmem:[#allocation29_spill] sm:$0xff] }
 0x111   : > { %v4651_v48 = vsel %vm451_vm3, %v7913_v41, %v566_v28  ;;  %v4665_v28 = vpop.permute.xlu1 %293  ;;  %v785_v36 = vmul.f32 %v757_v9, %v757_v9  ;;  %v1579_v21 = vsub.f32 %v4497_v42, %v3714_v1  ;;  %v4672_v41 = vsel %vm303_vm0, %v7917_v2, %v4515_v37 }
 0x112   : > { %7914 = vst [vmem:[#allocation90_spill] sm:$0xff] %v4651_v48  ;;  %v595_v51 = vmul.f32 %v4651_v48, %v4651_v48  ;;  %v587_v11 = vadd.f32 %v4651_v48, %v531_v56  ;;  %v681_v63 = vadd.f32 %v4570_v58, %v632_v30  ;;  %v1669_v3 = vsub.f32 %v757_v9, %v3714_v1  ;;  %v7924_v56 = vld [vmem:[#allocation36_spill] sm:$0xff]  ;;  %v7925_v1 = vld [vmem:[#allocation41_spill] sm:$0xff] }
 0x113   : > { %7916 = vst [vmem:[#allocation50_spill] sm:$0xff] %v4659_v61  ;;  %v7919_v54 = vrot.slane %v3732_v6, 1  ;;  %v625_v53 = vadd.f32 %v7921_v35, %v601_v16  ;;  %v4686_v34 = vmul.f32 %v1519_v32, %v1519_v32  ;;  %v4688_v37 = vmul.f32 %v1520_v5, %v1520_v5 }
 0x114   : > { %7918 = vst [vmem:[#allocation15_spill] sm:$0xff] %v4672_v41  ;;  %v603_v42 = vadd.f32 %v595_v51, %v547_v24  ;;  %v678_v2 = vadd.f32 %v7924_v56, %v4476_v49  ;;  %v633_v58 = vadd.f32 %v609_v59, %v4543_v46  ;;  %v697_v30 = vadd.f32 %v689_v33, %v648_v39  ;;  %v7928_v33 = vld [vmem:[#allocation40_spill] sm:$0xff] }
 0x115   : > { %v4683_v60 = vsel %vm652_vm5, %v7919_v54, %v3732_v6  ;;  %7922 = vst [vmem:[#allocation29_spill] sm:$0xff] %v4686_v34  ;;  %v694_v48 = vadd.f32 %v7925_v1, %v4480_v18  ;;  %v811_v61 = vrot.slane %v4672_v41, 6  ;;  %v1018_v51 = vperm.slane %v4672_v41, 7  ;;  %v7929_v54 = vld [vmem:[#allocation12_spill] sm:$0xff]  ;;  %v4740_v1 = vpop.permute.xlu0 %291 }
 0x116   : > { %7920 = vst [vmem:[#allocation91_spill] sm:$0xff] %v4683_v60  ;;  %v734_v6 = vmul.f32 %v4683_v60, %v4683_v60  ;;  %v7717_v32 = vrot.slane %v4672_v41, 2  ;;  %v611_v16 = vadd.f32 %v587_v11, %v4099_v47  ;;  %v729_v5 = vadd.f32 %v709_v13, %v681_v63 }
 0x117   : > { %7923 = vst [vmem:[#allocation92_spill] sm:$0xff] %v4688_v37  ;;  %v4701_v49 = vmul.f32 %v1579_v21, %v1579_v21  ;;  %v4703_v46 = vmul.f32 %v1669_v3, %v1669_v3  ;;  %v627_v59 = vadd.f32 %v7928_v33, %v603_v42  ;;  %v649_v18 = vadd.f32 %v4583_v43, %v625_v53  ;;  %v7930_v21 = vld [vmem:[#allocation13_spill] sm:$0xff]  ;;  %v3408_v33 = vld [vmem:[%s3694_s7 + $0x38] sm:$0xff] }
 0x118   : > { %v726_v39 = vadd.f32 %v4683_v60, %v678_v2  ;;  %v4710_v24 = vmul.f32 %v4672_v41, %v4672_v41  ;;  %v4715_v47 = vsel %vm303_vm0, %v7929_v54, %v4593_v62  ;;  %v745_v13 = vadd.f32 %v737_v38, %v697_v30  ;;  %v4732_v38 = vld [vmem:[%s3694_s7 + $0x28] sm:$0xff] }
 0x119   : > { %7926 = vst [vmem:[#allocation36_spill] sm:$0xff] %v4701_v49  ;;  %v7931_v11 = vrot.slane %v7930_v21, 6  ;;  %v643_v43 = vmul.f32 %v4617_v31, %v4617_v31  ;;  %v759_v3 = vrot.slane %v4617_v31, 1  ;;  %v742_v42 = vadd.f32 %v734_v6, %v694_v48  ;;  %v4742_v6 = vpop.permute.xlu1 %387  ;;  %v7941_v49 = vld [vmem:[#allocation42_spill] sm:$0xff] }
 0x11a   : > { %7927 = vst [vmem:[#allocation41_spill] sm:$0xff] %v4703_v46  ;;  %v4728_v35 = vsel %vm1022_vm6, %v7717_v32, %v1018_v51  ;;  %v635_v62 = vadd.f32 %v611_v16, %v4617_v31  ;;  %v777_v56 = vadd.f32 %v757_v9, %v729_v5  ;;  %v799_v30 = vperm.slane %v4715_v47, 0  ;;  %v7936_v9 = vld [vmem:[#allocation27_spill] sm:$0xff]  ;;  %v7939_v32 = vld [vmem:[#allocation32_spill] sm:$0xff] }
 0x11b   : > { %v4720_v63 = vsel %vm809_vm4, %v7931_v11, %v811_v61  ;;  %v7933_v61 = vrot.slane %v3726_v4, 1  ;;  %v651_v2 = vadd.f32 %v643_v43, %v627_v59  ;;  %v816_v48 = vrot.slane %v4715_v47, 6  ;;  %v4755_v59 = vld [vmem:[%s3694_s7 + $0x8] sm:$0xff]  ;;  %v4759_v43 = vpop.permute.xlu2 %391 }
 0x11c   : > { %7932 = vst [vmem:[#allocation40_spill] sm:$0xff] %v4720_v63  ;;  %v774_v51 = vadd.f32 %v4322_v14, %v726_v39  ;;  %v843_v16 = vmul.f32 %v4720_v63, %v4720_v63  ;;  %v7934_v4 = vrot.slane %v3738_v7, 1  ;;  %v682_v5 = vadd.f32 %v7936_v9, %v633_v58 }
 0x11d   : > { %v723_v53 = vsel %vm652_vm5, %v7933_v61, %v4732_v38  ;;  %v1846_v11 = vsub.f32 %v4728_v35, %v4755_v59  ;;  %v7937_v14 = vrot.slane %v4170_v55, 1  ;;  %v698_v7 = vadd.f32 %v7939_v32, %v649_v18 }
 0x11e   : > { %v4751_v54 = vsel %vm652_vm5, %v7934_v4, %v3408_v33  ;;  %v738_v61 = vmul.f32 %v723_v53, %v723_v53  ;;  %v793_v60 = vadd.f32 %v785_v36, %v745_v13  ;;  %v790_v33 = vadd.f32 %v4375_v23, %v742_v42  ;;  %v7940_v4 = vld [vmem:[#allocation37_spill] sm:$0xff] }
 0x11f   : > { %7935 = vst [vmem:[#allocation12_spill] sm:$0xff] %v4751_v54  ;;  %v4764_v39 = vsel %vm652_vm5, %v7937_v14, %v759_v3  ;;  %v4769_v58 = vadd.f32 %v4720_v63, %v774_v51  ;;  %v684_v9 = vadd.f32 %v7940_v4, %v635_v62  ;;  %v740_v46 = vmul.f32 %v4751_v54, %v4751_v54  ;;  %v4802_v14 = vld [vmem:[%s3694_s7 + $0x20] sm:$0xff] }
 0x120   : > { %7938 = vst [vmem:[#allocation13_spill] sm:$0xff] %v4764_v39  ;;  %v700_v37 = vadd.f32 %v7941_v49, %v651_v2  ;;  %v4777_v55 = vsel %vm652_vm5, %v759_v3, %v4617_v31  ;;  %v832_v32 = vsel %vm809_vm4, %v799_v30, %v816_v48  ;;  %v787_v23 = vmul.f32 %v4764_v39, %v4764_v39  ;;  %v7956_v31 = vld [vmem:[#allocation24_spill] sm:$0xff] }
 0x121   : > { %7942 = vst [vmem:[#allocation27_spill] sm:$0xff] %v4777_v55  ;;  %v1640_v36 = vsub.f32 %v723_v53, %v4732_v38  ;;  %v730_v18 = vadd.f32 %v723_v53, %v682_v5  ;;  %v7943_v13 = vrot.slane %v4436_v29, 6  ;;  %v4786_v62 = vadd.f32 %v843_v16, %v790_v33 }
 0x122   : > { %v4790_v49 = vmul.f32 %v4728_v35, %v4728_v35  ;;  %v4792_v3 = vmul.f32 %v1846_v11, %v1846_v11  ;;  %v746_v2 = vadd.f32 %v738_v61, %v698_v7  ;;  %v732_v30 = vadd.f32 %v4751_v54, %v684_v9  ;;  %v7947_v9 = vld [vmem:[#allocation14_spill] sm:$0xff] }
 0x123   : > { %v818_v42 = vsel %vm809_vm4, %v816_v48, %v7943_v13  ;;  %v4797_v51 = vadd.f32 %v4764_v39, %v4536_v50  ;;  %v788_v53 = vmul.f32 %v4777_v55, %v4777_v55  ;;  %v846_v5 = vmul.f32 %v832_v32, %v832_v32 }
 0x124   : > { %7944 = vst [vmem:[#allocation32_spill] sm:$0xff] %v4792_v3  ;;  %v748_v48 = vadd.f32 %v740_v46, %v700_v37  ;;  %v847_v16 = vmul.f32 %v818_v42, %v818_v42  ;;  %v1699_v33 = vsub.f32 %v832_v32, %v4802_v14  ;;  %v1700_v11 = vsub.f32 %v818_v42, %v4732_v38  ;;  %v413_v46 = vpop.permute.xlu2 %412 }
 0x125   : > { %v4807_v61 = vadd.f32 %v787_v23, %v4545_v25  ;;  %v4809_v7 = vmul.f32 %v1640_v36, %v1640_v36  ;;  %v778_v50 = vadd.f32 %v4589_v45, %v730_v18  ;;  %v4814_v4 = vmul.f32 %v4715_v47, %v4715_v47  ;;  %v384_v25 = vpop.permute.xlu0 %383  ;;  %v411_v23 = vpop.permute.xlu1 %410 }
 0x126   : > { %v794_v37 = vadd.f32 %v4611_v40, %v746_v2  ;;  %v4821_v13 = vsel %vm303_vm0, %v7947_v9, %v4663_v27  ;;  %v4824_v36 = vadd.f32 %v4777_v55, %v732_v30  ;;  %v4826_v45 = vadd.f32 %v832_v32, %v777_v56  ;;  %v7951_v55 = vld [vmem:[#allocation16_spill] sm:$0xff] }
 0x127   : > { %7945 = vst [vmem:[#allocation37_spill] sm:$0xff] %v4809_v7  ;;  %v4828_v18 = vadd.f32 %v818_v42, %v778_v50  ;;  %v4830_v39 = vadd.f32 %v846_v5, %v793_v60  ;;  %v4832_v40 = vadd.f32 %v788_v53, %v748_v48  ;;  %v4836_v27 = vmul.f32 %v1699_v33, %v1699_v33  ;;  %v4860_v48 = vld [vmem:[%s3694_s7] sm:$0xff]  ;;  %v7953_v33 = vld [vmem:[#allocation17_spill] sm:$0xff]  ;;  %v7955_v50 = vld [vmem:[#allocation19_spill] sm:$0xff] }
 0x128   : > { %7946 = vst [vmem:[#allocation42_spill] sm:$0xff] %v4814_v4  ;;  %v4834_v2 = vadd.f32 %v847_v16, %v794_v37  ;;  %v4838_v9 = vmul.f32 %v1700_v11, %v1700_v11  ;;  %v4844_v56 = vsel %vm303_vm0, %v7951_v55, %v4665_v28  ;;  %v4847_v60 = vsel %vm434_vm7, %v413_v46, %v384_v25  ;;  %v4865_v16 = vld [vmem:[%s3694_s7 + $0x18] sm:$0xff] }
 0x129   : > { %7949 = vst [vmem:[#allocation93_spill] sm:$0xff] %v4836_v27  ;;  %v4851_v32 = vsel %vm434_vm7, %v411_v23, %v4675_v52  ;;  %v4855_v42 = vmul.f32 %v4821_v13, %v4821_v13  ;;  %v863_v5 = vrot.slane %v4755_v59, 6  ;;  %v858_v28 = vperm.slane %v4860_v48, 0 }
 0x12a   : > { %7948 = vst [vmem:[#allocation14_spill] sm:$0xff] %v4834_v2  ;;  %v4869_v52 = vsub.f32 %v4821_v13, %v4865_v16  ;;  %v4874_v11 = vsel %vm303_vm0, %v7953_v33, %v4740_v1  ;;  %v834_v37 = vadd.f32 %v7955_v50, %v4500_v20  ;;  %v923_v46 = vrot.slane %v4847_v60, 6 }
 0x12b   : > { %7950 = vst [vmem:[#allocation94_spill] sm:$0xff] %v4838_v9  ;;  %v862_v25 = vrot.slane %v4860_v48, 6  ;;  %v910_v23 = vperm.slane %v4851_v32, 0  ;;  %v922_v53 = vrot.slane %v4851_v32, 6  ;;  %v1071_v55 = vperm.slane %v4755_v59, 7 }
 0x12c   : > { %7952 = vst [vmem:[#allocation16_spill] sm:$0xff] %v4844_v56  ;;  %v1076_v30 = vrot.slane %v4755_v59, 2  ;;  %v850_v54 = vadd.f32 %v7956_v31, %v4502_v17  ;;  %v1075_v1 = vrot.slane %v4860_v48, 2  ;;  %v819_v7 = vrot.slane %v4874_v11, 6 }
 0x12d   : > { %7954 = vst [vmem:[#allocation17_spill] sm:$0xff] %v4874_v11  ;;  %v4888_v33 = vsel %vm809_vm4, %v862_v25, %v863_v5  ;;  %v4891_v20 = vsel %vm809_vm4, %v858_v28, %v862_v25  ;;  %v4894_v50 = vsel %vm809_vm4, %v922_v53, %v923_v46  ;;  %v4897_v63 = vsel %vm809_vm4, %v910_v23, %v922_v53 }
 0x12e   : > { %7957 = vst [vmem:[#allocation19_spill] sm:$0xff] %v4888_v33  ;;  %v886_v9 = vadd.f32 %v4891_v20, %v834_v37  ;;  %v887_v27 = vadd.f32 %v4888_v33, %v4769_v58  ;;  %v894_v17 = vmul.f32 %v4891_v20, %v4891_v20  ;;  %v895_v31 = vmul.f32 %v4888_v33, %v4888_v33 }
 0x12f   : > { %v820_v5 = vrot.slane %v4844_v56, 6  ;;  %v800_v28 = vperm.slane %v4874_v11, 0  ;;  %v954_v46 = vmul.f32 %v4897_v63, %v4897_v63  ;;  %v955_v53 = vmul.f32 %v4894_v50, %v4894_v50 }
 0x130   : > { %v902_v37 = vadd.f32 %v894_v17, %v850_v54  ;;  %v903_v25 = vadd.f32 %v895_v31, %v4786_v62  ;;  %v946_v58 = vadd.f32 %v4897_v63, %v886_v9  ;;  %v947_v23 = vadd.f32 %v4894_v50, %v887_v27 }
 0x131   : > { %v4917_v34 = vsel %vm1022_vm6, %v1076_v30, %v1071_v55  ;;  %v7958_v0 = vrot.slane %v4672_v41, 2  ;;  %v7959_v3 = vrot.slane %v7930_v21, 2  ;;  %v4927_v54 = vsel %vm1022_vm6, %v1075_v1, %v1076_v30 }
 0x132   : > { %v962_v62 = vadd.f32 %v954_v46, %v902_v37  ;;  %v963_v17 = vadd.f32 %v955_v53, %v903_v25  ;;  %v970_v9 = vadd.f32 %v946_v58, %v7930_v21  ;;  %v971_v27 = vadd.f32 %v947_v23, %v4672_v41 }
 0x133   : > { %v4924_v44 = vsel %vm1022_vm6, %v7959_v3, %v7958_v0  ;;  %v1003_v55 = vmul.f32 %v4847_v60, %v4847_v60  ;;  %v1123_v31 = vperm.slane %v4847_v60, 7  ;;  %v1128_v4 = vrot.slane %v4847_v60, 2  ;;  %v7960_v3 = vld [vmem:[#allocation21_spill] sm:$0xff] }
 0x134   : > { %v1002_v0 = vmul.f32 %v4851_v32, %v4851_v32  ;;  %v986_v2 = vadd.f32 %v7960_v3, %v962_v62  ;;  %v987_v30 = vadd.f32 %v4710_v24, %v963_v17  ;;  %v994_v1 = vadd.f32 %v970_v9, %v4851_v32 }
 0x135   : > { %v995_v21 = vadd.f32 %v971_v27, %v4847_v60  ;;  %v1108_v46 = vmul.f32 %v4917_v34, %v4917_v34  ;;  %v1055_v53 = vmul.f32 %v4924_v44, %v4924_v44  ;;  %v1107_v37 = vmul.f32 %v4927_v54, %v4927_v54 }
 0x136   : > { %v1127_v25 = vrot.slane %v4851_v32, 2  ;;  %v1010_v58 = vadd.f32 %v1002_v0, %v986_v2  ;;  %v1011_v23 = vadd.f32 %v1003_v55, %v987_v30  ;;  %v1047_v62 = vadd.f32 %v4924_v44, %v994_v1 }
 0x137   : > { %v1048_v24 = vadd.f32 %v4728_v35, %v995_v21  ;;  %v7961_v17 = vrot.slane %v4821_v13, 6  ;;  %v7962_v9 = vrot.slane %v4308_v15, 6  ;;  %v4957_v3 = vmul.f32 %v4844_v56, %v4844_v56 }
 0x138   : > { %v1063_v2 = vadd.f32 %v1055_v53, %v1010_v58  ;;  %v1064_v55 = vadd.f32 %v4790_v49, %v1011_v23  ;;  %v1099_v0 = vadd.f32 %v4927_v54, %v1047_v62  ;;  %v4965_v30 = vsel %vm809_vm4, %v819_v7, %v820_v5 }
 0x139   : > { %v815_v27 = vsel %vm809_vm4, %v7962_v9, %v7961_v17  ;;  %7963 = vst [vmem:[#allocation24_spill] sm:$0xff] %v4957_v3  ;;  %v1100_v35 = vadd.f32 %v4917_v34, %v1048_v24  ;;  %v4968_v1 = vsel %vm809_vm4, %v800_v28, %v819_v7  ;;  %v1147_v21 = vsel %vm1022_vm6, %v1128_v4, %v1123_v31 }
 0x13a   : > { %7964 = vst [vmem:[#allocation21_spill] sm:$0xff] %v4965_v30  ;;  %v1129_v17 = vsel %vm1022_vm6, %v1127_v25, %v1128_v4  ;;  %v1115_v9 = vadd.f32 %v1107_v37, %v1063_v2  ;;  %v1116_v41 = vadd.f32 %v1108_v46, %v1064_v55  ;;  %v4973_v49 = vadd.f32 %v815_v27, %v4603_v19  ;;  %v4996_v55 = vld [vmem:[%s3694_s7 + $0x10] sm:$0xff] }
 0x13b   : > { %7965 = vst [vmem:[#allocation95_spill] sm:$0xff] %v4968_v1  ;;  %v1151_v33 = vadd.f32 %v1129_v17, %v1099_v0  ;;  %v1152_v53 = vadd.f32 %v1147_v21, %v1100_v35  ;;  %v845_v58 = vmul.f32 %v815_v27, %v815_v27  ;;  %v1698_v23 = vsub.f32 %v815_v27, %v4865_v16 }
 0x13c   : > { %v4978_v5 = vmul.f32 %v4869_v52, %v4869_v52  ;;  %v1160_v7 = vmul.f32 %v1147_v21, %v1147_v21  ;;  %v1159_v28 = vmul.f32 %v1129_v17, %v1129_v17  ;;  %v848_v4 = vmul.f32 %v4968_v1, %v4968_v1 }
 0x13d   : > { %v1175_v31 = vmul.f32 %v1151_v33, %v1151_v33  ;;  %v1176_v62 = vmul.f32 %v1152_v53, %v1152_v53  ;;  %v849_v46 = vmul.f32 %v4965_v30, %v4965_v30  ;;  %v4986_v19 = vmul.f32 %v4874_v11, %v4874_v11 }
 0x13e   : > { %7966 = vst [vmem:[#allocation96_spill] sm:$0xff] %v4978_v5  ;;  %v1816_v37 = vsub.f32 %v4847_v60, %v4755_v59  ;;  %v1167_v25 = vadd.f32 %v1159_v28, %v1115_v9  ;;  %v1168_v52 = vadd.f32 %v1160_v7, %v1116_v41  ;;  %v4991_v33 = vadd.f32 %v845_v58, %v4639_v8  ;;  %v417_v60 = vpop.permute.xlu1 %416 }
 0x13f   : > { %7967 = vst [vmem:[#allocation97_spill] sm:$0xff] %v4986_v19  ;;  %v1183_v24 = vmul.f32 0.0625, %v1175_v31  ;;  %v1184_v27 = vmul.f32 0.0625, %v1176_v62  ;;  %v4993_v2 = vmul.f32 %v1698_v23, %v1698_v23  ;;  %v859_v0 = vperm.slane %v4996_v55, 0 }
 0x140   : > { %v865_v35 = vrot.slane %v4996_v55, 6  ;;  %v5002_v53 = vadd.f32 %v4968_v1, %v4797_v51  ;;  %v5007_v8 = vadd.f32 %v4965_v30, %v4824_v36  ;;  %v5010_v58 = vadd.f32 %v848_v4, %v4807_v61 }
 0x141   : > { %7968 = vst [vmem:[#allocation98_spill] sm:$0xff] %v4993_v2  ;;  %v1191_v41 = vsub.f32 %v1167_v25, %v1183_v24  ;;  %v1192_v9 = vsub.f32 %v1168_v52, %v1184_v27  ;;  %v5013_v23 = vadd.f32 %v849_v46, %v4832_v40  ;;  %v5015_v7 = vmul.f32 %v1816_v37, %v1816_v37  ;;  %v415_v25 = vpop.permute.xlu0 %414 }
 0x142   : > { %7969 = vst [vmem:[#allocation99_spill] sm:$0xff] %v5007_v8  ;;  %v1906_v28 = vsub.f32 %v1147_v21, %v4755_v59  ;;  %v1845_v62 = vsub.f32 %v4924_v44, %v4860_v48  ;;  %v1815_v36 = vsub.f32 %v4851_v32, %v4860_v48  ;;  %v836_v61 = vadd.f32 %v4380_v26, %v4574_v57 }
 0x143   : > { %7970 = vst [vmem:[#allocation100_spill] sm:$0xff] %v5013_v23  ;;  %v1199_v51 = vmul.f32 0.06666667, %v1191_v41  ;;  %v1200_v31 = vmul.f32 0.06666667, %v1192_v9  ;;  %v5025_v4 = vsel %vm809_vm4, %v859_v0, %v865_v35  ;;  %v5029_v40 = vsel %vm434_vm7, %v415_v25, %v4742_v6 }
 0x144   : > { %v911_v44 = vperm.slane %v5029_v40, 0  ;;  %v925_v37 = vrot.slane %v5029_v40, 6  ;;  %v1755_v32 = vsub.f32 %v4897_v63, %v4860_v48  ;;  %v1756_v26 = vsub.f32 %v4894_v50, %v4755_v59 }
 0x145   : > { %v5031_v21 = vmax.f32 %v1199_v51, 0.0  ;;  %v5033_v46 = vmax.f32 %v1200_v31, 0.0  ;;  %v852_v57 = vadd.f32 %v4405_v10, %v4577_v22  ;;  %v7971_v6 = vrot.slane %v4821_v13, 2 }
 0x146   : > { %v7972_v52 = vrot.slane %v4308_v15, 2  ;;  %v1905_v27 = vsub.f32 %v1129_v17, %v4860_v48  ;;  %v896_v0 = vmul.f32 %v5025_v4, %v5025_v4  ;;  %v866_v63 = vrot.slane %v4865_v16, 6 }
 0x147   : > { %3307 = vrsqrt.f32 %v5031_v21  ;;  %v5053_v41 = vmul.f32 %v1906_v28, %v1906_v28  ;;  %v5056_v10 = vmul.f32 %v1845_v62, %v1845_v62  ;;  %v888_v22 = vadd.f32 %v5025_v4, %v836_v61 }
 0x148   : > { %v1028_v24 = vsel %vm1022_vm6, %v7972_v52, %v7971_v6  ;;  %3309 = vrsqrt.f32 %v5033_v46  ;;  %v5059_v50 = vmul.f32 %v1815_v36, %v1815_v36  ;;  %v5065_v17 = vsel %vm809_vm4, %v911_v44, %v925_v37 }
 0x149   : > { %v5061_v9 = vmul.f32 %v1028_v24, %v1028_v24  ;;  %v1847_v51 = vsub.f32 %v1028_v24, %v4996_v55  ;;  %v5067_v31 = vmul.f32 %v1755_v32, %v1755_v32  ;;  %v948_v28 = vadd.f32 %v5065_v17, %v888_v22 }
 0x14a   : > { %v956_v25 = vmul.f32 %v5065_v17, %v5065_v17  ;;  %v7973_v62 = vperm.slane %v4821_v13, 7  ;;  %v7974_v61 = vmov %v7971_v6  ;;  %v5079_v6 = vmul.f32 %v1756_v26, %v1756_v26 }
 0x14b   : > { %v5081_v52 = vmul.f32 %v1905_v27, %v1905_v27  ;;  %v904_v44 = vadd.f32 %v896_v0, %v852_v57  ;;  %v5084_v32 = vsel %vm809_vm4, %v865_v35, %v866_v63  ;;  %v972_v22 = vadd.f32 %v948_v28, %v4308_v15 }
 0x14c   : > { %v5077_v36 = vsel %vm1022_vm6, %v7974_v61, %v7973_v62  ;;  %v5089_v30 = vsel %vm434_vm7, %v417_v60, %v4759_v43  ;;  %v860_v1 = vperm.slane %v4802_v14, 0  ;;  %v868_v62 = vrot.slane %v4802_v14, 6 }
 0x14d   : > { %v3308_v61 = vpop.eup %3307  ;;  %v5093_v26 = vmul.f32 %v1847_v51, %v1847_v51  ;;  %v964_v27 = vadd.f32 %v956_v25, %v904_v44  ;;  %v926_v57 = vrot.slane %v5089_v30, 6  ;;  %v1848_v35 = vsub.f32 %v5077_v36, %v4865_v16 }
 0x14e   : > { %v3310_v0 = vpop.eup %3309  ;;  %v1216_v15 = vmul.f32 %v3308_v61, %v5031_v21  ;;  %v897_v43 = vmul.f32 %v5084_v32, %v5084_v32  ;;  %v5103_v60 = vmul.f32 %v5077_v36, %v5077_v36  ;;  %v869_v63 = vrot.slane %v4732_v38, 6 }
 0x14f   : > { %7975 = vst [vmem:[#allocation101_spill] sm:$0xff] %v5093_v26  ;;  %v1228_v51 = vmul.f32 %v3310_v0, %v5033_v46  ;;  %v996_v28 = vadd.f32 %v972_v22, %v5029_v40  ;;  %v889_v25 = vadd.f32 %v5084_v32, %v4973_v49  ;;  %v5111_v44 = vsel %vm809_vm4, %v925_v37, %v926_v57 }
 0x150   : > { %v1217_v3 = vmul.f32 %v3308_v61, %v1216_v15  ;;  %v1078_v23 = vrot.slane %v4996_v55, 2  ;;  %v1079_v8 = vrot.slane %v4865_v16, 2  ;;  %v5116_v5 = vsel %vm809_vm4, %v860_v1, %v868_v62 }
 0x151   : > { %v1229_v2 = vmul.f32 %v3310_v0, %v1228_v51  ;;  %v988_v19 = vadd.f32 %v4384_v12, %v964_v27  ;;  %v957_v22 = vmul.f32 %v5111_v44, %v5111_v44  ;;  %v5121_v26 = vmul.f32 %v1848_v35, %v1848_v35 }
 0x152   : > { %v1218_v49 = vmul.f32 0.5, %v1217_v3  ;;  %v905_v37 = vadd.f32 %v897_v43, %v4991_v33  ;;  %v949_v57 = vadd.f32 %v5111_v44, %v889_v25  ;;  %v5126_v15 = vsel %vm809_vm4, %v868_v62, %v869_v63 }
 0x153   : > { %v1230_v11 = vmul.f32 0.5, %v1229_v2  ;;  %v1004_v1 = vmul.f32 %v5029_v40, %v5029_v40  ;;  %v1049_v51 = vadd.f32 %v1028_v24, %v996_v28  ;;  %v898_v12 = vmul.f32 %v5116_v5, %v5116_v5 }
 0x154   : > { %v1219_v27 = vsub.f32 1.5, %v1218_v49  ;;  %v5133_v35 = vsel %vm1022_vm6, %v1078_v23, %v1079_v8  ;;  %v1130_v3 = vrot.slane %v5029_v40, 2  ;;  %v965_v33 = vadd.f32 %v957_v22, %v905_v37 }
 0x155   : > { %vm1222_vm8 = vcmp.eq.f32.partialorder %v5031_v21, inf  ;;  %vm1224_vm9 = vcmp.eq.f32.partialorder %v5031_v21, 0.0  ;;  %v1231_v62 = vsub.f32 1.5, %v1230_v11  ;;  %v1012_v2 = vadd.f32 %v1004_v1, %v988_v19 }
 0x156   : > { %v1220_v43 = vmul.f32 %v3308_v61, %v1219_v27  ;;  %v1225_v63 = vand.u32 2147483648, %v5031_v21  ;;  %v973_v24 = vadd.f32 %v949_v57, %v4821_v13  ;;  %v1131_v28 = vrot.slane %v5089_v30, 2 }
 0x157   : > { %v1232_v25 = vmul.f32 %v3310_v0, %v1231_v62  ;;  %vm1234_vm10 = vcmp.eq.f32.partialorder %v5033_v46, inf  ;;  %v1101_v23 = vadd.f32 %v5133_v35, %v1049_v51  ;;  %v1072_v22 = vperm.slane %v4865_v16, 7 }
 0x158   : > { %v1221_v49 = vmul.f32 %v1220_v43, %v5031_v21  ;;  %vm1236_vm11 = vcmp.eq.f32.partialorder %v5033_v46, 0.0  ;;  %v989_v11 = vadd.f32 %v4855_v42, %v965_v33  ;;  %v1005_v19 = vmul.f32 %v5089_v30, %v5089_v30 }
 0x159   : > { %v1233_v13 = vmul.f32 %v1232_v25, %v5033_v46  ;;  %v1237_v61 = vand.u32 2147483648, %v5033_v46  ;;  %v1109_v0 = vmul.f32 %v5133_v35, %v5133_v35  ;;  %v1065_v37 = vadd.f32 %v5061_v9, %v1012_v2 }
 0x15a   : > { %v1223_v57 = vsel %vm1222_vm8, %v5031_v21, %v1221_v49  ;;  %v997_v1 = vadd.f32 %v973_v24, %v5089_v30  ;;  %v1013_v51 = vadd.f32 %v1005_v19, %v989_v11  ;;  %v5159_v42 = vsel %vm1022_vm6, %v1130_v3, %v1131_v28 }
 0x15b   : > { %v1226_v27 = vsel %vm1224_vm9, %v1225_v63, %v1223_v57  ;;  %v1235_v33 = vsel %vm1234_vm10, %v5033_v46, %v1233_v13  ;;  %v5167_v62 = vsel %vm1022_vm6, %v1079_v8, %v1072_v22  ;;  %v1153_v9 = vadd.f32 %v5159_v42, %v1101_v23 }
 0x15c   : > { %v1238_v2 = vsel %vm1236_vm11, %v1237_v61, %v1235_v33  ;;  %v1311_v43 = vadd.f32 0.0001, %v1226_v27  ;;  %v1050_v24 = vadd.f32 %v5077_v36, %v997_v1  ;;  %v899_v3 = vmul.f32 %v5126_v15, %v5126_v15 }
 0x15d   : > { %v1312_v25 = vadd.f32 0.0001, %v1238_v2  ;;  %v1117_v49 = vadd.f32 %v1109_v0, %v1065_v37  ;;  %v1124_v21 = vperm.slane %v5089_v30, 7  ;;  %v1177_v63 = vmul.f32 %v1153_v9, %v1153_v9  ;;  %v396_v9 = vpop.permute.xlu2 %395  ;;  %v7978_v2 = vld [vmem:[#allocation19_spill] sm:$0xff] }
 0x15e   : > { %v5174_v11 = vmul.f32 %v1311_v43, %v1311_v43  ;;  %v1110_v8 = vmul.f32 %v5167_v62, %v5167_v62  ;;  %v1066_v46 = vadd.f32 %v5103_v60, %v1013_v51  ;;  %v1102_v23 = vadd.f32 %v5167_v62, %v1050_v24 }
 0x15f   : > { %v5180_v22 = vmul.f32 %v1312_v25, %v1312_v25  ;;  %v1817_v36 = vsub.f32 %v5029_v40, %v4996_v55  ;;  %v1161_v19 = vmul.f32 %v5159_v42, %v5159_v42  ;;  %v1185_v13 = vmul.f32 0.0625, %v1177_v63 }
 0x160   : > { %3311 = vrcp.f32 %v5174_v11  ;;  %v1757_v61 = vsub.f32 %v5065_v17, %v4996_v55  ;;  %v5191_v0 = vadd.f32 %v5116_v5, %v4826_v45  ;;  %v7976_v60 = vrot.slane %v4436_v29, 2 }
 0x161   : > { %v7977_v37 = vrot.slane %v4715_v47, 2  ;;  %3313 = vrcp.f32 %v5180_v22  ;;  %v1725_v40 = vsub.f32 %v4891_v20, %v4860_v48  ;;  %v5204_v1 = vsel %vm1022_vm6, %v1131_v28, %v1124_v21  ;;  %v7979_v28 = vld [vmem:[#allocation14_spill] sm:$0xff] }
 0x162   : > { %v1169_v17 = vadd.f32 %v1161_v19, %v1117_v49  ;;  %v1118_v51 = vadd.f32 %v1110_v8, %v1066_v46  ;;  %v1154_v45 = vadd.f32 %v5204_v1, %v1102_v23  ;;  %v5209_v27 = vadd.f32 %v5126_v15, %v4828_v18 }
 0x163   : > { %v5198_v57 = vsel %vm1022_vm6, %v7977_v37, %v7976_v60  ;;  %v5212_v33 = vadd.f32 %v898_v12, %v4830_v39  ;;  %v1726_v43 = vsub.f32 %v7978_v2, %v4755_v59  ;;  %v5216_v24 = vmul.f32 %v1817_v36, %v1817_v36 }
 0x164   : > { %v1193_v20 = vsub.f32 %v1169_v17, %v1185_v13  ;;  %v5219_v25 = vadd.f32 %v899_v3, %v7979_v28  ;;  %v1875_v49 = vsub.f32 %v4927_v54, %v4860_v48  ;;  %v1162_v18 = vmul.f32 %v5204_v1, %v5204_v1 }
 0x165   : > { %v1178_v21 = vmul.f32 %v1154_v45, %v1154_v45  ;;  %v5227_v39 = vmul.f32 %v5198_v57, %v5198_v57  ;;  %v5229_v12 = vmul.f32 %v1725_v40, %v1725_v40  ;;  %v5231_v63 = vmul.f32 %v1757_v61, %v1757_v61 }
 0x166   : > { %v1201_v8 = vmul.f32 0.06666667, %v1193_v20  ;;  %v5235_v3 = vsub.f32 %v5198_v57, %v4802_v14  ;;  %v3312_v46 = vpop.eup %3311  ;;  %v1727_v48 = vsub.f32 %v5025_v4, %v4996_v55  ;;  %v1876_v54 = vsub.f32 %v4917_v34, %v4755_v59 }
 0x167   : > { %v1170_v23 = vadd.f32 %v1162_v18, %v1118_v51  ;;  %v1186_v36 = vmul.f32 0.0625, %v1178_v21  ;;  %v3314_v19 = vpop.eup %3313  ;;  %v1328_v13 = vmul.f32 %v3312_v46, %v5174_v11  ;;  %v1734_v60 = vmul.f32 %v1726_v43, %v1726_v43  ;;  %v400_v18 = vpop.permute.xlu0 %399 }
 0x168   : > { %7980 = vst [vmem:[#allocation19_spill] sm:$0xff] %v5235_v3  ;;  %v5244_v61 = vsub.f32 %v5133_v35, %v4996_v55  ;;  %v5246_v37 = vmax.f32 %v1201_v8, 0.0  ;;  %v1343_v40 = vmul.f32 %v3314_v19, %v5180_v22  ;;  %v1883_v17 = vmul.f32 %v1875_v49, %v1875_v49  ;;  %v419_v21 = vpop.permute.xlu1 %418 }
 0x169   : > { %v5251_v4 = vsub.f32 %v5084_v32, %v4865_v16  ;;  %v1194_v34 = vsub.f32 %v1170_v23, %v1186_v36  ;;  %v1329_v59 = vsub.f32 1.0, %v1328_v13  ;;  %v1336_v51 = vand.u32 2147483647, %v5174_v11  ;;  %v421_v36 = vpop.permute.xlu2 %420 }
 0x16a   : > { %v1338_v45 = vand.u32 2147483648, %v5174_v11  ;;  %3315 = vrsqrt.f32 %v5246_v37  ;;  %v1344_v2 = vsub.f32 1.0, %v1343_v40  ;;  %v5256_v35 = vmul.f32 %v1727_v48, %v1727_v48 }
 0x16b   : > { %v5258_v43 = vmul.f32 %v1876_v54, %v1876_v54  ;;  %v1202_v20 = vmul.f32 0.06666667, %v1194_v34  ;;  %v1330_v28 = vmul.f32 %v3312_v46, %v1329_v59  ;;  %vm1333_vm12 = vweird.f32 %v3312_v46 }
 0x16c   : > { %v1351_v49 = vand.u32 2147483647, %v5180_v22  ;;  %v1353_v32 = vand.u32 2147483648, %v5180_v22  ;;  %vm1332_vm13 = vweird.f32 %v5174_v11  ;;  %v1345_v8 = vmul.f32 %v3314_v19, %v1344_v2 }
 0x16d   : > { %vm1348_vm14 = vweird.f32 %v3314_v19  ;;  %v5263_v23 = vmax.f32 %v1202_v20, 0.0  ;;  %v1331_v48 = vadd.f32 %v3312_v46, %v1330_v28  ;;  %vm1337_vm15 = vcmp.eq.f32.partialorder %v1336_v51, 8.507059e+37  ;;  %vm1334_vm9 = vmor %vm1332_vm13, %vm1333_vm12 }
 0x16e   : > { %v1339_v54 = vor.u32 1.1754944e-38, %v1338_v45  ;;  %vm1347_vm8 = vweird.f32 %v5180_v22  ;;  %v1346_v13 = vadd.f32 %v3314_v19, %v1345_v8  ;;  %v5268_v40 = vsel %vm434_vm7, %v421_v36, %v400_v18 }
 0x16f   : > { %3317 = vrsqrt.f32 %v5263_v23  ;;  %v5271_v34 = vsel %vm434_vm7, %v419_v21, %v396_v9  ;;  %v1335_v59 = vsel %vm1334_vm9, %v3312_v46, %v1331_v48  ;;  %vm1349_vm10 = vmor %vm1347_vm8, %vm1348_vm14  ;;  %vm1352_vm11 = vcmp.eq.f32.partialorder %v1351_v49, 8.507059e+37 }
 0x170   : > { %v3316_v11 = vpop.eup %3315  ;;  %v1354_v2 = vor.u32 1.1754944e-38, %v1353_v32  ;;  %v1340_v45 = vsel %vm1337_vm15, %v1339_v54, %v1335_v59  ;;  %v1350_v20 = vsel %vm1349_vm10, %v3314_v19, %v1346_v13  ;;  %v1081_v28 = vrot.slane %v4802_v14, 2 }
 0x171   : > { %v1240_v22 = vmul.f32 %v3316_v11, %v5246_v37  ;;  %v5276_v3 = vmul.f32 -2.7777777, %v1340_v45  ;;  %v929_v18 = vrot.slane %v5268_v40, 6  ;;  %v912_v9 = vperm.slane %v5271_v34, 0 }
 0x172   : > { %v1355_v8 = vsel %vm1352_vm11, %v1354_v2, %v1350_v20  ;;  %v1082_v49 = vrot.slane %v4732_v38, 2  ;;  %v928_v32 = vrot.slane %v5271_v34, 6  ;;  %vm1246_vm12 = vcmp.eq.f32.partialorder %v5246_v37, inf }
 0x173   : > { %7981 = vst [vmem:[#allocation14_spill] sm:$0xff] %v5276_v3  ;;  %v5280_v21 = vmul.f32 -2.7777777, %v1355_v8  ;;  %v1241_v46 = vmul.f32 %v3316_v11, %v1240_v22  ;;  %v5286_v19 = vmul.f32 %v5229_v12, %v5276_v3  ;;  %v5290_v36 = vmul.f32 %v5067_v31, %v5276_v3 }
 0x174   : > { %v5294_v48 = vmul.f32 %v5059_v50, %v5276_v3  ;;  %v5298_v54 = vmul.f32 %v5056_v10, %v5276_v3  ;;  %v5308_v2 = vmul.f32 %v1883_v17, %v5276_v3  ;;  %v5312_v31 = vmul.f32 %v5081_v52, %v5276_v3 }
 0x175   : > { %7982 = vst [vmem:[#allocation102_spill] sm:$0xff] %v5280_v21  ;;  %v3318_v13 = vpop.eup %3317  ;;  %v5301_v59 = vmul.f32 %v1734_v60, %v5280_v21  ;;  %v5305_v12 = vmul.f32 %v5079_v6, %v5280_v21  ;;  %v1242_v50 = vmul.f32 0.5, %v1241_v46  ;;  %v5316_v10 = vsel %vm809_vm4, %v928_v32, %v929_v18 }
 0x176   : > { %7983 = vst [vmem:[#allocation103_spill] sm:$0xff] %v5298_v54  ;;  %v1252_v45 = vmul.f32 %v3318_v13, %v5263_v23  ;;  %v5319_v60 = vsel %vm809_vm4, %v912_v9, %v928_v32  ;;  %v951_v17 = vadd.f32 %v5316_v10, %v5209_v27  ;;  %v959_v52 = vmul.f32 %v5316_v10, %v5316_v10 }
 0x177   : > { %7984 = vst [vmem:[#allocation104_spill] sm:$0xff] %v5308_v2  ;;  %v950_v6 = vadd.f32 %v5319_v60, %v5191_v0  ;;  %v958_v20 = vmul.f32 %v5319_v60, %v5319_v60  ;;  %v1243_v22 = vsub.f32 1.5, %v1242_v50  ;;  %v1007_v18 = vmul.f32 %v5268_v40, %v5268_v40  ;;  %v7985_v2 = vld [vmem:[#allocation42_spill] sm:$0xff] }
 0x178   : > { %v1253_v8 = vmul.f32 %v3318_v13, %v1252_v45  ;;  %v1125_v9 = vperm.slane %v5268_v40, 7  ;;  %v967_v0 = vadd.f32 %v959_v52, %v5219_v25  ;;  %v975_v27 = vadd.f32 %v951_v17, %v4436_v29  ;;  %v7986_v17 = vld [vmem:[#allocation76_spill] sm:$0xff] }
 0x179   : > { %v966_v46 = vadd.f32 %v958_v20, %v5212_v33  ;;  %v974_v32 = vadd.f32 %v950_v6, %v4715_v47  ;;  %v1244_v51 = vmul.f32 %v3316_v11, %v1243_v22  ;;  %vm1248_vm13 = vcmp.eq.f32.partialorder %v5246_v37, 0.0  ;;  %v7987_v22 = vld [vmem:[#allocation32_spill] sm:$0xff] }
 0x17a   : > { %v1254_v50 = vmul.f32 0.5, %v1253_v8  ;;  %v1249_v45 = vand.u32 2147483648, %v5246_v37  ;;  %v5340_v3 = vsel %vm1022_vm6, %v1081_v28, %v1082_v49  ;;  %v1006_v33 = vmul.f32 %v5271_v34, %v5271_v34 }
 0x17b   : > { %v990_v54 = vadd.f32 %v7985_v2, %v966_v46  ;;  %v1245_v25 = vmul.f32 %v1244_v51, %v5246_v37  ;;  %v991_v11 = vadd.f32 %v7986_v17, %v967_v0  ;;  %v998_v20 = vadd.f32 %v974_v32, %v5271_v34 }
 0x17c   : > { %v1255_v6 = vsub.f32 1.5, %v1254_v50  ;;  %v5350_v52 = vmul.f32 %v5015_v7, %v5280_v21  ;;  %v5354_v28 = vmul.f32 %v7987_v22, %v5280_v21  ;;  %v5358_v2 = vmul.f32 %v5258_v43, %v5280_v21  ;;  %v7989_v22 = vld [vmem:[#allocation75_spill] sm:$0xff] }
 0x17d   : > { %v999_v8 = vadd.f32 %v975_v27, %v5268_v40  ;;  %v1247_v51 = vsel %vm1246_vm12, %v5246_v37, %v1245_v25  ;;  %v5364_v0 = vmul.f32 %v5053_v41, %v5280_v21  ;;  %v1014_v32 = vadd.f32 %v1006_v33, %v990_v54 }
 0x17e   : > { %v1256_v46 = vmul.f32 %v3318_v13, %v1255_v6  ;;  %v1250_v7 = vsel %vm1248_vm13, %v1249_v45, %v1247_v51  ;;  %vm1258_vm14 = vcmp.eq.f32.partialorder %v5263_v23, inf  ;;  %vm1260_vm15 = vcmp.eq.f32.partialorder %v5263_v23, 0.0 }
 0x17f   : > { %v1134_v43 = vrot.slane %v5268_v40, 2  ;;  %v1313_v27 = vadd.f32 0.0001, %v1250_v7  ;;  %v7988_v25 = vperm.slane %v4732_v38, 7  ;;  %v1015_v41 = vadd.f32 %v1007_v18, %v991_v11  ;;  %v7990_v11 = vld [vmem:[#allocation77_spill] sm:$0xff] }
 0x180   : > { %v1257_v50 = vmul.f32 %v1256_v46, %v5263_v23  ;;  %v1261_v54 = vand.u32 2147483648, %v5263_v23  ;;  %v1111_v37 = vmul.f32 %v5340_v3, %v5340_v3  ;;  %v1051_v45 = vadd.f32 %v5198_v57, %v998_v20 }
 0x181   : > { %v5375_v13 = vsel %vm1022_vm6, %v1082_v49, %v7988_v25  ;;  %v1133_v33 = vrot.slane %v5271_v34, 2  ;;  %v5383_v17 = vmul.f32 %v1313_v27, %v1313_v27  ;;  %v1052_v51 = vadd.f32 %v7989_v22, %v999_v8 }
 0x182   : > { %v1259_v6 = vsel %vm1258_vm14, %v5263_v23, %v1257_v50  ;;  %v1067_v46 = vadd.f32 %v5227_v39, %v1014_v32  ;;  %v1112_v18 = vmul.f32 %v5375_v13, %v5375_v13  ;;  %v1068_v7 = vadd.f32 %v7990_v11, %v1015_v41 }
 0x183   : > { %v1262_v49 = vsel %vm1260_vm15, %v1261_v54, %v1259_v6  ;;  %v1103_v25 = vadd.f32 %v5340_v3, %v1051_v45  ;;  %v5393_v57 = vmul.f32 %v5244_v61, %v5244_v61  ;;  %v1878_v23 = vsub.f32 %v5167_v62, %v4865_v16 }
 0x184   : > { %v1314_v20 = vadd.f32 0.0001, %v1262_v49  ;;  %3319 = vrcp.f32 %v5383_v17  ;;  %v1758_v39 = vsub.f32 %v5111_v44, %v4865_v16  ;;  %v1818_v8 = vsub.f32 %v5089_v30, %v4865_v16 }
 0x185   : > { %v1104_v32 = vadd.f32 %v5375_v13, %v1052_v51  ;;  %v5404_v50 = vsel %vm1022_vm6, %v1133_v33, %v1134_v43  ;;  %v1149_v61 = vsel %vm1022_vm6, %v1134_v43, %v1125_v9  ;;  %v1119_v41 = vadd.f32 %v1111_v37, %v1067_v46 }
 0x186   : > { %v5406_v27 = vmul.f32 %v1314_v20, %v1314_v20  ;;  %v1155_v62 = vadd.f32 %v5404_v50, %v1103_v25  ;;  %v5412_v54 = vmul.f32 %v5251_v4, %v5251_v4  ;;  %v1907_v44 = vsub.f32 %v5159_v42, %v4996_v55 }
 0x187   : > { %v1120_v30 = vadd.f32 %v1112_v18, %v1068_v7  ;;  %v1156_v45 = vadd.f32 %v1149_v61, %v1104_v32  ;;  %v1908_v33 = vsub.f32 %v5204_v1, %v4865_v16  ;;  %v1820_v9 = vsub.f32 %v5268_v40, %v4732_v38  ;;  %v404_v32 = vpop.permute.xlu0 %403 }
 0x188   : > { %3321 = vrcp.f32 %v5406_v27  ;;  %v1163_v43 = vmul.f32 %v5404_v50, %v5404_v50  ;;  %v5423_v37 = vmul.f32 %v1878_v23, %v1878_v23  ;;  %v1164_v4 = vmul.f32 %v1149_v61, %v1149_v61 }
 0x189   : > { %v1179_v6 = vmul.f32 %v1155_v62, %v1155_v62  ;;  %v1180_v51 = vmul.f32 %v1156_v45, %v1156_v45  ;;  %v1366_v55 = vand.u32 2147483647, %v5383_v17  ;;  %v5426_v42 = vmul.f32 %v1758_v39, %v1758_v39 }
 0x18a   : > { %v3320_v46 = vpop.eup %3319  ;;  %v5428_v49 = vmul.f32 %v1818_v8, %v1818_v8  ;;  %v1171_v18 = vadd.f32 %v1163_v43, %v1119_v41  ;;  %v1172_v1 = vadd.f32 %v1164_v4, %v1120_v30  ;;  %v1368_v7 = vand.u32 2147483648, %v5383_v17  ;;  %v423_v41 = vpop.permute.xlu2 %422 }
 0x18b   : > { %v1358_v16 = vmul.f32 %v3320_v46, %v5383_v17  ;;  %v1187_v40 = vmul.f32 0.0625, %v1179_v6  ;;  %v1188_v11 = vmul.f32 0.0625, %v1180_v51  ;;  %v1915_v25 = vmul.f32 %v1907_v44, %v1907_v44 }
 0x18c   : > { %v5432_v23 = vmul.f32 %v1908_v33, %v1908_v33  ;;  %v5434_v20 = vmul.f32 %v1820_v9, %v1820_v9  ;;  %v1910_v39 = vsub.f32 %v1149_v61, %v4732_v38  ;;  %vm1362_vm8 = vweird.f32 %v5383_v17 }
 0x18d   : > { %v1359_v62 = vsub.f32 1.0, %v1358_v16  ;;  %v1195_v45 = vsub.f32 %v1171_v18, %v1187_v40  ;;  %v1196_v8 = vsub.f32 %v1172_v1, %v1188_v11  ;;  %vm1363_vm9 = vweird.f32 %v3320_v46  ;;  %v5453_v40 = vld [vmem:[%s3694_s7 + $0x30] sm:$0xff] }
 0x18e   : > { %v3322_v21 = vpop.eup %3321  ;;  %vm5438_vm10 = vcmp.eq.f32.partialorder %v1366_v55, 8.507059e+37  ;;  %v1759_v44 = vsub.f32 %v5319_v60, %v4802_v14  ;;  %v5446_v61 = vsel %vm434_vm7, %v423_v41, %v404_v32  ;;  %v1369_v4 = vor.u32 1.1754944e-38, %v1368_v7  ;;  %vm1364_vm11 = vmor %vm1362_vm8, %vm1363_vm9 }
 0x18f   : > { %v1360_v33 = vmul.f32 %v3320_v46, %v1359_v62  ;;  %v1373_v9 = vmul.f32 %v3322_v21, %v5406_v27  ;;  %v1203_v43 = vmul.f32 0.06666667, %v1195_v45  ;;  %v1381_v6 = vand.u32 2147483647, %v5406_v27 }
 0x190   : > { %v1383_v51 = vand.u32 2147483648, %v5406_v27  ;;  %v1204_v18 = vmul.f32 0.06666667, %v1196_v8  ;;  %v861_v60 = vperm.slane %v5453_v40, 0  ;;  %v871_v7 = vrot.slane %v5453_v40, 6 }
 0x191   : > { %v1361_v55 = vadd.f32 %v3320_v46, %v1360_v33  ;;  %v1374_v16 = vsub.f32 1.0, %v1373_v9  ;;  %v5450_v1 = vmax.f32 %v1203_v43, 0.0  ;;  %v913_v32 = vperm.slane %v5446_v61, 0 }
 0x192   : > { %v5459_v11 = vmax.f32 %v1204_v18, 0.0  ;;  %v7736_v62 = vrot.slane %v5446_v61, 6  ;;  %vm1378_vm12 = vweird.f32 %v3322_v21  ;;  %v5467_v33 = vmul.f32 %v1910_v39, %v1910_v39  ;;  %v5497_v18 = vld [vmem:[%s3694_s7 + $0x28] sm:$0xff] }
 0x193   : > { %v1365_v45 = vsel %vm1364_vm11, %v3320_v46, %v1361_v55  ;;  %v1375_v8 = vmul.f32 %v3322_v21, %v1374_v16  ;;  %3323 = vrsqrt.f32 %v5450_v1  ;;  %v5472_v17 = vsub.f32 %v5316_v10, %v4732_v38 }
 0x194   : > { %v1370_v41 = vsel %vm5438_vm10, %v1369_v4, %v1365_v45  ;;  %3325 = vrsqrt.f32 %v5459_v11  ;;  %vm1377_vm13 = vweird.f32 %v5406_v27  ;;  %v5477_v43 = vmul.f32 %v1759_v44, %v1759_v44 }
 0x195   : > { %v1376_v9 = vadd.f32 %v3322_v21, %v1375_v8  ;;  %v5475_v46 = vmul.f32 -2.7777777, %v1370_v41  ;;  %vm1379_vm14 = vmor %vm1377_vm13, %vm1378_vm12  ;;  %vm1382_vm15 = vcmp.eq.f32.partialorder %v1381_v6, 8.507059e+37  ;;  %v1384_v30 = vor.u32 1.1754944e-38, %v1383_v51 }
 0x196   : > { %v5482_v39 = vsel %vm809_vm4, %v861_v60, %v871_v7  ;;  %v5487_v38 = vsel %vm809_vm4, %v913_v32, %v7736_v62  ;;  %v1729_v51 = vsub.f32 %v5116_v5, %v4802_v14  ;;  %v1730_v55 = vsub.f32 %v5126_v15, %v5497_v18 }
 0x197   : > { %v1380_v10 = vsel %vm1379_vm14, %v3322_v21, %v1376_v9  ;;  %v1923_v27 = vmul.f32 %v1915_v25, %v5475_v46  ;;  %v1743_v44 = vmul.f32 %v5256_v35, %v5475_v46  ;;  %v1773_v4 = vmul.f32 %v5231_v63, %v5475_v46 }
 0x198   : > { %v1385_v6 = vsel %vm1382_vm15, %v1384_v30, %v1380_v10  ;;  %v1879_v21 = vsub.f32 %v5340_v3, %v4802_v14  ;;  %v1880_v32 = vsub.f32 %v5375_v13, %v5497_v18  ;;  %v900_v14 = vmul.f32 %v5482_v39, %v5482_v39 }
 0x199   : > { %v3324_v16 = vpop.eup %3323  ;;  %v5503_v25 = vmul.f32 -2.7777777, %v1385_v6  ;;  %v5506_v35 = vadd.f32 %v1923_v27, %v5312_v31  ;;  %v5509_v63 = vadd.f32 %v1743_v44, %v5286_v19  ;;  %v5512_v60 = vadd.f32 %v1773_v4, %v5290_v36 }
 0x19a   : > { %v3326_v5 = vpop.eup %3325  ;;  %v1264_v15 = vmul.f32 %v3324_v16, %v5450_v1  ;;  %v960_v3 = vmul.f32 %v5487_v38, %v5487_v38  ;;  %v5554_v27 = vmul.f32 %v1730_v55, %v1730_v55  ;;  %v5563_v4 = vmul.f32 %v1880_v32, %v1880_v32  ;;  %v7999_v55 = vld [vmem:[#allocation17_spill] sm:$0xff] }
 0x19b   : > { %v1744_v31 = vmul.f32 %v5412_v54, %v5503_v25  ;;  %v1774_v19 = vmul.f32 %v5426_v42, %v5503_v25  ;;  %v1834_v36 = vmul.f32 %v5428_v49, %v5503_v25  ;;  %v1864_v13 = vmul.f32 %v5121_v26, %v5503_v25 }
 0x19c   : > { %v1894_v45 = vmul.f32 %v5423_v37, %v5503_v25  ;;  %v1924_v8 = vmul.f32 %v5432_v23, %v5503_v25  ;;  %v1265_v41 = vmul.f32 %v3324_v16, %v1264_v15  ;;  %v1276_v9 = vmul.f32 %v3326_v5, %v5459_v11 }
 0x19d   : > { %v5535_v54 = vadd.f32 %v1744_v31, %v5301_v59  ;;  %v5538_v42 = vadd.f32 %v1774_v19, %v5305_v12  ;;  %v5541_v49 = vadd.f32 %v1834_v36, %v5350_v52  ;;  %v5544_v26 = vadd.f32 %v1864_v13, %v5354_v28  ;;  %v5577_v36 = vld [vmem:[%s3694_s7 + $0x38] sm:$0xff] }
 0x19e   : > { %v5547_v37 = vadd.f32 %v1894_v45, %v5358_v2  ;;  %v5550_v23 = vadd.f32 %v1924_v8, %v5364_v0  ;;  %v1266_v30 = vmul.f32 0.5, %v1265_v41  ;;  %v1277_v10 = vmul.f32 %v3326_v5, %v1276_v9  ;;  %v8002_v9 = vld [vmem:[#allocation103_spill] sm:$0xff] }
 0x19f   : > { %7993 = vst [vmem:[#allocation42_spill] sm:$0xff] %v5535_v54  ;;  %v5552_v59 = vmul.f32 %v1729_v51, %v1729_v51  ;;  %v1833_v12 = vmul.f32 %v5216_v24, %v5475_v46  ;;  %v892_v52 = vadd.f32 %v5482_v39, %v5002_v53  ;;  %v5560_v28 = vmul.f32 %v1879_v21, %v1879_v21 }
 0x1a0   : > { %7994 = vst [vmem:[#allocation76_spill] sm:$0xff] %v5541_v49  ;;  %v1267_v2 = vsub.f32 1.5, %v1266_v30  ;;  %v1278_v44 = vmul.f32 0.5, %v1277_v10  ;;  %v908_v0 = vadd.f32 %v900_v14, %v5010_v58  ;;  %v7998_v51 = vrot.slane %v4844_v56, 2  ;;  %v8003_v10 = vld [vmem:[#allocation104_spill] sm:$0xff] }
 0x1a1   : > { %7995 = vst [vmem:[#allocation32_spill] sm:$0xff] %v5544_v26  ;;  %v5566_v6 = vadd.f32 %v1833_v12, %v5294_v48  ;;  %v8000_v15 = vrot.slane %v7999_v55, 2  ;;  %v952_v53 = vadd.f32 %v5487_v38, %v892_v52  ;;  %v872_v58 = vrot.slane %v5577_v36, 6  ;;  %v8001_v48 = vld [vmem:[#allocation101_spill] sm:$0xff] }
 0x1a2   : > { %7996 = vst [vmem:[#allocation75_spill] sm:$0xff] %v5547_v37  ;;  %v1268_v21 = vmul.f32 %v3324_v16, %v1267_v2  ;;  %v1279_v31 = vsub.f32 1.5, %v1278_v44  ;;  %v968_v19 = vadd.f32 %v960_v3, %v908_v0  ;;  %vm1270_vm8 = vcmp.eq.f32.partialorder %v5450_v1, inf  ;;  %v8004_v2 = vld [vmem:[#allocation97_spill] sm:$0xff]  ;;  %v8032_v37 = vld [vmem:[#allocation83_spill] sm:$0xff] }
 0x1a3   : > { %7997 = vst [vmem:[#allocation77_spill] sm:$0xff] %v5550_v23  ;;  %v5573_v24 = vsel %vm1022_vm6, %v8000_v15, %v7998_v51  ;;  %v1863_v32 = vmul.f32 %v8001_v48, %v5475_v46  ;;  %v1893_v14 = vmul.f32 %v5393_v57, %v5475_v46  ;;  %v1008_v13 = vmul.f32 %v5446_v61, %v5446_v61  ;;  %v8005_v15 = vld [vmem:[#allocation23_spill] sm:$0xff] }
 0x1a4   : > { %v1269_v45 = vmul.f32 %v1268_v21, %v5450_v1  ;;  %v1280_v16 = vmul.f32 %v3326_v5, %v1279_v31  ;;  %v1084_v3 = vrot.slane %v5453_v40, 2  ;;  %v7737_v8 = vrot.slane %v5577_v36, 2 }
 0x1a5   : > { %v1273_v41 = vand.u32 2147483648, %v5450_v1  ;;  %v5592_v30 = vadd.f32 %v1863_v32, %v8002_v9  ;;  %v5595_v12 = vadd.f32 %v1893_v14, %v8003_v10  ;;  %v976_v57 = vadd.f32 %v952_v53, %v7999_v55  ;;  %v8006_v32 = vld [vmem:[#allocation59_spill] sm:$0xff]  ;;  %v8010_v10 = vld [vmem:[#allocation78_spill] sm:$0xff]  ;;  %v408_v55 = vpop.permute.xlu1 %407 }
 0x1a6   : > { %v1271_v52 = vsel %vm1270_vm8, %v5450_v1, %v1269_v45  ;;  %vm1272_vm9 = vcmp.eq.f32.partialorder %v5450_v1, 0.0  ;;  %v1281_v5 = vmul.f32 %v1280_v16, %v5459_v11  ;;  %v992_v44 = vadd.f32 %v8004_v2, %v968_v19  ;;  %v8008_v45 = vld [vmem:[#allocation18_spill] sm:$0xff] }
 0x1a7   : > { %v1274_v0 = vsel %vm1272_vm9, %v1273_v41, %v1271_v52  ;;  %vm1282_vm10 = vcmp.eq.f32.partialorder %v5459_v11, inf  ;;  %v1285_v51 = vand.u32 2147483648, %v5459_v11  ;;  %v5606_v21 = vmul.f32 %v8005_v15, %v5475_v46  ;;  %v8018_v15 = vld [vmem:[#allocation58_spill] sm:$0xff] }
 0x1a8   : > { %v1283_v31 = vsel %vm1282_vm10, %v5459_v11, %v1281_v5  ;;  %vm1284_vm11 = vcmp.eq.f32.partialorder %v5459_v11, 0.0  ;;  %v1315_v53 = vadd.f32 0.0001, %v1274_v0  ;;  %v5613_v1 = vsel %vm1022_vm6, %v1084_v3, %v7737_v8  ;;  %v8012_v3 = vld [vmem:[#allocation38_spill] sm:$0xff]  ;;  %v8016_v0 = vld [vmem:[#allocation20_spill] sm:$0xff] }
 0x1a9   : > { %v1286_v19 = vsel %vm1284_vm11, %v1285_v51, %v1283_v31  ;;  %v1000_v48 = vadd.f32 %v976_v57, %v5446_v61  ;;  %v5618_v14 = vmul.f32 %v8006_v32, %v5503_v25  ;;  %v5622_v16 = vmul.f32 %v8008_v45, %v5475_v46  ;;  %v8014_v57 = vld [vmem:[#allocation81_spill] sm:$0xff]  ;;  %v8020_v45 = vld [vmem:[#allocation35_spill] sm:$0xff] }
 0x1aa   : > { %v1316_v41 = vadd.f32 0.0001, %v1286_v19  ;;  %v5624_v11 = vmul.f32 %v1315_v53, %v1315_v53  ;;  %v1016_v9 = vadd.f32 %v1008_v13, %v992_v44  ;;  %v5628_v52 = vmul.f32 %v8010_v10, %v5503_v25  ;;  %v5650_v44 = vld [vmem:[%s3694_s7 + $0x20] sm:$0xff] }
 0x1ab   : > { %8007 = vst [vmem:[#allocation101_spill] sm:$0xff] %v5618_v14  ;;  %v5632_v5 = vmul.f32 %v8012_v3, %v5475_v46  ;;  %v5636_v2 = vmul.f32 %v8014_v57, %v5503_v25  ;;  %v5640_v51 = vmul.f32 %v8016_v0, %v5475_v46  ;;  %v5644_v31 = vmul.f32 %v8018_v15, %v5503_v25  ;;  %v8024_v57 = vld [vmem:[#allocation60_spill] sm:$0xff] }
 0x1ac   : > { %8009 = vst [vmem:[#allocation103_spill] sm:$0xff] %v5622_v16  ;;  %v5646_v13 = vmul.f32 %v1316_v41, %v1316_v41  ;;  %3327 = vrcp.f32 %v5624_v11  ;;  %v1819_v53 = vsub.f32 %v5271_v34, %v5650_v44  ;;  %v1061_v19 = vmul.f32 %v5573_v24, %v5573_v24  ;;  %v8022_v41 = vld [vmem:[#allocation82_spill] sm:$0xff] }
 0x1ad   : > { %8011 = vst [vmem:[#allocation104_spill] sm:$0xff] %v5628_v52  ;;  %v5659_v32 = vsel %vm809_vm4, %v871_v7, %v872_v58  ;;  %v5663_v10 = vmul.f32 %v8020_v45, %v5475_v46  ;;  %v5667_v3 = vmul.f32 %v8022_v41, %v5503_v25  ;;  %v5671_v0 = vmul.f32 %v8024_v57, %v5475_v46  ;;  %v8026_v41 = vld [vmem:[#allocation61_spill] sm:$0xff]  ;;  %v8028_v57 = vld [vmem:[#allocation79_spill] sm:$0xff] }
 0x1ae   : > { %8013 = vst [vmem:[#allocation97_spill] sm:$0xff] %v5632_v5  ;;  %3329 = vrcp.f32 %v5646_v13  ;;  %v5676_v34 = vmul.f32 %v5472_v17, %v5472_v17  ;;  %v1909_v7 = vsub.f32 %v5404_v50, %v5650_v44  ;;  %v1113_v58 = vmul.f32 %v5613_v1, %v5613_v1  ;;  %v8030_v50 = vld [vmem:[#allocation80_spill] sm:$0xff] }
 0x1af   : > { %8015 = vst [vmem:[#allocation23_spill] sm:$0xff] %v5636_v2  ;;  %v1053_v15 = vadd.f32 %v5573_v24, %v1000_v48  ;;  %v1069_v45 = vadd.f32 %v1061_v19, %v1016_v9  ;;  %v5685_v62 = vmul.f32 %v8026_v41, %v5503_v25  ;;  %v5689_v8 = vmul.f32 %v8028_v57, %v5475_v46  ;;  %v8034_v9 = vld [vmem:[#allocation84_spill] sm:$0xff]  ;;  %v425_v41 = vpop.permute.xlu0 %424 }
 0x1b0   : > { %8017 = vst [vmem:[#allocation59_spill] sm:$0xff] %v5640_v51  ;;  %v901_v17 = vmul.f32 %v5659_v32, %v5659_v32  ;;  %v5695_v23 = vmul.f32 %v8030_v50, %v5503_v25  ;;  %v5699_v48 = vmul.f32 %v8032_v37, %v5475_v46  ;;  %v5703_v19 = vmul.f32 %v8034_v9, %v5503_v25 }
 0x1b1   : > { %8019 = vst [vmem:[#allocation18_spill] sm:$0xff] %v5644_v31  ;;  %v5705_v26 = vmul.f32 %v1819_v53, %v1819_v53  ;;  %v8036_v57 = vperm.slane %v4844_v56, 7  ;;  %v8037_v49 = vrot.slane %v4844_v56, 2  ;;  %v1074_v50 = vperm.slane %v5577_v36, 7 }
 0x1b2   : > { %8021 = vst [vmem:[#allocation78_spill] sm:$0xff] %v5663_v10  ;;  %v1136_v53 = vrot.slane %v5446_v61, 2  ;;  %v5733_v31 = vadd.f32 %v1113_v58, %v1069_v45  ;;  %v1398_v58 = vand.u32 2147483648, %v5624_v11  ;;  %v8046_v45 = vrot.slane %v5446_v61, 6 }
 0x1b3   : > { %8023 = vst [vmem:[#allocation38_spill] sm:$0xff] %v5667_v3  ;;  %v5712_v54 = vsel %vm1022_vm6, %v8037_v49, %v8036_v57  ;;  %v1105_v57 = vadd.f32 %v5613_v1, %v1053_v15  ;;  %v8043_v3 = vld [vmem:[#allocation99_spill] sm:$0xff]  ;;  %v1396_v15 = vand.u32 2147483647, %v5624_v11  ;;  %vm1392_vm13 = vweird.f32 %v5624_v11 }
 0x1b4   : > { %8025 = vst [vmem:[#allocation81_spill] sm:$0xff] %v5671_v0  ;;  %v893_v10 = vadd.f32 %v5659_v32, %v8043_v3  ;;  %v5738_v51 = vmul.f32 %v5712_v54, %v5712_v54  ;;  %v8045_v3 = vrot.slane %v5577_v36, 2  ;;  %vm1407_vm9 = vweird.f32 %v5646_v13 }
 0x1b5   : > { %8027 = vst [vmem:[#allocation20_spill] sm:$0xff] %v5685_v62  ;;  %v8041_v62 = vld [vmem:[#allocation96_spill] sm:$0xff]  ;;  %vm1397_vm8 = vcmp.eq.f32.partialorder %v1396_v15, 8.507059e+37 }
 0x1b6   : > { %8029 = vst [vmem:[#allocation58_spill] sm:$0xff] %v5689_v8  ;;  %v8040_v8 = vld [vmem:[#allocation19_spill] sm:$0xff]  ;;  %v5724_v0 = vmul.f32 %v8041_v62, %v5503_v25 }
 0x1b7   : > { %8031 = vst [vmem:[#allocation35_spill] sm:$0xff] %v5695_v23  ;;  %v8038_v23 = vld [vmem:[#allocation98_spill] sm:$0xff]  ;;  %v1857_v9 = vmul.f32 %v8040_v8, %v8040_v8  ;;  %v8044_v8 = vld [vmem:[#allocation100_spill] sm:$0xff] }
 0x1b8   : > { %8033 = vst [vmem:[#allocation82_spill] sm:$0xff] %v5699_v48  ;;  %v5717_v37 = vmul.f32 %v8038_v23, %v5503_v25  ;;  %v3328_v48 = vpop.eup %3327  ;;  %v5731_v23 = vsel %vm434_vm7, %v425_v41, %v408_v55  ;;  %v5746_v55 = vsel %vm1022_vm6, %v8045_v3, %v1074_v50  ;;  %v1411_v50 = vand.u32 2147483647, %v5646_v13 }
 0x1b9   : > { %8035 = vst [vmem:[#allocation60_spill] sm:$0xff] %v5703_v19  ;;  %v1917_v19 = vmul.f32 %v1909_v7, %v1909_v7  ;;  %v1388_v49 = vmul.f32 %v3328_v48, %v5624_v11  ;;  %v909_v7 = vadd.f32 %v901_v17, %v8044_v8  ;;  %v932_v62 = vrot.slane %v5731_v23, 6 }
 0x1ba   : > { %8039 = vst [vmem:[#allocation61_spill] sm:$0xff] %v5717_v37  ;;  %v3330_v37 = vpop.eup %3329  ;;  %vm1393_vm12 = vweird.f32 %v3328_v48  ;;  %v7739_v41 = vrot.slane %v5731_v23, 2  ;;  %v1413_v3 = vand.u32 2147483648, %v5646_v13  ;;  %vm1412_vm11 = vcmp.eq.f32.partialorder %v1411_v50, 8.507059e+37 }
 0x1bb   : > { %8042 = vst [vmem:[#allocation79_spill] sm:$0xff] %v5724_v0  ;;  %v1389_v25 = vsub.f32 1.0, %v1388_v49  ;;  %v1403_v0 = vmul.f32 %v3330_v37, %v5646_v13  ;;  %v5752_v17 = vsel %vm809_vm4, %v8046_v45, %v932_v62  ;;  %vm1408_vm14 = vweird.f32 %v3330_v37  ;;  %vm1394_vm15 = vmor %vm1392_vm13, %vm1393_vm12 }
 0x1bc   : > { %v953_v2 = vadd.f32 %v5752_v17, %v893_v10  ;;  %v961_v5 = vmul.f32 %v5752_v17, %v5752_v17  ;;  %v1399_v10 = vor.u32 1.1754944e-38, %v1398_v58  ;;  %vm1409_vm10 = vmor %vm1407_vm9, %vm1408_vm14 }
 0x1bd   : > { %v1390_v49 = vmul.f32 %v3328_v48, %v1389_v25  ;;  %v1404_v8 = vsub.f32 1.0, %v1403_v0  ;;  %v5764_v25 = vsel %vm1022_vm6, %v1136_v53, %v7739_v41  ;;  %v1414_v53 = vor.u32 1.1754944e-38, %v1413_v3  ;;  %v3418_v41 = vld [vmem:[%s3694_s7] sm:$0xff] }
 0x1be   : > { %v969_v62 = vadd.f32 %v961_v5, %v909_v7  ;;  %8047 = vst [vmem:[#allocation80_spill] sm:$0xff] %v5764_v25  ;;  %v977_v0 = vadd.f32 %v953_v2, %v4844_v56  ;;  %v1157_v11 = vadd.f32 %v5764_v25, %v1105_v57  ;;  %v1009_v7 = vmul.f32 %v5731_v23, %v5731_v23 }
 0x1bf   : > { %v1391_v52 = vadd.f32 %v3328_v48, %v1390_v49  ;;  %v1405_v16 = vmul.f32 %v3330_v37, %v1404_v8  ;;  %v8048_v49 = vld [vmem:[#allocation24_spill] sm:$0xff]  ;;  %v1126_v2 = vperm.slane %v5731_v23, 7 }
 0x1c0   : > { %v993_v8 = vadd.f32 %v8048_v49, %v969_v62  ;;  %v1001_v13 = vadd.f32 %v977_v0, %v5731_v23  ;;  %v1181_v57 = vmul.f32 %v1157_v11, %v1157_v11  ;;  %v8049_v11 = vld [vmem:[#allocation52_spill] sm:$0xff] }
 0x1c1   : > { %v1395_v45 = vsel %vm1394_vm15, %v3328_v48, %v1391_v52  ;;  %v1406_v14 = vadd.f32 %v3330_v37, %v1405_v16  ;;  %v1165_v16 = vmul.f32 %v5764_v25, %v5764_v25 }
 0x1c2   : > { %v1400_v5 = vsel %vm1397_vm8, %v1399_v10, %v1395_v45  ;;  %v1017_v48 = vadd.f32 %v1009_v7, %v993_v8  ;;  %v8063_v7 = vld [vmem:[#allocation51_spill] sm:$0xff] }
 0x1c3   : > { %v1410_v15 = vsel %vm1409_vm10, %v3330_v37, %v1406_v14  ;;  %v5774_v58 = vmul.f32 -2.7777777, %v1400_v5 }
 0x1c4   : > { %v1415_v52 = vsel %vm1412_vm11, %v1414_v53, %v1410_v15 }
 0x1c5   : > { %v5780_v62 = vmul.f32 -2.7777777, %v1415_v52  ;;  %v1745_v50 = vmul.f32 %v5552_v59, %v5774_v58  ;;  %v1775_v14 = vmul.f32 %v5477_v43, %v5774_v58  ;;  %v1835_v37 = vmul.f32 %v5705_v26, %v5774_v58 }
 0x1c6   : > { %v1865_v3 = vmul.f32 %v1857_v9, %v5774_v58  ;;  %v1895_v10 = vmul.f32 %v5560_v28, %v5774_v58  ;;  %v1925_v0 = vmul.f32 %v1917_v19, %v5774_v58  ;;  %v5794_v45 = vmul.f32 %v8049_v11, %v5774_v58 }
 0x1c7   : > { %v5798_v59 = vmul.f32 %v5554_v27, %v5780_v62  ;;  %v5801_v43 = vadd.f32 %v5509_v63, %v1745_v50  ;;  %v1776_v26 = vmul.f32 %v5676_v34, %v5780_v62  ;;  %v5806_v9 = vadd.f32 %v5512_v60, %v1775_v14  ;;  %v8058_v34 = vld [vmem:[#allocation53_spill] sm:$0xff]  ;;  %v8059_v60 = vld [vmem:[#allocation31_spill] sm:$0xff]  ;;  %v8064_v50 = vld [vmem:[#allocation36_spill] sm:$0xff] }
 0x1c8   : > { %v5809_v28 = vadd.f32 %v5566_v6, %v1835_v37  ;;  %v5812_v19 = vadd.f32 %v5592_v30, %v1865_v3  ;;  %v5815_v49 = vadd.f32 %v5595_v12, %v1895_v10  ;;  %v5818_v27 = vadd.f32 %v5506_v35, %v1925_v0  ;;  %v8060_v30 = vld [vmem:[#allocation34_spill] sm:$0xff]  ;;  %v8061_v12 = vld [vmem:[#allocation29_spill] sm:$0xff]  ;;  %v8062_v35 = vld [vmem:[#allocation92_spill] sm:$0xff] }
 0x1c9   : > { %8050 = vst [vmem:[#allocation83_spill] sm:$0xff] %v5798_v59  ;;  %v5821_v63 = vadd.f32 %v5538_v42, %v1776_v26  ;;  %v5825_v8 = vmul.f32 %v8058_v34, %v5780_v62  ;;  %v5829_v6 = vmul.f32 %v8059_v60, %v5774_v58  ;;  %v5833_v5 = vmul.f32 %v8060_v30, %v5780_v62  ;;  %v8065_v37 = vld [vmem:[#allocation87_spill] sm:$0xff]  ;;  %v8066_v10 = vld [vmem:[#allocation88_spill] sm:$0xff]  ;;  %v8067_v26 = vld [vmem:[#allocation50_spill] sm:$0xff] }
 0x1ca   : > { %8051 = vst [vmem:[#allocation84_spill] sm:$0xff] %v5801_v43  ;;  %v5837_v53 = vmul.f32 %v8061_v12, %v5774_v58  ;;  %v5841_v42 = vmul.f32 %v8062_v35, %v5780_v62  ;;  %v5845_v15 = vmul.f32 %v8063_v7, %v5774_v58  ;;  %v1054_v52 = vadd.f32 %v5712_v54, %v1001_v13  ;;  %v8068_v60 = vld [vmem:[#allocation37_spill] sm:$0xff] }
 0x1cb   : > { %8052 = vst [vmem:[#allocation98_spill] sm:$0xff] %v5806_v9  ;;  %v5850_v14 = vmul.f32 %v8064_v50, %v5774_v58  ;;  %v5854_v3 = vmul.f32 %v8065_v37, %v5780_v62  ;;  %v5858_v0 = vmul.f32 %v8066_v10, %v5774_v58  ;;  %v1189_v11 = vmul.f32 0.0625, %v1181_v57  ;;  %v8070_v30 = vld [vmem:[#allocation41_spill] sm:$0xff]  ;;  %v8076_v10 = vld [vmem:[#allocation94_spill] sm:$0xff] }
 0x1cc   : > { %8053 = vst [vmem:[#allocation19_spill] sm:$0xff] %v5809_v28  ;;  %v5862_v34 = vmul.f32 %v8067_v26, %v5774_v58  ;;  %v5866_v13 = vmul.f32 %v8068_v60, %v5780_v62  ;;  %v5870_v12 = vmul.f32 %v8070_v30, %v5774_v58  ;;  %v8072_v35 = vld [vmem:[#allocation89_spill] sm:$0xff]  ;;  %v1114_v50 = vmul.f32 %v5746_v55, %v5746_v55  ;;  %v8078_v30 = vld [vmem:[#allocation63_spill] sm:$0xff]  ;;  %v8085_v28 = vld [vmem:[#allocation68_spill] sm:$0xff] }
 0x1cd   : > { %8054 = vst [vmem:[#allocation96_spill] sm:$0xff] %v5812_v19  ;;  %v5874_v7 = vmul.f32 %v8072_v35, %v5780_v62  ;;  %v8074_v57 = vld [vmem:[#allocation93_spill] sm:$0xff]  ;;  %v5884_v26 = vmul.f32 %v8076_v10, %v5780_v62  ;;  %v1173_v60 = vadd.f32 %v1165_v16, %v5733_v31  ;;  %v1635_v56 = vsub.f32 %v8078_v30, %v3418_v41  ;;  %v8083_v19 = vld [vmem:[#allocation66_spill] sm:$0xff] }
 0x1ce   : > { %8055 = vst [vmem:[#allocation99_spill] sm:$0xff] %v5815_v49  ;;  %v5880_v37 = vmul.f32 %v8074_v57, %v5774_v58  ;;  %v5891_v35 = vmul.f32 %v5434_v20, %v5780_v62  ;;  %v5899_v57 = vmul.f32 %v5467_v33, %v5780_v62  ;;  %v8082_v49 = vld [vmem:[#allocation65_spill] sm:$0xff]  ;;  %v1070_v31 = vadd.f32 %v5738_v51, %v1017_v48  ;;  %v8088_v51 = vld [vmem:[#allocation70_spill] sm:$0xff] }
 0x1cf   : > { %8056 = vst [vmem:[#allocation100_spill] sm:$0xff] %v5818_v27  ;;  %v5895_v27 = vmul.f32 %v5563_v4, %v5780_v62  ;;  %v5903_v10 = vmul.f32 %v8082_v49, %v8082_v49  ;;  %v1106_v16 = vadd.f32 %v5746_v55, %v1054_v52  ;;  %v1197_v30 = vsub.f32 %v1173_v60, %v1189_v11  ;;  %v8089_v60 = vld [vmem:[#allocation73_spill] sm:$0xff] }
 0x1d0   : > { %8057 = vst [vmem:[#allocation24_spill] sm:$0xff] %v5821_v63  ;;  %v5909_v20 = vmul.f32 %v8083_v19, %v8083_v19  ;;  %v8084_v63 = vld [vmem:[#allocation67_spill] sm:$0xff]  ;;  %v5917_v33 = vmul.f32 %v8085_v28, %v8085_v28  ;;  %v8086_v49 = vrot.slane %v5731_v23, 2  ;;  %v5926_v48 = vmul.f32 %v8088_v51, %v8088_v51  ;;  %v8090_v28 = vld [vmem:[#allocation69_spill] sm:$0xff] }
 0x1d1   : > { %8069 = vst [vmem:[#allocation52_spill] sm:$0xff] %v5866_v13  ;;  %v5913_v4 = vmul.f32 %v8084_v63, %v8084_v63  ;;  %v1122_v52 = vadd.f32 %v1114_v50, %v1070_v31  ;;  %v1205_v11 = vmul.f32 0.06666667, %v1197_v30  ;;  %v5931_v63 = vmul.f32 %v8089_v60, %v8089_v60  ;;  %v8093_v30 = vld [vmem:[#allocation57_spill] sm:$0xff] }
 0x1d2   : > { %8071 = vst [vmem:[#allocation53_spill] sm:$0xff] %v5870_v12  ;;  %v5922_v9 = vsel %vm1022_vm6, %v8086_v49, %v1126_v2  ;;  %v5933_v43 = vmul.f32 %v1635_v56, %v1635_v56  ;;  %v1665_v25 = vsub.f32 %v8090_v28, %v3418_v41  ;;  %v8091_v2 = vld [vmem:[#allocation56_spill] sm:$0xff]  ;;  %v1461_v60 = vsub.f32 %v8093_v30, %v5453_v40  ;;  %v8094_v56 = vld [vmem:[#allocation74_spill] sm:$0xff]  ;;  %v8095_v41 = vld [vmem:[#allocation49_spill] sm:$0xff] }
 0x1d3   : > { %8073 = vst [vmem:[#allocation31_spill] sm:$0xff] %v5874_v7  ;;  %v1158_v19 = vadd.f32 %v5922_v9, %v1106_v16  ;;  %v1491_v49 = vsub.f32 %v8091_v2, %v5453_v40  ;;  %v1166_v50 = vmul.f32 %v5922_v9, %v5922_v9  ;;  %v5942_v16 = vmax.f32 %v1205_v11, 0.0  ;;  %v8096_v2 = vld [vmem:[#allocation72_spill] sm:$0xff]  ;;  %v3419_v11 = vld [vmem:[%s3694_s7 + $0x8] sm:$0xff]  ;;  %v8097_v30 = vld [vmem:[#allocation91_spill] sm:$0xff] }
 0x1d4   : > { %8075 = vst [vmem:[#allocation34_spill] sm:$0xff] %v5880_v37  ;;  %v1551_v28 = vsub.f32 %v8095_v41, %v5453_v40  ;;  %v1636_v7 = vsub.f32 %v8097_v30, %v3419_v11  ;;  %v5961_v59 = vmul.f32 %v1665_v25, %v1665_v25  ;;  %v5969_v13 = vmul.f32 %v1461_v60, %v1461_v60 }
 0x1d5   : > { %8077 = vst [vmem:[#allocation29_spill] sm:$0xff] %v5884_v26  ;;  %v1182_v31 = vmul.f32 %v1158_v19, %v1158_v19  ;;  %v1611_v26 = vsub.f32 %v8096_v2, %v5453_v40  ;;  %v1174_v37 = vadd.f32 %v1166_v50, %v1122_v52  ;;  %3331 = vrsqrt.f32 %v5942_v16 }
 0x1d6   : > { %8079 = vst [vmem:[#allocation92_spill] sm:$0xff] %v5891_v35  ;;  %v1850_v19 = vsub.f32 %v7989_v22, %v5497_v18  ;;  %v8099_v35 = vld [vmem:[#allocation15_spill] sm:$0xff]  ;;  %v5963_v2 = vmul.f32 %v1491_v49, %v1491_v49  ;;  %vm1294_vm12 = vcmp.eq.f32.partialorder %v5942_v16, inf  ;;  %vm1296_vm13 = vcmp.eq.f32.partialorder %v5942_v16, 0.0 }
 0x1d7   : > { %8080 = vst [vmem:[#allocation51_spill] sm:$0xff] %v5895_v27  ;;  %v1462_v27 = vsub.f32 %v8094_v56, %v5577_v36  ;;  %v8098_v56 = vld [vmem:[#allocation40_spill] sm:$0xff]  ;;  %v1786_v41 = vsub.f32 %v8099_v35, %v3419_v11  ;;  %v5977_v35 = vmul.f32 %v1611_v26, %v1611_v26 }
 0x1d8   : > { %8081 = vst [vmem:[#allocation36_spill] sm:$0xff] %v5899_v57  ;;  %v8092_v57 = vld [vmem:[#allocation71_spill] sm:$0xff]  ;;  %v1696_v12 = vsub.f32 %v8098_v56, %v3419_v11  ;;  %v5975_v56 = vmul.f32 %v1551_v28, %v1551_v28  ;;  %v1858_v11 = vmul.f32 %v1850_v19, %v1850_v19  ;;  %v8107_v28 = vld [vmem:[#allocation85_spill] sm:$0xff] }
 0x1d9   : > { %8087 = vst [vmem:[#allocation87_spill] sm:$0xff] %v5922_v9  ;;  %v1641_v51 = vsub.f32 %v8092_v57, %v5453_v40  ;;  %v1790_v57 = vsub.f32 %v4436_v29, %v5497_v18  ;;  %v1190_v9 = vmul.f32 0.0625, %v1182_v31  ;;  %v8101_v29 = vld [vmem:[#allocation86_spill] sm:$0xff]  ;;  %v5971_v22 = vmul.f32 %v1462_v27, %v1462_v27  ;;  %v8104_v18 = vld [vmem:[#allocation12_spill] sm:$0xff] }
 0x1da   : > { %8100 = vst [vmem:[#allocation88_spill] sm:$0xff] %v5963_v2  ;;  %v1492_v52 = vsub.f32 %v8101_v29, %v5577_v36  ;;  %v1642_v30 = vsub.f32 %v8104_v18, %v5577_v36  ;;  %v5979_v2 = vmul.f32 %v1636_v7, %v1636_v7  ;;  %v5981_v29 = vmul.f32 %v1696_v12, %v1696_v12  ;;  %v8106_v27 = vld [vmem:[#allocation90_spill] sm:$0xff]  ;;  %v8109_v7 = vld [vmem:[#allocation13_spill] sm:$0xff]  ;;  %v8110_v12 = vld [vmem:[#allocation27_spill] sm:$0xff] }
 0x1db   : > { %v1198_v50 = vsub.f32 %v1174_v37, %v1190_v9  ;;  %v5967_v31 = vmul.f32 %v1641_v51, %v1641_v51  ;;  %8103 = vst [vmem:[#allocation37_spill] sm:$0xff] %v5971_v22  ;;  %v1798_v25 = vmul.f32 %v1790_v57, %v1790_v57  ;;  %v5983_v9 = vmul.f32 %v1786_v41, %v1786_v41  ;;  %v3332_v37 = vpop.eup %3331 }
 0x1dc   : > { %v5985_v51 = vmul.f32 %v1492_v52, %v1492_v52  ;;  %v1522_v60 = vsub.f32 %v8106_v27, %v5577_v36  ;;  %v1582_v18 = vsub.f32 %v8107_v28, %v5577_v36  ;;  %v5993_v57 = vmul.f32 %v1642_v30, %v1642_v30  ;;  %v8111_v27 = vld [vmem:[#allocation95_spill] sm:$0xff]  ;;  %v8112_v28 = vld [vmem:[#allocation21_spill] sm:$0xff] }
 0x1dd   : > { %8102 = vst [vmem:[#allocation50_spill] sm:$0xff] %v5967_v31  ;;  %v1206_v49 = vmul.f32 0.06666667, %v1198_v50  ;;  %v1671_v19 = vsub.f32 %v8109_v7, %v5453_v40  ;;  %v1672_v41 = vsub.f32 %v8110_v12, %v5577_v36  ;;  %v1288_v50 = vmul.f32 %v3332_v37, %v5942_v16 }
 0x1de   : > { %8105 = vst [vmem:[#allocation41_spill] sm:$0xff] %v5985_v51  ;;  %v1789_v52 = vsub.f32 %v4715_v47, %v5650_v44  ;;  %v1701_v51 = vsub.f32 %v8111_v27, %v5453_v40  ;;  %v1851_v30 = vsub.f32 %v5573_v24, %v5453_v40  ;;  %v1761_v7 = vsub.f32 %v5487_v38, %v5453_v40 }
 0x1df   : > { %v5991_v26 = vmax.f32 %v1206_v49, 0.0  ;;  %8108 = vst [vmem:[#allocation89_spill] sm:$0xff] %v5993_v57  ;;  %v1702_v49 = vsub.f32 %v8112_v28, %v5577_v36  ;;  %v1821_v12 = vsub.f32 %v5446_v61, %v5453_v40  ;;  %v1289_v57 = vmul.f32 %v3332_v37, %v1288_v50 }
 0x1e0   : > { %v6013_v22 = vmul.f32 %v1522_v60, %v1522_v60  ;;  %v6015_v47 = vmul.f32 %v1582_v18, %v1582_v18  ;;  %v1731_v44 = vsub.f32 %v5482_v39, %v5453_v40  ;;  %v1881_v27 = vsub.f32 %v5613_v1, %v5453_v40 }
 0x1e1   : > { %3333 = vrsqrt.f32 %v5991_v26  ;;  %v6021_v28 = vmul.f32 %v1671_v19, %v1671_v19  ;;  %v6023_v24 = vmul.f32 %v1672_v41, %v1672_v41  ;;  %v1732_v38 = vsub.f32 %v5659_v32, %v5577_v36 }
 0x1e2   : > { %8113 = vst [vmem:[#allocation93_spill] sm:$0xff] %v6015_v47  ;;  %v1290_v31 = vmul.f32 0.5, %v1289_v57  ;;  %v1797_v61 = vmul.f32 %v1789_v52, %v1789_v52  ;;  %v6027_v50 = vmul.f32 %v1701_v51, %v1701_v51  ;;  %v6029_v60 = vmul.f32 %v1702_v49, %v1702_v49 }
 0x1e3   : > { %8114 = vst [vmem:[#allocation94_spill] sm:$0xff] %v6023_v24  ;;  %v1852_v18 = vsub.f32 %v5712_v54, %v5577_v36  ;;  %v6033_v39 = vmul.f32 %v1851_v30, %v1851_v30  ;;  %v6035_v47 = vmul.f32 %v1761_v7, %v1761_v7  ;;  %v6037_v1 = vmul.f32 %v1821_v12, %v1821_v12  ;;  %v8120_v30 = vld [vmem:[#allocation30_spill] sm:$0xff] }
 0x1e4   : > { %8115 = vst [vmem:[#allocation63_spill] sm:$0xff] %v6029_v60  ;;  %v1291_v19 = vsub.f32 1.5, %v1290_v31  ;;  %v6039_v24 = vmul.f32 %v1731_v44, %v1731_v44  ;;  %v6041_v32 = vmul.f32 %v1881_v27, %v1881_v27  ;;  %v6045_v51 = vmul.f32 %v5909_v20, %v5475_v46 }
 0x1e5   : > { %8116 = vst [vmem:[#allocation65_spill] sm:$0xff] %v6033_v39  ;;  %v6049_v57 = vmul.f32 %v5903_v10, %v5475_v46  ;;  %v6051_v54 = vmul.f32 %v1732_v38, %v1732_v38  ;;  %v6055_v52 = vsub.f32 %v5746_v55, %v5577_v36  ;;  %v1566_v7 = vmul.f32 %v8120_v30, %v5780_v62  ;;  %v8123_v10 = vld [vmem:[#allocation33_spill] sm:$0xff]  ;;  %v8126_v30 = vld [vmem:[#allocation102_spill] sm:$0xff] }
 0x1e6   : > { %8117 = vst [vmem:[#allocation66_spill] sm:$0xff] %v6037_v1  ;;  %v1292_v31 = vmul.f32 %v3332_v37, %v1291_v19  ;;  %v6060_v12 = vmul.f32 %v1852_v18, %v1852_v18  ;;  %v6064_v20 = vsub.f32 %v5752_v17, %v5577_v36  ;;  %v6068_v46 = vsub.f32 %v5731_v23, %v5577_v36  ;;  %v8124_v17 = vld [vmem:[#allocation14_spill] sm:$0xff]  ;;  %v8127_v23 = vld [vmem:[#allocation47_spill] sm:$0xff]  ;;  %v8128_v39 = vld [vmem:[#allocation101_spill] sm:$0xff] }
 0x1e7   : > { %v3334_v41 = vpop.eup %3333  ;;  %8118 = vst [vmem:[#allocation67_spill] sm:$0xff] %v6041_v32  ;;  %v6072_v55 = vmul.f32 %v8123_v10, %v5780_v62  ;;  %v6075_v37 = vmul.f32 %v1797_v61, %v5774_v58  ;;  %v1297_v38 = vand.u32 2147483648, %v5942_v16  ;;  %v8125_v18 = vld [vmem:[#allocation46_spill] sm:$0xff]  ;;  %v1472_v32 = vmul.f32 %v8127_v23, %v8126_v30 }
 0x1e8   : > { %8119 = vst [vmem:[#allocation68_spill] sm:$0xff] %v6051_v54  ;;  %v1300_v49 = vmul.f32 %v3334_v41, %v5991_v26  ;;  %v1293_v44 = vmul.f32 %v1292_v31, %v5942_v16  ;;  %v1471_v19 = vmul.f32 %v8125_v18, %v8124_v17  ;;  %v6090_v61 = vmul.f32 %v1858_v11, %v5780_v62  ;;  %v8129_v23 = vld [vmem:[#allocation22_spill] sm:$0xff] }
 0x1e9   : > { %8121 = vst [vmem:[#allocation70_spill] sm:$0xff] %v6060_v12  ;;  %v6085_v12 = vmul.f32 %v1798_v25, %v5780_v62  ;;  %v1482_v54 = vadd.f32 %v8128_v39, %v1472_v32  ;;  %v1501_v1 = vmul.f32 %v8129_v23, %v8124_v17  ;;  %v8130_v25 = vld [vmem:[#allocation26_spill] sm:$0xff]  ;;  %v1531_v62 = vmul.f32 %v5926_v48, %v8124_v17  ;;  %v8131_v32 = vld [vmem:[#allocation103_spill] sm:$0xff] }
 0x1ea   : > { %8122 = vst [vmem:[#allocation73_spill] sm:$0xff] %v6068_v46  ;;  %v1301_v27 = vmul.f32 %v3334_v41, %v1300_v49  ;;  %v1295_v10 = vsel %vm1294_vm12, %v5942_v16, %v1293_v44  ;;  %v1479_v49 = vadd.f32 %v5606_v21, %v1471_v19  ;;  %v1502_v46 = vmul.f32 %v8130_v25, %v8126_v30 }
 0x1eb   : > { %v1298_v31 = vsel %vm1296_vm13, %v1297_v38, %v1295_v10  ;;  %v6102_v16 = vadd.f32 %v1482_v54, %v5825_v8  ;;  %v1532_v21 = vmul.f32 %v5931_v63, %v8126_v30  ;;  %v8132_v38 = vld [vmem:[#allocation104_spill] sm:$0xff]  ;;  %v8133_v10 = vld [vmem:[#allocation97_spill] sm:$0xff]  ;;  %vm1306_vm14 = vcmp.eq.f32.partialorder %v5991_v26, inf }
 0x1ec   : > { %v1302_v58 = vmul.f32 0.5, %v1301_v27  ;;  %v1317_v60 = vadd.f32 0.0001, %v1298_v31  ;;  %v6099_v44 = vadd.f32 %v1479_v49, %v5794_v45  ;;  %v1509_v27 = vadd.f32 %v8131_v32, %v1501_v1  ;;  %v8134_v45 = vld [vmem:[#allocation23_spill] sm:$0xff]  ;;  %v8135_v8 = vld [vmem:[#allocation48_spill] sm:$0xff] }
 0x1ed   : > { %v1512_v19 = vadd.f32 %v8132_v38, %v1502_v46  ;;  %v1542_v31 = vadd.f32 %v8134_v45, %v1532_v21  ;;  %v1561_v54 = vmul.f32 %v8135_v8, %v8124_v17  ;;  %v8136_v49 = vld [vmem:[#allocation39_spill] sm:$0xff]  ;;  %vm1308_vm15 = vcmp.eq.f32.partialorder %v5991_v26, 0.0 }
 0x1ee   : > { %v1303_v18 = vsub.f32 1.5, %v1302_v58  ;;  %v6108_v39 = vmul.f32 %v1317_v60, %v1317_v60  ;;  %v1539_v58 = vadd.f32 %v8133_v10, %v1531_v62  ;;  %v1562_v48 = vmul.f32 %v8136_v49, %v8126_v30  ;;  %v8137_v62 = vld [vmem:[#allocation59_spill] sm:$0xff] }
 0x1ef   : > { %v1309_v63 = vand.u32 2147483648, %v5991_v26  ;;  %v6124_v60 = vadd.f32 %v1509_v27, %v5829_v6  ;;  %v6127_v1 = vadd.f32 %v1512_v19, %v5833_v5  ;;  %v6135_v25 = vadd.f32 %v1542_v31, %v5841_v42  ;;  %v8138_v6 = vld [vmem:[#allocation18_spill] sm:$0xff]  ;;  %v8141_v31 = vld [vmem:[#allocation45_spill] sm:$0xff] }
 0x1f0   : > { %v1304_v11 = vmul.f32 %v3334_v41, %v1303_v18  ;;  %3335 = vrcp.f32 %v6108_v39  ;;  %v6130_v41 = vadd.f32 %v1539_v58, %v5837_v53  ;;  %v1426_v18 = vand.u32 2147483647, %v6108_v39  ;;  %v8140_v58 = vld [vmem:[#allocation78_spill] sm:$0xff] }
 0x1f1   : > { %v1569_v21 = vadd.f32 %v8137_v62, %v1561_v54  ;;  %v1428_v32 = vand.u32 2147483648, %v6108_v39  ;;  %v1572_v27 = vadd.f32 %v8138_v6, %v1562_v48  ;;  %v1591_v5 = vmul.f32 %v5917_v33, %v8124_v17  ;;  %v8144_v62 = vld [vmem:[#allocation20_spill] sm:$0xff] }
 0x1f2   : > { %v1305_v23 = vmul.f32 %v1304_v11, %v5991_v26  ;;  %v1621_v42 = vmul.f32 %v5913_v4, %v8124_v17  ;;  %v1622_v8 = vmul.f32 %v8141_v31, %v8126_v30  ;;  %v1651_v33 = vmul.f32 %v5933_v43, %v8124_v17  ;;  %v8168_v43 = vld [vmem:[#allocation51_spill] sm:$0xff] }
 0x1f3   : > { %v6143_v53 = vadd.f32 %v1569_v21, %v5845_v15  ;;  %v6149_v10 = vadd.f32 %v1572_v27, %v1566_v7  ;;  %v1599_v45 = vadd.f32 %v8140_v58, %v1591_v5  ;;  %v8142_v15 = vld [vmem:[#allocation38_spill] sm:$0xff]  ;;  %v1652_v4 = vmul.f32 %v5979_v2, %v8126_v30 }
 0x1f4   : > { %v1307_v46 = vsel %vm1306_vm14, %v5991_v26, %v1305_v23  ;;  %v8139_v26 = vld [vmem:[#allocation62_spill] sm:$0xff]  ;;  %v8143_v23 = vld [vmem:[#allocation81_spill] sm:$0xff]  ;;  %vm1422_vm8 = vweird.f32 %v6108_v39  ;;  %v1632_v21 = vadd.f32 %v8144_v62, %v1622_v8  ;;  %vm6168_vm10 = vcmp.eq.f32.partialorder %v1426_v18, 8.507059e+37  ;;  %v8151_v8 = vld [vmem:[#allocation52_spill] sm:$0xff] }
 0x1f5   : > { %v1310_v11 = vsel %vm1308_vm15, %v1309_v63, %v1307_v46  ;;  %v1592_v19 = vmul.f32 %v8139_v26, %v8126_v30  ;;  %v1629_v63 = vadd.f32 %v8143_v23, %v1621_v42  ;;  %v6165_v46 = vadd.f32 %v1599_v45, %v5850_v14  ;;  %v8147_v18 = vld [vmem:[#allocation58_spill] sm:$0xff]  ;;  %v8155_v62 = vld [vmem:[#allocation60_spill] sm:$0xff] }
 0x1f6   : > { %v1318_v38 = vadd.f32 0.0001, %v1310_v11  ;;  %v3336_v54 = vpop.eup %3335  ;;  %v1429_v11 = vor.u32 1.1754944e-38, %v1428_v32  ;;  %v6178_v5 = vadd.f32 %v1632_v21, %v6072_v55  ;;  %v1659_v26 = vadd.f32 %v8147_v18, %v1651_v33  ;;  %v8153_v23 = vld [vmem:[#allocation42_spill] sm:$0xff]  ;;  %v8156_v18 = vld [vmem:[#allocation61_spill] sm:$0xff] }
 0x1f7   : > { %v1602_v48 = vadd.f32 %v8142_v15, %v1592_v19  ;;  %v1418_v7 = vmul.f32 %v3336_v54, %v6108_v39  ;;  %vm1423_vm9 = vweird.f32 %v3336_v54  ;;  %v1630_v27 = vadd.f32 %v1629_v63, %v5858_v0  ;;  %v8148_v19 = vld [vmem:[#allocation35_spill] sm:$0xff]  ;;  %v8150_v0 = vld [vmem:[#allocation28_spill] sm:$0xff] }
 0x1f8   : > { %v6156_v49 = vmul.f32 %v1318_v38, %v1318_v38  ;;  %v1662_v42 = vadd.f32 %v8148_v19, %v1652_v4  ;;  %v1681_v58 = vmul.f32 %v5961_v59, %v8124_v17  ;;  %v1711_v31 = vmul.f32 %v8150_v0, %v8124_v17  ;;  %v8154_v59 = vld [vmem:[#allocation82_spill] sm:$0xff]  ;;  %vm1424_vm12 = vmor %vm1422_vm8, %vm1423_vm9 }
 0x1f9   : > { %v1419_v6 = vsub.f32 1.0, %v1418_v7  ;;  %v6174_v2 = vadd.f32 %v1602_v48, %v5854_v3  ;;  %v8149_v3 = vld [vmem:[#allocation64_spill] sm:$0xff]  ;;  %v1660_v55 = vadd.f32 %v1659_v26, %v5862_v34  ;;  %v1712_v33 = vmul.f32 %v5981_v29, %v8126_v30  ;;  %v8152_v48 = vld [vmem:[#allocation83_spill] sm:$0xff]  ;;  %v8157_v26 = vld [vmem:[#allocation25_spill] sm:$0xff] }
 0x1fa   : > { %3337 = vrcp.f32 %v6156_v49  ;;  %v1441_v14 = vand.u32 2147483647, %v6156_v49  ;;  %v1443_v38 = vand.u32 2147483648, %v6156_v49  ;;  %v1682_v45 = vmul.f32 %v8149_v3, %v8126_v30  ;;  %v8159_v3 = vld [vmem:[#allocation76_spill] sm:$0xff] }
 0x1fb   : > { %v1420_v32 = vmul.f32 %v3336_v54, %v1419_v6  ;;  %v6192_v15 = vadd.f32 %v1662_v42, %v8151_v8  ;;  %v6198_v63 = vadd.f32 %v8153_v23, %v8152_v48  ;;  %vm1437_vm11 = vweird.f32 %v6156_v49  ;;  %v8165_v23 = vld [vmem:[#allocation29_spill] sm:$0xff] }
 0x1fc   : > { %v1689_v7 = vadd.f32 %v8154_v59, %v1681_v58  ;;  %v1692_v21 = vadd.f32 %v8155_v62, %v1682_v45  ;;  %v1719_v6 = vadd.f32 %v6045_v51, %v1711_v31  ;;  %v1722_v29 = vadd.f32 %v8156_v18, %v1712_v33  ;;  %v8162_v31 = vld [vmem:[#allocation53_spill] sm:$0xff]  ;;  %v8163_v33 = vld [vmem:[#allocation31_spill] sm:$0xff] }
 0x1fd   : > { %v1421_v4 = vadd.f32 %v3336_v54, %v1420_v32  ;;  %v1801_v19 = vmul.f32 %v8157_v26, %v8124_v17  ;;  %v1802_v42 = vmul.f32 %v5983_v9, %v8126_v30  ;;  %v8158_v32 = vld [vmem:[#allocation92_spill] sm:$0xff]  ;;  %vm6217_vm13 = vcmp.eq.f32.partialorder %v1441_v14, 8.507059e+37  ;;  %v8164_v9 = vld [vmem:[#allocation34_spill] sm:$0xff]  ;;  %v8166_v62 = vld [vmem:[#allocation79_spill] sm:$0xff] }
 0x1fe   : > { %v6214_v58 = vadd.f32 %v8159_v3, %v8158_v32  ;;  %v1444_v39 = vor.u32 1.1754944e-38, %v1443_v38  ;;  %v1690_v8 = vadd.f32 %v1689_v7, %v8162_v31  ;;  %v1693_v48 = vadd.f32 %v1692_v21, %v8163_v33  ;;  %v8167_v38 = vld [vmem:[#allocation32_spill] sm:$0xff]  ;;  %v8171_v26 = vld [vmem:[#allocation77_spill] sm:$0xff]  ;;  %v6245_v32 = vpop.permute.xlu2 %2258  ;;  %v8174_v31 = vld [vmem:[#allocation55_spill] sm:$0xff] }
 0x1ff   : > { %v1425_v45 = vsel %vm1424_vm12, %v3336_v54, %v1421_v4  ;;  %v1720_v30 = vadd.f32 %v1719_v6, %v8164_v9  ;;  %v6227_v59 = vadd.f32 %v1722_v29, %v8165_v23  ;;  %v1809_v14 = vadd.f32 %v6049_v57, %v1801_v19  ;;  %v8170_v6 = vld [vmem:[#allocation36_spill] sm:$0xff]  ;;  %v8175_v9 = vld [vmem:[#allocation50_spill] sm:$0xff] }
 0x200   : > { %v3338_v34 = vpop.eup %3337  ;;  %v1430_v17 = vsel %vm6168_vm10, %v1429_v11, %v1425_v45  ;;  %v1812_v18 = vadd.f32 %v8166_v62, %v1802_v42  ;;  %v6235_v7 = vadd.f32 %v8167_v38, %v6090_v61  ;;  %v8169_v11 = vld [vmem:[#allocation75_spill] sm:$0xff]  ;;  %v6243_v29 = vadd.f32 %v8171_v26, %v8170_v6  ;;  %v8172_v19 = vld [vmem:[#allocation88_spill] sm:$0xff]  ;;  %v8173_v61 = vld [vmem:[#allocation54_spill] sm:$0xff] }
 0x201   : > { %v1433_v51 = vmul.f32 %v3338_v34, %v6156_v49  ;;  %v6229_v4 = vmul.f32 -2.7777777, %v1430_v17  ;;  %vm1438_vm14 = vweird.f32 %v3338_v34  ;;  %v6239_v21 = vadd.f32 %v8169_v11, %v8168_v43  ;;  %v8177_v26 = vld [vmem:[#allocation84_spill] sm:$0xff] }
 0x202   : > { %vm1439_vm15 = vmor %vm1437_vm11, %vm1438_vm14  ;;  %v1890_v0 = vmul.f32 %v6055_v52, %v6055_v52  ;;  %v8181_v52 = vld [vmem:[#allocation87_spill] sm:$0xff] }
 0x203   : > { %v1434_v54 = vsub.f32 1.0, %v1433_v51  ;;  %v1477_v57 = vmul.f32 %v5969_v13, %v6229_v4  ;;  %v1507_v42 = vmul.f32 %v8172_v19, %v6229_v4  ;;  %v1537_v45 = vmul.f32 %v8173_v61, %v6229_v4  ;;  %v8183_v61 = vld [vmem:[#allocation89_spill] sm:$0xff] }
 0x204   : > { %v1567_v51 = vmul.f32 %v5975_v56, %v6229_v4  ;;  %v1597_v17 = vmul.f32 %v8174_v31, %v6229_v4  ;;  %v1627_v33 = vmul.f32 %v5977_v35, %v6229_v4  ;;  %v1657_v23 = vmul.f32 %v8175_v9, %v6229_v4 }
 0x205   : > { %v1435_v3 = vmul.f32 %v3338_v34, %v1434_v54  ;;  %v6262_v13 = vadd.f32 %v6099_v44, %v1477_v57  ;;  %v6265_v62 = vadd.f32 %v6124_v60, %v1507_v42  ;;  %v6268_v38 = vadd.f32 %v6130_v41, %v1537_v45 }
 0x206   : > { %v6274_v56 = vadd.f32 %v6143_v53, %v1567_v51  ;;  %v6277_v35 = vadd.f32 %v6165_v46, %v1597_v17  ;;  %v6279_v43 = vadd.f32 %v1630_v27, %v1627_v33  ;;  %v6281_v44 = vadd.f32 %v1660_v55, %v1657_v23  ;;  %v8176_v55 = vld [vmem:[#allocation80_spill] sm:$0xff]  ;;  %v8185_v51 = vld [vmem:[#allocation73_spill] sm:$0xff]  ;;  %v6333_v17 = vpop.permute.xlu2 %2271 }
 0x207   : > { %v1436_v54 = vadd.f32 %v3338_v34, %v1435_v3  ;;  %v1687_v60 = vmul.f32 %v6021_v28, %v6229_v4  ;;  %v1717_v41 = vmul.f32 %v6027_v50, %v6229_v4  ;;  %v1747_v49 = vmul.f32 %v6039_v24, %v6229_v4 }
 0x208   : > { %v1777_v46 = vmul.f32 %v6035_v47, %v6229_v4  ;;  %v6294_v27 = vadd.f32 %v1809_v14, %v6075_v37  ;;  %v1770_v47 = vmul.f32 %v6064_v20, %v6064_v20  ;;  %v8178_v37 = vld [vmem:[#allocation98_spill] sm:$0xff]  ;;  %v1912_v19 = vsub.f32 %v8181_v52, %v5577_v36  ;;  %v8182_v20 = vld [vmem:[#allocation93_spill] sm:$0xff]  ;;  %v8193_v52 = vld [vmem:[#allocation24_spill] sm:$0xff] }
 0x209   : > { %v1440_v11 = vsel %vm1439_vm15, %v3338_v34, %v1436_v54  ;;  %v1911_v34 = vsub.f32 %v8176_v55, %v5453_v40  ;;  %v6300_v28 = vadd.f32 %v1690_v8, %v1687_v60  ;;  %v6302_v50 = vadd.f32 %v1720_v30, %v1717_v41  ;;  %v8179_v8 = vld [vmem:[#allocation37_spill] sm:$0xff]  ;;  %v8186_v41 = vld [vmem:[#allocation66_spill] sm:$0xff] }
 0x20a   : > { %v1445_v53 = vsel %vm6217_vm13, %v1444_v39, %v1440_v11  ;;  %v6305_v24 = vadd.f32 %v8177_v26, %v1747_v49  ;;  %v6312_v39 = vadd.f32 %v8178_v37, %v1777_v46  ;;  %v6315_v40 = vadd.f32 %v1812_v18, %v6085_v12  ;;  %v8180_v30 = vld [vmem:[#allocation41_spill] sm:$0xff]  ;;  %v8184_v12 = vld [vmem:[#allocation94_spill] sm:$0xff] }
 0x20b   : > { %v6298_v6 = vmul.f32 -2.7777777, %v1445_v53  ;;  %v1830_v31 = vmul.f32 %v8185_v51, %v8185_v51  ;;  %v1919_v23 = vmul.f32 %v1911_v34, %v1911_v34  ;;  %v1837_v49 = vmul.f32 %v8186_v41, %v6229_v4  ;;  %v6359_v34 = vpop.permute.xlu1 %2253 }
 0x20c   : > { %v1920_v55 = vmul.f32 %v1912_v19, %v1912_v19 }
 0x20d   : > { %v1478_v14 = vmul.f32 %v8179_v8, %v6298_v6  ;;  %v1508_v3 = vmul.f32 %v8180_v30, %v6298_v6  ;;  %v1538_v57 = vmul.f32 %v6013_v22, %v6298_v6  ;;  %v1598_v42 = vmul.f32 %v8182_v20, %v6298_v6  ;;  %v8191_v8 = vld [vmem:[#allocation70_spill] sm:$0xff]  ;;  %v8192_v30 = vld [vmem:[#allocation43_spill] sm:$0xff] }
 0x20e   : > { %v1658_v45 = vmul.f32 %v8183_v61, %v6298_v6  ;;  %v1688_v18 = vmul.f32 %v8184_v12, %v6298_v6  ;;  %v8195_v12 = vld [vmem:[#allocation67_spill] sm:$0xff]  ;;  %v1928_v51 = vmul.f32 %v1920_v55, %v6298_v6 }
 0x20f   : > { %v6336_v33 = vadd.f32 %v6102_v16, %v1478_v14  ;;  %v6339_v22 = vadd.f32 %v6127_v1, %v1508_v3  ;;  %v6342_v9 = vadd.f32 %v6135_v25, %v1538_v57  ;;  %v6345_v54 = vadd.f32 %v6174_v2, %v1598_v42  ;;  %v8187_v16 = vld [vmem:[#allocation63_spill] sm:$0xff]  ;;  %v8188_v1 = vld [vmem:[#allocation68_spill] sm:$0xff] }
 0x210   : > { %v6348_v11 = vadd.f32 %v6192_v15, %v1658_v45  ;;  %v6350_v60 = vadd.f32 %v1693_v48, %v1688_v18  ;;  %v1718_v53 = vmul.f32 %v8187_v16, %v6298_v6  ;;  %v1748_v46 = vmul.f32 %v8188_v1, %v6298_v6  ;;  %v8189_v15 = vld [vmem:[#allocation19_spill] sm:$0xff]  ;;  %v8190_v48 = vld [vmem:[#allocation65_spill] sm:$0xff]  ;;  %v8194_v42 = vld [vmem:[#allocation96_spill] sm:$0xff] }
 0x211   : > { %v1778_v25 = vmul.f32 %v1770_v47, %v6298_v6  ;;  %v1838_v2 = vmul.f32 %v1830_v31, %v6298_v6  ;;  %v6363_v26 = vadd.f32 %v8189_v15, %v1837_v49  ;;  %v1867_v37 = vmul.f32 %v8190_v48, %v6229_v4  ;;  %v8197_v49 = vld [vmem:[#allocation99_spill] sm:$0xff]  ;;  %v6418_v15 = vpop.permute.xlu2 %2275 }
 0x212   : > { %v1868_v14 = vmul.f32 %v8191_v8, %v6298_v6  ;;  %v1568_v3 = vmul.f32 %v8192_v30, %v6298_v6  ;;  %v6372_v57 = vadd.f32 %v6227_v59, %v1718_v53  ;;  %v6375_v47 = vadd.f32 %v6198_v63, %v1748_v46  ;;  %v6430_v30 = vpop.permute.xlu0 %2277 }
 0x213   : > { %v6378_v19 = vadd.f32 %v8193_v52, %v1778_v25  ;;  %v6381_v20 = vadd.f32 %v6214_v58, %v1838_v2  ;;  %v6384_v61 = vadd.f32 %v8194_v42, %v1867_v37  ;;  %v1897_v18 = vmul.f32 %v8195_v12, %v6229_v4  ;;  %v8196_v58 = vld [vmem:[#allocation44_spill] sm:$0xff]  ;;  %v3420_v12 = vld [vmem:[%s3694_s7 + $0x30] sm:$0xff] }
 0x214   : > { %v6387_v45 = vadd.f32 %v6235_v7, %v1868_v14  ;;  %v1898_v59 = vmul.f32 %v1890_v0, %v6298_v6  ;;  %v1927_v63 = vmul.f32 %v1919_v23, %v6229_v4  ;;  %v1935_v31 = vmax.f32 %v6262_v13, %v6265_v62  ;;  %v8198_v0 = vld [vmem:[#allocation100_spill] sm:$0xff] }
 0x215   : > { %v1620_v41 = vmul.f32 %v8196_v58, %v8196_v58  ;;  %v6399_v16 = vadd.f32 %v8197_v49, %v1897_v18  ;;  %v1936_v7 = vmax.f32 %v6336_v33, %v6339_v22  ;;  %v6410_v23 = vadd.f32 %v6243_v29, %v1928_v51  ;;  %v6423_v29 = vpop.permute.xlu1 %2268  ;;  %v8200_v18 = vld [vmem:[#allocation17_spill] sm:$0xff] }
 0x216   : > { %v6404_v53 = vadd.f32 %v6239_v21, %v1898_v59  ;;  %v6407_v1 = vadd.f32 %v8198_v0, %v1927_v63  ;;  %v1937_v46 = vmax.f32 %v1935_v31, %v6268_v38  ;;  %v6414_v25 = vadd.f32 %v6149_v10, %v1568_v3  ;;  %v8199_v3 = vld [vmem:[#allocation16_spill] sm:$0xff] }
 0x217   : > { %v1628_v55 = vmul.f32 %v1620_v41, %v6298_v6  ;;  %v1938_v2 = vmax.f32 %v1936_v7, %v6342_v9  ;;  %v1792_v52 = vsub.f32 %v8199_v3, %v5577_v36  ;;  %v1791_v59 = vsub.f32 %v8200_v18, %v3420_v12 }
 0x218   : > { %v1939_v21 = vmax.f32 %v1937_v46, %v6274_v56 }
 0x219   : > { %v1940_v48 = vmax.f32 %v1938_v2, %v6414_v25  ;;  %v6426_v8 = vadd.f32 %v6178_v5, %v1628_v55  ;;  %v1800_v31 = vmul.f32 %v1792_v52, %v1792_v52  ;;  %v1799_v41 = vmul.f32 %v1791_v59, %v1791_v59  ;;  %v6442_v7 = vpop.permute.xlu2 %2290 }
 0x21a   : > { %v1941_v37 = vmax.f32 %v1939_v21, %v6277_v35 }
 0x21b   : > { %v1942_v10 = vmax.f32 %v1940_v48, %v6345_v54  ;;  %v1808_v36 = vmul.f32 %v1800_v31, %v6298_v6  ;;  %v1807_v46 = vmul.f32 %v1799_v41, %v6229_v4 }
 0x21c   : > { %v1943_v14 = vmax.f32 %v1941_v37, %v6279_v43 }
 0x21d   : > { %v1944_v42 = vmax.f32 %v1942_v10, %v6426_v8  ;;  %v6448_v2 = vpop.permute.xlu1 %2273  ;;  %v6452_v48 = vadd.f32 %v6294_v27, %v1807_v46  ;;  %v6455_v10 = vpop.permute.xlu0 %2292 }
 0x21e   : > { %v1945_v63 = vmax.f32 %v1943_v14, %v6281_v44  ;;  %v6458_v14 = vadd.f32 %v6315_v40, %v1808_v36 }
 0x21f   : > { %v1946_v51 = vmax.f32 %v1944_v42, %v6348_v11 }
 0x220   : > { %v1947_v5 = vmax.f32 %v1945_v63, %v6300_v28 }
 0x221   : > { %v1948_v58 = vmax.f32 %v1946_v51, %v6350_v60  ;;  %v6466_v12 = vpop.permute.xlu2 %2305 }
 0x222   : > { %v1949_v49 = vmax.f32 %v1947_v5, %v6302_v50 }
 0x223   : > { %v1950_v0 = vmax.f32 %v1948_v58, %v6372_v57 }
 0x224   : > { %v1951_v55 = vmax.f32 %v1949_v49, %v6305_v24 }
 0x225   : > { %v1952_v21 = vmax.f32 %v1950_v0, %v6375_v47  ;;  %v6470_v40 = vpop.permute.xlu1 %2288  ;;  %v6476_v5 = vpop.permute.xlu0 %2307 }
 0x226   : > { %v1953_v37 = vmax.f32 %v1951_v55, %v6312_v39 }
 0x227   : > { %v1954_v6 = vmax.f32 %v1952_v21, %v6378_v19 }
 0x228   : > { %v1955_v4 = vmax.f32 %v1953_v37, %v6452_v48 }
 0x229   : > { %v1956_v3 = vmax.f32 %v1954_v6, %v6458_v14  ;;  %v6509_v37 = vpop.permute.xlu2 %2311 }
 0x22a   : > { %v1957_v52 = vmax.f32 %v1955_v4, %v6363_v26 }
 0x22b   : > { %v1958_v42 = vmax.f32 %v1956_v3, %v6381_v20 }
 0x22c   : > { %v1959_v27 = vmax.f32 %v1957_v52, %v6384_v61 }
 0x22d   : > { %v1960_v18 = vmax.f32 %v1958_v42, %v6387_v45  ;;  %v6517_v6 = vpop.permute.xlu1 %2294  ;;  %v6523_v3 = vpop.permute.xlu0 %2323 }
 0x22e   : > { %v1961_v59 = vmax.f32 %v1959_v27, %v6399_v16 }
 0x22f   : > { %v1962_v63 = vmax.f32 %v1960_v18, %v6404_v53 }
 0x230   : > { %v6474_v51 = vmax.f32 %v1961_v59, %v6407_v1 }
 0x231   : > { %v6479_v31 = vmax.f32 %v1962_v63, %v6410_v23 }
 0x232   : > { %v2055_v58 = vsub.f32 %v6407_v1, %v6474_v51  ;;  %v1965_v41 = vsub.f32 %v6262_v13, %v6474_v51  ;;  %v1971_v49 = vsub.f32 %v6265_v62, %v6474_v51  ;;  %v1977_v36 = vsub.f32 %v6268_v38, %v6474_v51 }
 0x233   : > { %v1990_v0 = vsub.f32 %v6345_v54, %v6479_v31  ;;  %v2002_v46 = vsub.f32 %v6348_v11, %v6479_v31  ;;  %v2008_v55 = vsub.f32 %v6350_v60, %v6479_v31  ;;  %v2014_v21 = vsub.f32 %v6372_v57, %v6479_v31 }
 0x234   : > { %v2020_v13 = vsub.f32 %v6375_v47, %v6479_v31  ;;  %v2026_v62 = vsub.f32 %v6378_v19, %v6479_v31  ;;  %v2032_v38 = vsub.f32 %v6458_v14, %v6479_v31  ;;  %v2038_v54 = vsub.f32 %v6381_v20, %v6479_v31 }
 0x235   : > { %v2044_v11 = vsub.f32 %v6387_v45, %v6479_v31  ;;  %v2050_v60 = vsub.f32 %v6404_v53, %v6479_v31  ;;  %v1966_v47 = vsub.f32 %v6336_v33, %v6479_v31  ;;  %v1972_v19 = vsub.f32 %v6339_v22, %v6479_v31 }
 0x236   : > { %v1978_v20 = vsub.f32 %v6342_v9, %v6479_v31  ;;  %v1984_v4 = vsub.f32 %v6414_v25, %v6479_v31  ;;  %v2005_v52 = vmul.f32 1.442695, %v2002_v46  ;;  %v1996_v42 = vsub.f32 %v6426_v8, %v6479_v31 }
 0x237   : > { %v2011_v27 = vmul.f32 1.442695, %v2008_v55  ;;  %v1969_v18 = vmul.f32 1.442695, %v1966_v47  ;;  %v1983_v33 = vsub.f32 %v6274_v56, %v6474_v51  ;;  %v1975_v22 = vmul.f32 1.442695, %v1972_v19  ;;  %v6539_v55 = vpop.permute.xlu2 %2331 }
 0x238   : > { %v1989_v59 = vsub.f32 %v6277_v35, %v6474_v51  ;;  %v1995_v9 = vsub.f32 %v6279_v43, %v6474_v51  ;;  %v2001_v25 = vsub.f32 %v6281_v44, %v6474_v51  ;;  %3339 = vpow2.f32 %v2005_v52  ;;  %8201 = vst [vmem:[#allocation69_spill] sm:$0xff] %v6539_v55 }
 0x239   : > { %v2017_v63 = vmul.f32 1.442695, %v2014_v21  ;;  %v2007_v8 = vsub.f32 %v6300_v28, %v6474_v51  ;;  %3341 = vpow2.f32 %v2011_v27  ;;  %v1981_v56 = vmul.f32 1.442695, %v1978_v20  ;;  %v6549_v27 = vpop.permute.xlu1 %2309  ;;  %v6551_v20 = vpop.permute.xlu0 %2263 }
 0x23a   : > { %v2023_v47 = vmul.f32 1.442695, %v2020_v13  ;;  %3343 = vpow2.f32 %v1969_v18  ;;  %v1987_v35 = vmul.f32 1.442695, %v1984_v4  ;;  %v1993_v13 = vmul.f32 1.442695, %v1990_v0 }
 0x23b   : > { %3345 = vpow2.f32 %v1975_v22  ;;  %v1967_v22 = vmul.f32 1.442695, %v1965_v41  ;;  %v1973_v19 = vmul.f32 1.442695, %v1971_v49  ;;  %v1999_v52 = vmul.f32 1.442695, %v1996_v42 }
 0x23c   : > { %3347 = vpow2.f32 %v2017_v63  ;;  %v1979_v0 = vmul.f32 1.442695, %v1977_v36  ;;  %v2029_v4 = vmul.f32 1.442695, %v2026_v62  ;;  %v2053_v45 = vmul.f32 1.442695, %v2050_v60 }
 0x23d   : > { %3349 = vpow2.f32 %v1981_v56  ;;  %v1985_v56 = vmul.f32 1.442695, %v1983_v33  ;;  %v2057_v53 = vmul.f32 1.442695, %v2055_v58  ;;  %v2035_v1 = vmul.f32 1.442695, %v2032_v38 }
 0x23e   : > { %v6557_v21 = vpop.eup %3339  ;;  %3351 = vpow2.f32 %v2023_v47  ;;  %v2041_v47 = vmul.f32 1.442695, %v2038_v54  ;;  %v8206_v28 = vsub.f32 %v6302_v50, %v6474_v51  ;;  %v8208_v14 = vsub.f32 %v6410_v23, %v6479_v31 }
 0x23f   : > { %8202 = vst [vmem:[#allocation56_spill] sm:$0xff] %v6557_v21  ;;  %v6559_v43 = vpop.eup %3341  ;;  %3353 = vpow2.f32 %v1987_v35  ;;  %v2339_v42 = vpop.permute.xlu2 %2338  ;;  %v8209_v50 = vsub.f32 %v6305_v24, %v6474_v51  ;;  %v8213_v24 = vsub.f32 %v6312_v39, %v6474_v51 }
 0x240   : > { %v6561_v57 = vpop.eup %3343  ;;  %3355 = vpow2.f32 %v1993_v13  ;;  %v1991_v13 = vmul.f32 1.442695, %v1989_v59  ;;  %v2059_v38 = vmul.f32 1.442695, %v8208_v14 }
 0x241   : > { %v6563_v63 = vpop.eup %3345  ;;  %3357 = vpow2.f32 %v1967_v22  ;;  %v2047_v22 = vmul.f32 1.442695, %v2044_v11  ;;  %v2341_v33 = vpop.permute.xlu0 %2340 }
 0x242   : > { %v6565_v46 = vpop.eup %3347  ;;  %v2062_v41 = vadd.f32 %v6563_v63, %v6561_v57  ;;  %3359 = vpow2.f32 %v1973_v19  ;;  %v2328_v19 = vpop.permute.xlu1 %2327 }
 0x243   : > { %v6569_v49 = vpop.eup %3349  ;;  %3361 = vpow2.f32 %v1999_v52  ;;  %v1997_v52 = vmul.f32 1.442695, %v1995_v9  ;;  %v2003_v9 = vmul.f32 1.442695, %v2001_v25  ;;  %v2009_v25 = vmul.f32 1.442695, %v2007_v8 }
 0x244   : > { %v6571_v35 = vpop.eup %3351  ;;  %v2064_v36 = vadd.f32 %v6569_v49, %v2062_v41  ;;  %3363 = vpow2.f32 %v1979_v0  ;;  %v6584_v41 = vsel %vm434_vm7, %v2339_v42, %v6523_v3  ;;  %v6598_v0 = vsel %vm434_vm7, %v2341_v33, %v2328_v19 }
 0x245   : > { %8203 = vst [vmem:[#allocation71_spill] sm:$0xff] %v6571_v35  ;;  %v6574_v62 = vpop.eup %3353  ;;  %3365 = vpow2.f32 %v2029_v4  ;;  %v2556_v42 = vrot.slane %v6584_v41, 6  ;;  %v2015_v8 = vmul.f32 1.442695, %v8206_v28  ;;  %v7743_v33 = vrot.slane %v6598_v0, 2 }
 0x246   : > { %v6579_v18 = vpop.eup %3355  ;;  %v2066_v54 = vadd.f32 %v6574_v62, %v2064_v36  ;;  %3367 = vpow2.f32 %v1985_v56  ;;  %8204 = vst [vmem:[#allocation57_spill] sm:$0xff] %v6584_v41  ;;  %v2550_v56 = vperm.slane %v6584_v41, 0 }
 0x247   : > { %v6586_v59 = vpop.eup %3357  ;;  %3369 = vpow2.f32 %v2041_v47 }
 0x248   : > { %v6591_v11 = vpop.eup %3359  ;;  %v2068_v4 = vadd.f32 %v6579_v18, %v2066_v54  ;;  %3371 = vpow2.f32 %v1991_v13  ;;  %v2557_v13 = vrot.slane %v6598_v0, 6  ;;  %v6646_v23 = vsel %vm809_vm4, %v2550_v56, %v2556_v42 }
 0x249   : > { %v6600_v3 = vpop.eup %3361  ;;  %3373 = vpow2.f32 %v2047_v22  ;;  %v2061_v60 = vadd.f32 %v6591_v11, %v6586_v59  ;;  %8210 = vst [vmem:[#allocation72_spill] sm:$0xff] %v6646_v23  ;;  %v8216_v56 = vsub.f32 %v6452_v48, %v6474_v51  ;;  %v6682_v48 = vsel %vm303_vm0, %v6245_v32, %v6448_v2 }
 0x24a   : > { %v6608_v47 = vpop.eup %3363  ;;  %v2070_v44 = vadd.f32 %v6600_v3, %v2068_v4  ;;  %3375 = vpow2.f32 %v1997_v52  ;;  %v6649_v31 = vsel %vm809_vm4, %v2556_v42, %v2557_v13 }
 0x24b   : > { %v6615_v36 = vpop.eup %3365  ;;  %3377 = vpow2.f32 %v2053_v45  ;;  %v2063_v58 = vadd.f32 %v6608_v47, %v2061_v60  ;;  %v2639_v60 = vrot.slane %v6584_v41, 2  ;;  %8211 = vst [vmem:[#allocation91_spill] sm:$0xff] %v6649_v31  ;;  %v2033_v42 = vmul.f32 1.442695, %v8216_v56 }
 0x24c   : > { %8205 = vst [vmem:[#allocation74_spill] sm:$0xff] %v6615_v36  ;;  %v6622_v22 = vpop.eup %3367  ;;  %v2072_v19 = vadd.f32 %v6557_v21, %v2070_v44  ;;  %3379 = vpow2.f32 %v2003_v9  ;;  %v2021_v9 = vmul.f32 1.442695, %v8209_v50  ;;  %v8222_v50 = vsub.f32 %v6399_v16, %v6474_v51 }
 0x24d   : > { %v6629_v54 = vpop.eup %3369  ;;  %3381 = vpow2.f32 %v2057_v53  ;;  %v2065_v52 = vadd.f32 %v6622_v22, %v2063_v58 }
 0x24e   : > { %8207 = vst [vmem:[#allocation49_spill] sm:$0xff] %v6629_v54  ;;  %v6635_v45 = vpop.eup %3371  ;;  %v2074_v4 = vadd.f32 %v6559_v43, %v2072_v19  ;;  %3383 = vpow2.f32 %v2009_v25  ;;  %v2027_v19 = vmul.f32 1.442695, %v8213_v24  ;;  %v2509_v24 = vrot.slane %v6682_v48, 6 }
 0x24f   : > { %v6642_v44 = vpop.eup %3373  ;;  %3385 = vpow2.f32 %v2035_v1  ;;  %v2067_v53 = vadd.f32 %v6635_v45, %v2065_v52  ;;  %v6660_v1 = vsel %vm1022_vm6, %v2639_v60, %v7743_v33  ;;  %v8219_v52 = vsub.f32 %v6363_v26, %v6474_v51 }
 0x250   : > { %v6651_v58 = vpop.eup %3375  ;;  %v2076_v25 = vadd.f32 %v6565_v46, %v2074_v4  ;;  %3387 = vpow2.f32 %v2015_v8  ;;  %8214 = vst [vmem:[#allocation15_spill] sm:$0xff] %v6660_v1  ;;  %v6671_v8 = vsel %vm303_vm0, %v6359_v34, %v6333_v17  ;;  %v8221_v17 = vsub.f32 %v6384_v61, %v6474_v51 }
 0x251   : > { %8212 = vst [vmem:[#allocation40_spill] sm:$0xff] %v6651_v58  ;;  %v6662_v28 = vpop.eup %3377  ;;  %3389 = vpow2.f32 %v2059_v38  ;;  %v2069_v13 = vadd.f32 %v6651_v58, %v2067_v53  ;;  %v2039_v38 = vmul.f32 1.442695, %v8219_v52  ;;  %v6696_v26 = vsel %vm303_vm0, %v6423_v29, %v6430_v30 }
 0x252   : > { %8215 = vst [vmem:[#allocation86_spill] sm:$0xff] %v6662_v28  ;;  %v6673_v39 = vpop.eup %3379  ;;  %v2078_v14 = vadd.f32 %v6571_v35, %v2076_v25  ;;  %3391 = vpow2.f32 %v2021_v9  ;;  %v2045_v34 = vmul.f32 1.442695, %v8221_v17  ;;  %v2051_v9 = vmul.f32 1.442695, %v8222_v50 }
 0x253   : > { %8217 = vst [vmem:[#allocation12_spill] sm:$0xff] %v6671_v8  ;;  %v6684_v4 = vpop.eup %3381  ;;  %v2071_v60 = vadd.f32 %v6673_v39, %v2069_v13  ;;  %3393 = vpow2.f32 %v2027_v19  ;;  %v2501_v61 = vperm.slane %v6671_v8, 0  ;;  %v2508_v53 = vrot.slane %v6671_v8, 6  ;;  %v6713_v13 = vld [vmem:[%s3704_s8 + $0x8] sm:$0xff] }
 0x254   : > { %8218 = vst [vmem:[#allocation90_spill] sm:$0xff] %v6673_v39  ;;  %v6698_v32 = vpop.eup %3383  ;;  %v2080_v2 = vadd.f32 %v6615_v36, %v2078_v14  ;;  %v2595_v51 = vrot.slane %v6671_v8, 2  ;;  %v2596_v29 = vrot.slane %v6682_v48, 2  ;;  %v6718_v19 = vsel %vm336_vm1, %v6713_v13, %v6442_v7  ;;  %v6802_v36 = vld [vmem:[%s3704_s8 + $0x18] sm:$0xff] }
 0x255   : > { %8220 = vst [vmem:[#allocation85_spill] sm:$0xff] %v6684_v4  ;;  %v6703_v25 = vpop.eup %3385  ;;  %v2073_v16 = vadd.f32 %v6698_v32, %v2071_v60  ;;  %3395 = vpow2.f32 %v2033_v42  ;;  %v2512_v14 = vrot.slane %v6696_v26, 6  ;;  %v2592_v60 = vperm.slane %v6682_v48, 7 }
 0x256   : > { %8223 = vst [vmem:[#allocation13_spill] sm:$0xff] %v6696_v26  ;;  %v6709_v30 = vpop.eup %3387  ;;  %v2082_v56 = vadd.f32 %v6703_v25, %v2080_v2  ;;  %v6729_v2 = vsel %vm303_vm0, %v6551_v20, %v6418_v15  ;;  %3397 = vpow2.f32 %v2039_v38  ;;  %v6735_v42 = vsel %vm809_vm4, %v2501_v61, %v2508_v53  ;;  %v6750_v38 = vld [vmem:[%s3704_s8 + $0x10] sm:$0xff] }
 0x257   : > { %v6721_v52 = vpop.eup %3389  ;;  %v2075_v17 = vadd.f32 %v6709_v30, %v2073_v16  ;;  %8225 = vst [vmem:[#allocation95_spill] sm:$0xff] %v6729_v2  ;;  %v7748_v50 = vrot.slane %v6718_v19, 1  ;;  %v6741_v31 = vsel %vm809_vm4, %v2508_v53, %v2509_v24  ;;  %v6744_v15 = vsel %vm1022_vm6, %v2595_v51, %v2596_v29  ;;  %v6763_v51 = vld [vmem:[%s3704_s8] sm:$0xff] }
 0x258   : > { %8224 = vst [vmem:[#allocation27_spill] sm:$0xff] %v6721_v52  ;;  %v6731_v33 = vpop.eup %3391  ;;  %v2084_v7 = vadd.f32 %v6629_v54, %v2082_v56  ;;  %3399 = vpow2.f32 %v2045_v34  ;;  %v6755_v61 = vsel %vm336_vm1, %v6750_v38, %v6455_v10  ;;  %v6760_v24 = vsel %vm1022_vm6, %v2596_v29, %v2592_v60 }
 0x259   : > { %8226 = vst [vmem:[#allocation21_spill] sm:$0xff] %v6731_v33  ;;  %v2077_v1 = vadd.f32 %v6731_v33, %v2075_v17  ;;  %v6746_v20 = vpop.eup %3393  ;;  %v2511_v17 = vrot.slane %v6729_v2, 6  ;;  %v6768_v34 = vsel %vm336_vm1, %v6763_v51, %v6470_v40  ;;  %3401 = vpow2.f32 %v2051_v9 }
 0x25a   : > { %8227 = vst [vmem:[#allocation30_spill] sm:$0xff] %v6735_v42  ;;  %v2086_v56 = vadd.f32 %v6642_v44, %v2084_v7  ;;  %v2598_v7 = vrot.slane %v6729_v2, 2  ;;  %v2502_v29 = vperm.slane %v6729_v2, 0  ;;  %v2361_v60 = vrot.slane %v6718_v19, 7 }
 0x25b   : > { %8228 = vst [vmem:[#allocation33_spill] sm:$0xff] %v6744_v15  ;;  %v2079_v53 = vadd.f32 %v6746_v20, %v2077_v1  ;;  %v6771_v16 = vpop.eup %3395  ;;  %v6777_v1 = vsel %vm369_vm2, %v6466_v12, %v6763_v51  ;;  %v6785_v40 = vsel %vm652_vm5, %v7748_v50, %v6718_v19  ;;  %v2360_v2 = vrot.slane %v6768_v34, 7 }
 0x25c   : > { %8229 = vst [vmem:[#allocation14_spill] sm:$0xff] %v6746_v20  ;;  %v2088_v10 = vadd.f32 %v6662_v28, %v2086_v56  ;;  %v6789_v9 = vpop.eup %3397  ;;  %v6797_v28 = vsel %vm809_vm4, %v2511_v17, %v2512_v14  ;;  %v2404_v50 = vrot.slane %v6777_v1, 7  ;;  %v6821_v14 = vsel %vm369_vm2, %v6476_v5, %v6713_v13 }
 0x25d   : > { %8230 = vst [vmem:[#allocation46_spill] sm:$0xff] %v6755_v61  ;;  %v2081_v55 = vadd.f32 %v6771_v16, %v2079_v53  ;;  %v6807_v53 = vsel %vm369_vm2, %v6509_v37, %v6802_v36  ;;  %v8241_v5 = vrot.slane %v6750_v38, 7  ;;  %v2482_v21 = vrot.slane %v6821_v14, 1 }
 0x25e   : > { %8231 = vst [vmem:[#allocation102_spill] sm:$0xff] %v6768_v34  ;;  %v6792_v41 = vadd.f32 %v6721_v52, %v2088_v10  ;;  %v8235_v10 = vrot.slane %v6696_v26, 2  ;;  %v6814_v56 = vpop.eup %3399  ;;  %v6853_v23 = vsel %vm451_vm3, %v6777_v1, %v2404_v50  ;;  %v2380_v8 = vrot.slane %v6763_v51, 7 }
 0x25f   : > { %8232 = vst [vmem:[#allocation47_spill] sm:$0xff] %v6777_v1  ;;  %v2083_v54 = vadd.f32 %v6789_v9, %v2081_v55  ;;  %v2481_v55 = vrot.slane %v6777_v1, 1  ;;  %v6835_v52 = vpop.eup %3401  ;;  %v2462_v33 = vrot.slane %v6713_v13, 1  ;;  %v2528_v42 = vperm.slane %v6763_v51, 0 }
 0x260   : > { %8233 = vst [vmem:[#allocation101_spill] sm:$0xff] %v6789_v9  ;;  %v6812_v12 = vsel %vm1022_vm6, %v2598_v7, %v8235_v10  ;;  %3403 = vrcp.f32 %v6792_v41  ;;  %v2117_v37 = vand.u32 2147483648, %v6792_v41  ;;  %v8239_v7 = vrot.slane %v6755_v61, 7 }
 0x261   : > { %8234 = vst [vmem:[#allocation22_spill] sm:$0xff] %v6797_v28  ;;  %v6824_v28 = vsel %vm809_vm4, %v2502_v29, %v2511_v17  ;;  %v2085_v26 = vadd.f32 %v6814_v56, %v2083_v54  ;;  %v6841_v17 = vsel %vm451_vm3, %v6750_v38, %v8241_v5  ;;  %v2444_v29 = vrot.slane %v6755_v61, 1 }
 0x262   : > { %8236 = vst [vmem:[#allocation26_spill] sm:$0xff] %v6812_v12  ;;  %v6832_v10 = vsel %vm451_vm3, %v6755_v61, %v8239_v7  ;;  %v2405_v12 = vrot.slane %v6821_v14, 7  ;;  %v7760_v54 = vrot.slane %v6807_v53, 1  ;;  %v2115_v7 = vand.u32 2147483647, %v6792_v41 }
 0x263   : > { %8237 = vst [vmem:[#allocation103_spill] sm:$0xff] %v6814_v56  ;;  %v2087_v35 = vadd.f32 %v6835_v52, %v2085_v26  ;;  %v2381_v9 = vrot.slane %v6713_v13, 7  ;;  %vm2111_vm8 = vweird.f32 %v6792_v41  ;;  %v2118_v26 = vor.u32 1.1754944e-38, %v2117_v37 }
 0x264   : > { %8238 = vst [vmem:[#allocation104_spill] sm:$0xff] %v6824_v28  ;;  %v6847_v28 = vsel %vm451_vm3, %v6768_v34, %v2360_v2  ;;  %v6861_v15 = vsel %vm652_vm5, %v7760_v54, %v6807_v53  ;;  %v6873_v5 = vsel %vm652_vm5, %v2481_v55, %v2482_v21  ;;  %v2461_v54 = vrot.slane %v6763_v51, 1 }
 0x265   : > { %8240 = vst [vmem:[#allocation97_spill] sm:$0xff] %v6835_v52  ;;  %v6867_v1 = vadd.f32 %v6684_v4, %v2087_v35  ;;  %v6870_v52 = vsel %vm451_vm3, %v2404_v50, %v2405_v12  ;;  %vm6880_vm9 = vcmp.eq.f32.partialorder %v2115_v7, 8.507059e+37  ;;  %v2530_v50 = vrot.slane %v6763_v51, 6 }
 0x266   : > { %8242 = vst [vmem:[#allocation23_spill] sm:$0xff] %v6841_v17  ;;  %v3404_v20 = vpop.eup %3403  ;;  %v6889_v12 = vsel %vm336_vm1, %v6802_v36, %v6517_v6  ;;  %v6893_v55 = vsel %vm652_vm5, %v2482_v21, %v6821_v14  ;;  %v6896_v4 = vsel %vm451_vm3, %v2380_v8, %v2381_v9  ;;  %v2617_v7 = vrot.slane %v6763_v51, 2 }
 0x267   : > { %8243 = vst [vmem:[#allocation48_spill] sm:$0xff] %v6847_v28  ;;  %v2107_v37 = vmul.f32 %v3404_v20, %v6792_v41  ;;  %3405 = vrcp.f32 %v6867_v1  ;;  %v2102_v17 = vand.u32 2147483648, %v6867_v1  ;;  %v6903_v28 = vsel %vm451_vm3, %v6763_v51, %v2380_v8 }
 0x268   : > { %8244 = vst [vmem:[#allocation39_spill] sm:$0xff] %v6853_v23  ;;  %v2441_v23 = vrot.slane %v6768_v34, 1  ;;  %v6906_v6 = vsel %vm451_vm3, %v2360_v2, %v2361_v60  ;;  %v2100_v21 = vand.u32 2147483647, %v6867_v1  ;;  %v6910_v39 = vsel %vm652_vm5, %v2461_v54, %v2462_v33 }
 0x269   : > { %8245 = vst [vmem:[#allocation59_spill] sm:$0xff] %v6873_v5  ;;  %v2618_v5 = vrot.slane %v6713_v13, 2  ;;  %v2108_v34 = vsub.f32 1.0, %v2107_v37  ;;  %v2364_v9 = vrot.slane %v6889_v12, 7  ;;  %vm2112_vm10 = vweird.f32 %v3404_v20 }
 0x26a   : > { %8248 = vst [vmem:[#allocation18_spill] sm:$0xff] %v6896_v4  ;;  %v2445_v4 = vrot.slane %v6889_v12, 1  ;;  %v8250_v37 = vrot.slane %v6718_v19, 1  ;;  %v6920_v8 = vsel %vm809_vm4, %v2528_v42, %v2530_v50  ;;  %vm2096_vm11 = vweird.f32 %v6867_v1  ;;  %vm2113_vm12 = vmor %vm2111_vm8, %vm2112_vm10 }
 0x26b   : > { %8249 = vst [vmem:[#allocation62_spill] sm:$0xff] %v6910_v39  ;;  %v2109_v58 = vmul.f32 %v3404_v20, %v2108_v34  ;;  %v6924_v2 = vsel %vm1022_vm6, %v2617_v7, %v2618_v5  ;;  %v2464_v51 = vrot.slane %v6750_v38, 1  ;;  %v6930_v34 = vsel %vm369_vm2, %v6549_v27, %v6750_v38 }
 0x26c   : > { %v6917_v56 = vsel %vm652_vm5, %v2441_v23, %v8250_v37  ;;  %8252 = vst [vmem:[#allocation45_spill] sm:$0xff] %v6920_v8  ;;  %v2103_v39 = vor.u32 1.1754944e-38, %v2102_v17  ;;  %v2384_v23 = vrot.slane %v6802_v36, 7  ;;  %v2465_v42 = vrot.slane %v6802_v36, 1 }
 0x26d   : > { %8251 = vst [vmem:[#allocation78_spill] sm:$0xff] %v6917_v56  ;;  %v3406_v60 = vpop.eup %3405  ;;  %v2110_v54 = vadd.f32 %v3404_v20, %v2109_v58  ;;  %vm6937_vm13 = vcmp.eq.f32.partialorder %v2100_v21, 8.507059e+37  ;;  %v6947_v58 = vsel %vm652_vm5, %v2444_v29, %v2445_v4  ;;  %v6951_v17 = vsel %vm652_vm5, %v2445_v4, %v6889_v12 }
 0x26e   : > { %8253 = vst [vmem:[#allocation38_spill] sm:$0xff] %v6924_v2  ;;  %v2092_v7 = vmul.f32 %v3406_v60, %v6867_v1  ;;  %v8256_v2 = vrot.slane %v6755_v61, 7  ;;  %v2407_v8 = vrot.slane %v6930_v34, 7  ;;  %v2484_v21 = vrot.slane %v6930_v34, 1 }
 0x26f   : > { %v2114_v41 = vsel %vm2113_vm12, %v3404_v20, %v2110_v54  ;;  %v2531_v56 = vrot.slane %v6713_v13, 6  ;;  %vm2097_vm14 = vweird.f32 %v3406_v60  ;;  %v2615_v29 = vperm.slane %v6713_v13, 7 }
 0x270   : > { %v6944_v27 = vsel %vm451_vm3, %v8256_v2, %v2364_v9  ;;  %v6958_v61 = vsel %vm6880_vm9, %v2118_v26, %v2114_v41  ;;  %v2093_v9 = vsub.f32 1.0, %v2092_v7  ;;  %v6997_v41 = vsel %vm652_vm5, %v2465_v42, %v6802_v36  ;;  %vm2098_vm15 = vmor %vm2096_vm11, %vm2097_vm14 }
 0x271   : > { %v6963_v2 = vmul.f32 %v6574_v62, %v6958_v61  ;;  %v6967_v4 = vmul.f32 %v6600_v3, %v6958_v61  ;;  %v6971_v20 = vmul.f32 %v6703_v25, %v6958_v61  ;;  %v6975_v26 = vmul.f32 %v6642_v44, %v6958_v61 }
 0x272   : > { %v2094_v35 = vmul.f32 %v3406_v60, %v2093_v9  ;;  %v6979_v54 = vmul.f32 %v6579_v18, %v6958_v61  ;;  %v6983_v62 = vmul.f32 %v6559_v43, %v6958_v61  ;;  %v6987_v3 = vmul.f32 %v6569_v49, %v6958_v61 }
 0x273   : > { %8257 = vst [vmem:[#allocation81_spill] sm:$0xff] %v6963_v2  ;;  %v8264_v25 = vrot.slane %v6750_v38, 7  ;;  %v6993_v44 = vsel %vm652_vm5, %v2464_v51, %v2465_v42  ;;  %v7001_v18 = vsel %vm652_vm5, %v2462_v33, %v6713_v13  ;;  %v8265_v9 = vrot.slane %v6807_v53, 7 }
 0x274   : > { %8258 = vst [vmem:[#allocation20_spill] sm:$0xff] %v6967_v4  ;;  %v2095_v43 = vadd.f32 %v3406_v60, %v2094_v35  ;;  %v8266_v51 = vrot.slane %v6807_v53, 1  ;;  %v7020_v33 = vmul.f32 %v6565_v46, %v6958_v61  ;;  %v7023_v13 = vsel %vm809_vm4, %v2530_v50, %v2531_v56 }
 0x275   : > { %8259 = vst [vmem:[#allocation58_spill] sm:$0xff] %v6971_v20  ;;  %v2385_v7 = vsel %vm451_vm3, %v8264_v25, %v2384_v23  ;;  %v7006_v49 = vsel %vm451_vm3, %v2407_v8, %v8265_v9  ;;  %v2415_v23 = vsel %vm451_vm3, %v6930_v34, %v2407_v8  ;;  %v7026_v42 = vsel %vm1022_vm6, %v2618_v5, %v2615_v29  ;;  %v8278_v9 = vld [vmem:[#allocation23_spill] sm:$0xff]  ;;  %v8280_v8 = vld [vmem:[#allocation30_spill] sm:$0xff] }
 0x276   : > { %8260 = vst [vmem:[#allocation35_spill] sm:$0xff] %v6975_v26  ;;  %v7013_v25 = vsel %vm652_vm5, %v2484_v21, %v8266_v51  ;;  %v2099_v35 = vsel %vm2098_vm15, %v3406_v60, %v2095_v43  ;;  %v7031_v21 = vmul.f32 %v6561_v57, %v6958_v61  ;;  %v7035_v1 = vmul.f32 %v6563_v63, %v6958_v61  ;;  %v8277_v43 = vld [vmem:[#allocation48_spill] sm:$0xff] }
 0x277   : > { %8261 = vst [vmem:[#allocation64_spill] sm:$0xff] %v6979_v54  ;;  %v2425_v56 = vmul.f32 %v6718_v19, %v6963_v2  ;;  %v7042_v5 = vmul.f32 %v6785_v40, %v6967_v4  ;;  %v7046_v50 = vsel %vm6937_vm13, %v2103_v39, %v2099_v35  ;;  %v7050_v57 = vmul.f32 %v6807_v53, %v6979_v54 }
 0x278   : > { %8262 = vst [vmem:[#allocation28_spill] sm:$0xff] %v6983_v62  ;;  %v7054_v63 = vmul.f32 %v6709_v30, %v7046_v50  ;;  %v7058_v60 = vmul.f32 %v6771_v16, %v7046_v50  ;;  %v7062_v19 = vmul.f32 %v6608_v47, %v7046_v50  ;;  %v7066_v39 = vmul.f32 %v6635_v45, %v7046_v50 }
 0x279   : > { %8263 = vst [vmem:[#allocation52_spill] sm:$0xff] %v6987_v3  ;;  %v7070_v40 = vmul.f32 %v6586_v59, %v7046_v50  ;;  %v7074_v30 = vmul.f32 %v6591_v11, %v7046_v50  ;;  %v7078_v16 = vmul.f32 %v6622_v22, %v7046_v50  ;;  %v7082_v47 = vmul.f32 %v6698_v32, %v7046_v50 }
 0x27a   : > { %8267 = vst [vmem:[#allocation83_spill] sm:$0xff] %v7026_v42  ;;  %v7086_v45 = vmul.f32 %v6861_v15, %v6983_v62  ;;  %v2417_v59 = vmul.f32 %v6870_v52, %v6987_v3  ;;  %v2433_v53 = vmul.f32 %v6821_v14, %v6979_v54  ;;  %v7094_v11 = vmul.f32 %v6893_v55, %v6983_v62  ;;  %v8273_v14 = vld [vmem:[#allocation103_spill] sm:$0xff]  ;;  %v8275_v55 = vld [vmem:[#allocation40_spill] sm:$0xff] }
 0x27b   : > { %8268 = vst [vmem:[#allocation42_spill] sm:$0xff] %v7031_v21  ;;  %v2374_v22 = vmul.f32 %v6832_v10, %v7070_v40  ;;  %v7100_v32 = vmul.f32 %v6741_v31, %v7020_v33  ;;  %v7104_v15 = vmul.f32 %v6682_v48, %v6971_v20  ;;  %v7108_v52 = vmul.f32 %v6760_v24, %v6975_v26  ;;  %v8276_v10 = vld [vmem:[#allocation90_spill] sm:$0xff] }
 0x27c   : > { %8269 = vst [vmem:[#allocation82_spill] sm:$0xff] %v7062_v19  ;;  %v7112_v37 = vmul.f32 %v8273_v14, %v7046_v50  ;;  %v7116_v29 = vmul.f32 %v8275_v55, %v7046_v50  ;;  %v7120_v31 = vmul.f32 %v8276_v10, %v7046_v50  ;;  %v2372_v48 = vmul.f32 %v8277_v43, %v7070_v40  ;;  %v8279_v14 = vld [vmem:[#allocation18_spill] sm:$0xff]  ;;  %v8281_v10 = vld [vmem:[#allocation39_spill] sm:$0xff] }
 0x27d   : > { %8270 = vst [vmem:[#allocation60_spill] sm:$0xff] %v7070_v40  ;;  %v2394_v51 = vmul.f32 %v8278_v9, %v7074_v30  ;;  %v2373_v24 = vmul.f32 %v6906_v6, %v7031_v21  ;;  %v2392_v35 = vmul.f32 %v6903_v28, %v7074_v30  ;;  %v2393_v55 = vmul.f32 %v8279_v14, %v7035_v1  ;;  %v8282_v40 = vld [vmem:[#allocation21_spill] sm:$0xff]  ;;  %v8283_v14 = vld [vmem:[#allocation14_spill] sm:$0xff] }
 0x27e   : > { %8271 = vst [vmem:[#allocation61_spill] sm:$0xff] %v7074_v30  ;;  %v2520_v46 = vmul.f32 %v8280_v8, %v7054_v63  ;;  %v2416_v62 = vmul.f32 %v8281_v10, %v7062_v19  ;;  %v2427_v43 = vmul.f32 %v6889_v12, %v6963_v2  ;;  %v2456_v9 = vmul.f32 %v6951_v17, %v6967_v4  ;;  %v8284_v8 = vld [vmem:[#allocation101_spill] sm:$0xff]  ;;  %v8288_v4 = vld [vmem:[#allocation12_spill] sm:$0xff] }
 0x27f   : > { %8272 = vst [vmem:[#allocation25_spill] sm:$0xff] %v7108_v52  ;;  %v2396_v54 = vadd.f32 %v2392_v35, %v2372_v48  ;;  %v2397_v6 = vadd.f32 %v2393_v55, %v2373_v24  ;;  %v7142_v28 = vmul.f32 %v8282_v40, %v7046_v50  ;;  %v7146_v30 = vmul.f32 %v8283_v14, %v7046_v50  ;;  %v8285_v10 = vld [vmem:[#allocation97_spill] sm:$0xff]  ;;  %v8287_v55 = vld [vmem:[#allocation102_spill] sm:$0xff] }
 0x280   : > { %8274 = vst [vmem:[#allocation92_spill] sm:$0xff] %v7112_v37  ;;  %v7150_v26 = vmul.f32 %v8284_v8, %v7046_v50  ;;  %v7154_v12 = vmul.f32 %v8285_v10, %v7046_v50  ;;  %v2375_v17 = vmul.f32 %v6944_v27, %v7031_v21  ;;  %v2395_v48 = vmul.f32 %v2385_v7, %v7035_v1  ;;  %v8289_v8 = vld [vmem:[#allocation47_spill] sm:$0xff]  ;;  %v8290_v10 = vld [vmem:[#allocation46_spill] sm:$0xff] }
 0x281   : > { %v2398_v24 = vadd.f32 %v2394_v51, %v2374_v22  ;;  %v2420_v40 = vadd.f32 %v2416_v62, %v2396_v54  ;;  %v2421_v35 = vadd.f32 %v2417_v59, %v2397_v6  ;;  %v2424_v14 = vmul.f32 %v8287_v55, %v7078_v16  ;;  %v7172_v62 = vpop.permute.xlu1 %2335  ;;  %v8291_v59 = vld [vmem:[#allocation59_spill] sm:$0xff]  ;;  %v8292_v22 = vld [vmem:[#allocation33_spill] sm:$0xff]  ;;  %v8293_v6 = vld [vmem:[#allocation78_spill] sm:$0xff] }
 0x282   : > { %8286 = vst [vmem:[#allocation76_spill] sm:$0xff] %v7154_v12  ;;  %v7163_v2 = vmul.f32 %v8288_v4, %v7058_v60  ;;  %v2432_v42 = vmul.f32 %v8289_v8, %v7066_v39  ;;  %v2426_v52 = vmul.f32 %v8290_v10, %v7078_v16  ;;  %v2399_v20 = vadd.f32 %v2395_v48, %v2375_v17  ;;  %v8294_v17 = vld [vmem:[#allocation56_spill] sm:$0xff]  ;;  %v8296_v8 = vld [vmem:[#allocation45_spill] sm:$0xff] }
 0x283   : > { %v2428_v27 = vadd.f32 %v2424_v14, %v2420_v40  ;;  %v2429_v21 = vadd.f32 %v2425_v56, %v2421_v35  ;;  %v2418_v7 = vmul.f32 %v2415_v23, %v7062_v19  ;;  %v2419_v54 = vmul.f32 %v7006_v49, %v6987_v3  ;;  %v8295_v35 = vld [vmem:[#allocation62_spill] sm:$0xff] }
 0x284   : > { %v2493_v4 = vmul.f32 %v8291_v59, %v7082_v47  ;;  %v7178_v51 = vmul.f32 %v8292_v22, %v7112_v37  ;;  %v2453_v55 = vmul.f32 %v8293_v6, %v7116_v29  ;;  %v7184_v56 = vmul.f32 %v8294_v17, %v6958_v61  ;;  %v8297_v59 = vld [vmem:[#allocation72_spill] sm:$0xff] }
 0x285   : > { %v2436_v23 = vadd.f32 %v2432_v42, %v2428_v27  ;;  %v2437_v48 = vadd.f32 %v2433_v53, %v2429_v21  ;;  %v2422_v40 = vadd.f32 %v2418_v7, %v2398_v24  ;;  %v2423_v49 = vadd.f32 %v2419_v54, %v2399_v20  ;;  %v8298_v21 = vld [vmem:[#allocation71_spill] sm:$0xff]  ;;  %v8299_v24 = vld [vmem:[#allocation74_spill] sm:$0xff]  ;;  %v8301_v7 = vld [vmem:[#allocation49_spill] sm:$0xff] }
 0x286   : > { %v2473_v14 = vmul.f32 %v8295_v35, %v7120_v31  ;;  %v2542_v10 = vmul.f32 %v8296_v8, %v7142_v28  ;;  %v2568_v22 = vmul.f32 %v8297_v59, %v7146_v30  ;;  %v2455_v6 = vmul.f32 %v6947_v58, %v7116_v29  ;;  %v8309_v8 = vld [vmem:[#allocation57_spill] sm:$0xff]  ;;  %v8310_v59 = vld [vmem:[#allocation38_spill] sm:$0xff] }
 0x287   : > { %v2457_v3 = vadd.f32 %v2453_v55, %v2436_v23  ;;  %v2430_v19 = vadd.f32 %v2426_v52, %v2422_v40  ;;  %v2431_v17 = vadd.f32 %v2427_v43, %v2423_v49  ;;  %v2434_v42 = vmul.f32 %v6930_v34, %v7066_v39  ;;  %v8303_v34 = vld [vmem:[#allocation86_spill] sm:$0xff]  ;;  %v8305_v23 = vld [vmem:[#allocation85_spill] sm:$0xff]  ;;  %v8307_v40 = vld [vmem:[#allocation27_spill] sm:$0xff] }
 0x288   : > { %v2458_v20 = vadd.f32 %v7042_v5, %v2437_v48  ;;  %v7199_v53 = vmul.f32 %v8298_v21, %v6958_v61  ;;  %v7203_v27 = vmul.f32 %v8299_v24, %v6958_v61  ;;  %v7207_v54 = vmul.f32 %v8301_v7, %v6958_v61  ;;  %v8313_v7 = vld [vmem:[#allocation95_spill] sm:$0xff] }
 0x289   : > { %v2477_v58 = vadd.f32 %v2473_v14, %v2457_v3  ;;  %v2438_v52 = vadd.f32 %v2434_v42, %v2430_v19  ;;  %v2439_v43 = vadd.f32 %v7050_v57, %v2431_v17  ;;  %v7212_v55 = vmul.f32 %v8303_v34, %v6958_v61 }
 0x28a   : > { %8300 = vst [vmem:[#allocation53_spill] sm:$0xff] %v7203_v27  ;;  %v2475_v5 = vmul.f32 %v6993_v44, %v7120_v31  ;;  %v7218_v48 = vmul.f32 %v8305_v23, %v7046_v50  ;;  %v7222_v49 = vmul.f32 %v8307_v40, %v6958_v61  ;;  %v2474_v3 = vmul.f32 %v7001_v18, %v7184_v56  ;;  %v8311_v18 = vld [vmem:[#allocation104_spill] sm:$0xff] }
 0x28b   : > { %8302 = vst [vmem:[#allocation31_spill] sm:$0xff] %v7207_v54  ;;  %v2497_v19 = vadd.f32 %v2493_v4, %v2477_v58  ;;  %v2459_v57 = vadd.f32 %v2455_v6, %v2438_v52  ;;  %v2460_v35 = vadd.f32 %v2456_v9, %v2439_v43  ;;  %v2476_v14 = vmul.f32 %v6997_v41, %v7184_v56  ;;  %v2343_v9 = vpop.permute.xlu1 %2342  ;;  %v8312_v6 = vld [vmem:[#allocation22_spill] sm:$0xff] }
 0x28c   : > { %8304 = vst [vmem:[#allocation34_spill] sm:$0xff] %v7212_v55  ;;  %v2584_v44 = vmul.f32 %v8309_v8, %v7150_v26  ;;  %v2629_v50 = vmul.f32 %v8310_v59, %v7154_v12  ;;  %v2495_v17 = vmul.f32 %v7013_v25, %v7082_v47  ;;  %v2478_v61 = vadd.f32 %v2474_v3, %v2458_v20  ;;  %v8315_v3 = vld [vmem:[#allocation69_spill] sm:$0xff] }
 0x28d   : > { %8306 = vst [vmem:[#allocation29_spill] sm:$0xff] %v7218_v48  ;;  %v2524_v42 = vadd.f32 %v2520_v46, %v2497_v19  ;;  %v2479_v21 = vadd.f32 %v2475_v5, %v2459_v57  ;;  %v2480_v24 = vadd.f32 %v2476_v14, %v2460_v35  ;;  %v2522_v4 = vmul.f32 %v8311_v18, %v7054_v63 }
 0x28e   : > { %8308 = vst [vmem:[#allocation79_spill] sm:$0xff] %v7222_v49  ;;  %v2523_v41 = vmul.f32 %v8312_v6, %v7020_v33  ;;  %v2578_v58 = vmul.f32 %v8313_v7, %v7058_v60  ;;  %v2498_v52 = vadd.f32 %v7094_v11, %v2478_v61  ;;  %v2533_v43 = vrot.slane %v6750_v38, 6 }
 0x28f   : > { %v2546_v34 = vadd.f32 %v2542_v10, %v2524_v42  ;;  %v2499_v25 = vadd.f32 %v2495_v17, %v2479_v21  ;;  %v2500_v46 = vadd.f32 %v7086_v45, %v2480_v24  ;;  %v2543_v20 = vmul.f32 %v7023_v13, %v7199_v53  ;;  %v8316_v10 = vld [vmem:[#allocation91_spill] sm:$0xff]  ;;  %v2345_v17 = vpop.permute.xlu2 %2344 }
 0x290   : > { %v2525_v5 = vadd.f32 %v7100_v32, %v2498_v52  ;;  %v8314_v23 = vperm.slane %v6750_v38, 0  ;;  %v2353_v19 = vsel %vm434_vm7, %v2343_v9, %v8315_v3  ;;  %v2534_v11 = vrot.slane %v6802_v36, 6 }
 0x291   : > { %v2572_v57 = vadd.f32 %v2568_v22, %v2546_v34  ;;  %v2526_v35 = vadd.f32 %v2522_v4, %v2499_v25  ;;  %v2569_v14 = vmul.f32 %v8316_v10, %v7203_v27  ;;  %v2585_v45 = vmul.f32 %v6598_v0, %v7207_v54  ;;  %v8319_v25 = vld [vmem:[#allocation15_spill] sm:$0xff] }
 0x292   : > { %v2541_v40 = vsel %vm809_vm4, %v8314_v23, %v2533_v43  ;;  %v2547_v13 = vadd.f32 %v2543_v20, %v2525_v5  ;;  %v2551_v8 = vperm.slane %v2353_v19, 0  ;;  %v2559_v59 = vrot.slane %v2353_v19, 6 }
 0x293   : > { %v2544_v32 = vmul.f32 %v2541_v40, %v7142_v28  ;;  %v2580_v61 = vadd.f32 %v7163_v2, %v2572_v57  ;;  %v2527_v42 = vadd.f32 %v2523_v41, %v2500_v46  ;;  %v2620_v21 = vrot.slane %v6750_v38, 2 }
 0x294   : > { %v2621_v22 = vrot.slane %v6802_v36, 2  ;;  %v2573_v24 = vadd.f32 %v2569_v14, %v2547_v13  ;;  %v2567_v4 = vsel %vm809_vm4, %v2551_v8, %v2559_v59  ;;  %v2535_v9 = vsel %vm809_vm4, %v2533_v43, %v2534_v11  ;;  %v8320_v14 = vld [vmem:[#allocation58_spill] sm:$0xff]  ;;  %v8321_v13 = vld [vmem:[#allocation13_spill] sm:$0xff] }
 0x295   : > { %v2548_v18 = vadd.f32 %v2544_v32, %v2526_v35  ;;  %v2588_v6 = vadd.f32 %v2584_v44, %v2580_v61  ;;  %v8317_v7 = vperm.slane %v6598_v0, 7  ;;  %v8318_v52 = vrot.slane %v6598_v0, 2  ;;  %v8322_v8 = vld [vmem:[#allocation25_spill] sm:$0xff] }
 0x296   : > { %v2570_v2 = vmul.f32 %v2567_v4, %v7146_v30  ;;  %v2354_v38 = vsel %vm434_vm7, %v2345_v17, %v7172_v62  ;;  %v2581_v41 = vadd.f32 %v7104_v15, %v2573_v24  ;;  %v2651_v46 = vmul.f32 %v8319_v25, %v7218_v48  ;;  %v8323_v17 = vld [vmem:[#allocation83_spill] sm:$0xff] }
 0x297   : > { %v2649_v34 = vsel %vm1022_vm6, %v8318_v52, %v8317_v7  ;;  %v2545_v20 = vmul.f32 %v2535_v9, %v7199_v53  ;;  %v2560_v43 = vrot.slane %v2354_v38, 6  ;;  %v2611_v44 = vadd.f32 %v7178_v51, %v2588_v6 }
 0x298   : > { %v2622_v5 = vsel %vm1022_vm6, %v2620_v21, %v2621_v22  ;;  %v2574_v0 = vadd.f32 %v2570_v2, %v2548_v18  ;;  %v2586_v23 = vmul.f32 %v2353_v19, %v7150_v26  ;;  %v2589_v40 = vadd.f32 %v2585_v45, %v2581_v41 }
 0x299   : > { %v2642_v3 = vrot.slane %v2353_v19, 2  ;;  %v2549_v11 = vadd.f32 %v2545_v20, %v2527_v42  ;;  %v2561_v62 = vsel %vm809_vm4, %v2559_v59, %v2560_v43  ;;  %v2633_v57 = vadd.f32 %v2629_v50, %v2611_v44  ;;  %v8324_v19 = vld [vmem:[#allocation26_spill] sm:$0xff] }
 0x29a   : > { %v2582_v15 = vadd.f32 %v2578_v58, %v2574_v0  ;;  %v2571_v35 = vmul.f32 %v2561_v62, %v7203_v27  ;;  %v2643_v10 = vrot.slane %v2354_v38, 2  ;;  %v2579_v32 = vmul.f32 %v8321_v13, %v8320_v14 }
 0x29b   : > { %v2612_v51 = vadd.f32 %v8322_v8, %v2589_v40  ;;  %v2630_v61 = vmul.f32 %v8323_v17, %v7212_v55  ;;  %v2616_v21 = vperm.slane %v6802_v36, 7  ;;  %v2609_v45 = vmul.f32 %v8324_v19, %v7112_v37 }
 0x29c   : > { %v7287_v42 = vadd.f32 %v2651_v46, %v2633_v57  ;;  %v2590_v50 = vadd.f32 %v2586_v23, %v2582_v15  ;;  %v2575_v58 = vadd.f32 %v2571_v35, %v2549_v11  ;;  %v2652_v24 = vmul.f32 %v2649_v34, %v7222_v49  ;;  %v8327_v46 = vld [vmem:[#allocation35_spill] sm:$0xff] }
 0x29d   : > { %v2634_v59 = vadd.f32 %v2630_v61, %v2612_v51  ;;  %v2631_v18 = vmul.f32 %v2622_v5, %v7154_v12  ;;  %v2644_v4 = vsel %vm1022_vm6, %v2642_v3, %v2643_v10  ;;  %v2587_v7 = vmul.f32 %v2354_v38, %v7207_v54 }
 0x29e   : > { %v2613_v9 = vadd.f32 %v2609_v45, %v2590_v50  ;;  %v2583_v6 = vadd.f32 %v2579_v32, %v2575_v58  ;;  %v2638_v52 = vperm.slane %v2354_v38, 7  ;;  %2661 = vperm.xlu0 %3299, %v7287_v42   ;;  %v8325_v36 = vperm.slane %v8321_v13, 7 }
 0x29f   : > { %v8326_v2 = vrot.slane %v8321_v13, 2  ;;  %v7299_v25 = vadd.f32 %v2652_v24, %v2634_v59  ;;  %v2628_v34 = vsel %vm1022_vm6, %v2621_v22, %v2616_v21  ;;  %v2653_v5 = vmul.f32 %v2644_v4, %v7218_v48  ;;  %v8329_v4 = vld [vmem:[#allocation61_spill] sm:$0xff] }
 0x2a0   : > { %v2635_v43 = vadd.f32 %v2631_v18, %v2613_v9  ;;  %v2591_v44 = vadd.f32 %v2587_v7, %v2583_v6  ;;  %v2632_v0 = vmul.f32 %v2628_v34, %v7212_v55  ;;  %v2650_v23 = vsel %vm1022_vm6, %v2643_v10, %v2638_v52 }
 0x2a1   : > { %v2606_v41 = vsel %vm1022_vm6, %v8326_v2, %v8325_v36  ;;  %2666 = vperm.xlu1 %3302, %v7299_v25   ;;  %v2654_v22 = vmul.f32 %v2650_v23, %v7222_v49  ;;  %v8328_v62 = vmov 127   ;;  %v2783_v32 = vrot.slane %v7287_v42, 7  ;;  %v8333_v49 = vld [vmem:[#allocation20_spill] sm:$0xff] }
 0x2a2   : > { %v2610_v20 = vmul.f32 %v2606_v41, %v8327_v46  ;;  %v7307_v40 = vadd.f32 %v2653_v5, %v2635_v43  ;;  %v2929_v17 = vperm.slane %v7287_v42, 0  ;;  %v7791_v61 = vrot.slane %v7287_v42, 6  ;;  %v8334_v46 = vld [vmem:[#allocation42_spill] sm:$0xff] }
 0x2a3   : > { %v2793_v21 = vsel %vm451_vm3, %v7287_v42, %v2783_v32  ;;  %v2784_v19 = vrot.slane %v7299_v25, 7  ;;  %v2864_v50 = vrot.slane %v7299_v25, 1  ;;  %v2863_v24 = vrot.slane %v7287_v42, 1 }
 0x2a4   : > { %v2614_v38 = vadd.f32 %v2610_v20, %v2591_v44  ;;  %2671 = vperm.xlu2 %3303, %v7307_v40   ;;  %v2786_v58 = vrot.slane %v7307_v40, 7  ;;  %v2795_v9 = vmul.f32 %v2793_v21, %v8329_v4  ;;  %v7385_v36 = vsel %vm809_vm4, %v2929_v17, %v7791_v61  ;;  %v8330_v21 = vld [vmem:[#allocation60_spill] sm:$0xff]  ;;  %v8332_v20 = vld [vmem:[#allocation81_spill] sm:$0xff] }
 0x2a5   : > { %v2785_v2 = vsel %vm451_vm3, %v2783_v32, %v2784_v19  ;;  %v2866_v41 = vrot.slane %v7307_v40, 1  ;;  %v2930_v34 = vperm.slane %v7307_v40, 0  ;;  %v2865_v44 = vsel %vm652_vm5, %v2863_v24, %v2864_v50 }
 0x2a6   : > { %v2636_v3 = vadd.f32 %v2632_v0, %v2614_v38  ;;  %2697 = vrot.lane.b32.xlu0 %v7299_v25, %s3577_s15  ;;  %v2794_v5 = vsel %vm451_vm3, %v7307_v40, %v2786_v58  ;;  %v7790_v38 = vrot.slane %v7307_v40, 6 }
 0x2a7   : > { %3305 = vset.pattern.permute.xlu0 %v8328_v62  ;;  %v2797_v24 = vmul.f32 %v2794_v5, %v8329_v4 }
 0x2a8   : > { %v7313_v11 = vadd.f32 %v2654_v22, %v2636_v3  ;;  %v7405_v22 = vsel %vm652_vm5, %v2864_v50, %v7299_v25  ;;  %v2875_v50 = vmul.f32 %v2865_v44, %v7120_v31 }
 0x2aa   : > { %2676 = vperm.xlu1 %3302, %v7313_v11   ;;  %v2787_v18 = vrot.slane %v7313_v11, 7  ;;  %v2867_v52 = vrot.slane %v7313_v11, 1 }
 0x2ac   : > { %2695 = vrot.lane.b32.xlu2 %v7287_v42, %s3577_s15  ;;  %v2788_v3 = vsel %vm451_vm3, %v2786_v58, %v2787_v18  ;;  %v2868_v32 = vsel %vm652_vm5, %v2866_v41, %v2867_v52  ;;  %v2874_v17 = vsel %vm652_vm5, %v2867_v52, %v7313_v11  ;;  %v7428_v52 = vsel %vm809_vm4, %v2930_v34, %v7790_v38 }
 0x2ad   : > { %3304 = vset.pattern.permute.xlu2 %v8328_v62  ;;  %v7436_v4 = vmul.f32 %v2868_v32, %v7120_v31  ;;  %v7439_v44 = vmul.f32 %v2874_v17, %v7184_v56  ;;  %v8331_v32 = vld [vmem:[#allocation82_spill] sm:$0xff] }
 0x2ae   : > { %2711 = vrot.lane.b32.xlu0 %v7287_v42, %s3578_s16 }
 0x2b2   : > { %2699 = vrot.lane.b32.xlu1 %v7307_v40, %s3577_s15 }
 0x2b3   : > { %3306 = vset.pattern.permute.xlu1 %v8328_v62 }
 0x2b4   : > { %2701 = vrot.lane.b32.xlu2 %v7313_v11, %s3577_s15 }
 0x2b6   : > { %2717 = vrot.lane.b32.xlu0 %v7313_v11, %s3578_s16 }
 0x2ba   : > { %2713 = vrot.lane.b32.xlu1 %v7299_v25, %s3578_s16 }
 0x2bc   : > { %2715 = vrot.lane.b32.xlu2 %v7307_v40, %s3578_s16 }
 0x2be   : > { %2683 = vrot.lane.b32.xlu0 %v7307_v40, %s3576_s21 }
 0x2c2   : > { %2679 = vrot.lane.b32.xlu1 %v7287_v42, %s3576_s21 }
 0x2c4   : > { %2681 = vrot.lane.b32.xlu2 %v7299_v25, %s3576_s21 }
 0x2c6   : > { %2732 = vperm.xlu0 %3305, %v7299_v25  }
 0x2ca   : > { %2685 = vrot.lane.b32.xlu1 %v7313_v11, %s3576_s21 }
 0x2cc   : > { %2728 = vperm.xlu2 %3304, %v7287_v42  }
 0x2ce   : > { %2747 = vrot.lane.b32.xlu0 %v7307_v40, %s3580_s18 }
 0x2d2   : > { %2736 = vperm.xlu1 %3306, %v7307_v40  }
 0x2d4   : > { %2740 = vperm.xlu2 %3304, %v7313_v11  }
 0x2da   : > { %2743 = vrot.lane.b32.xlu1 %v7287_v42, %s3580_s18 }
 0x2dc   : > { %2745 = vrot.lane.b32.xlu2 %v7299_v25, %s3580_s18 }
 0x2e2   : > { %2749 = vrot.lane.b32.xlu1 %v7313_v11, %s3580_s18 }
 0x2fe   : > { %v7353_v57 = vpop.permute.xlu2 %2671 }
 0x306   : > { %v2696_v15 = vpop.permute.xlu2 %2695 }
 0x307   : > { %v7362_v8 = vsel %vm336_vm1, %v7287_v42, %v2696_v15  ;;  %v2796_v15 = vmul.f32 %v2785_v2, %v7035_v1 }
 0x308   : > { %v2763_v45 = vrot.slane %v7362_v8, 7  ;;  %v2843_v61 = vrot.slane %v7362_v8, 1 }
 0x30a   : > { %v2773_v43 = vsel %vm451_vm3, %v7362_v8, %v2763_v45 }
 0x30b   : > { %v2775_v19 = vmul.f32 %v2773_v43, %v8330_v21 }
 0x30e   : > { %v2702_v10 = vpop.permute.xlu2 %2701 }
 0x30f   : > { %v7379_v6 = vsel %vm336_vm1, %v7313_v11, %v2702_v10 }
 0x310   : > { %v7355_v35 = vpop.permute.xlu0 %2661  ;;  %v7792_v0 = vrot.slane %v7379_v6, 1  ;;  %v2767_v31 = vrot.slane %v7379_v6, 7 }
 0x312   : > { %v2854_v2 = vsel %vm652_vm5, %v7792_v0, %v7379_v6  ;;  %v2830_v0 = vmul.f32 %v7379_v6, %v8332_v20 }
 0x313   : > { %v7357_v13 = vpop.permute.xlu1 %2666  ;;  %v7456_v48 = vmul.f32 %v2854_v2, %v8333_v49 }
 0x316   : > { %v2716_v7 = vpop.permute.xlu2 %2715 }
 0x317   : > { %v7400_v23 = vsel %vm369_vm2, %v2716_v7, %v7307_v40  ;;  %v2798_v7 = vmul.f32 %v2788_v3, %v7035_v1  ;;  %v2827_v1 = vmul.f32 %v7362_v8, %v7078_v16 }
 0x318   : > { %v2698_v51 = vpop.permute.xlu0 %2697 }
 0x319   : > { %v7409_v62 = vsel %vm336_vm1, %v7299_v25, %v2698_v51  ;;  %v2810_v51 = vrot.slane %v7400_v23, 7 }
 0x31a   : > { %v2764_v41 = vrot.slane %v7409_v62, 7  ;;  %v2844_v34 = vrot.slane %v7409_v62, 1 }
 0x31c   : > { %v7372_v59 = vpop.permute.xlu1 %2676  ;;  %v2765_v55 = vsel %vm451_vm3, %v2763_v45, %v2764_v41  ;;  %v2845_v8 = vsel %vm652_vm5, %v2843_v61, %v2844_v34 }
 0x320   : > { %v2712_v10 = vpop.permute.xlu0 %2711 }
 0x321   : > { %v7418_v58 = vsel %vm369_vm2, %v2712_v10, %v7287_v42  ;;  %v2799_v10 = vadd.f32 %v2795_v9, %v2775_v19 }
 0x322   : > { %v7797_v18 = vrot.slane %v7418_v58, 7  ;;  %v2835_v12 = vmul.f32 %v7418_v58, %v7066_v39 }
 0x324   : > { %v2700_v43 = vpop.permute.xlu1 %2699  ;;  %v2817_v5 = vsel %vm451_vm3, %v7418_v58, %v7797_v18  ;;  %v2818_v18 = vsel %vm451_vm3, %v7400_v23, %v2810_v51 }
 0x325   : > { %v2709_v3 = vsel %vm336_vm1, %v7307_v40, %v2700_v43  ;;  %v2819_v38 = vmul.f32 %v2817_v5, %v8331_v32  ;;  %v2837_v5 = vmul.f32 %v7400_v23, %v7066_v39  ;;  %v2821_v41 = vmul.f32 %v2818_v18, %v8331_v32 }
 0x326   : > { %v2766_v17 = vrot.slane %v2709_v3, 7  ;;  %v2846_v45 = vrot.slane %v2709_v3, 1  ;;  %v2829_v37 = vmul.f32 %v2709_v3, %v7078_v16 }
 0x327   : > { %v2823_v43 = vadd.f32 %v2819_v38, %v2799_v10  ;;  %v2776_v10 = vmul.f32 %v2765_v55, %v8334_v46 }
 0x328   : > { %v2768_v9 = vsel %vm451_vm3, %v2766_v17, %v2767_v31  ;;  %v2774_v19 = vsel %vm451_vm3, %v2709_v3, %v2766_v17  ;;  %v2718_v27 = vpop.permute.xlu0 %2717  ;;  %v2682_v17 = vpop.permute.xlu2 %2681 }
 0x329   : > { %v2777_v54 = vmul.f32 %v2774_v19, %v8330_v21  ;;  %v2778_v2 = vmul.f32 %v2768_v9, %v8334_v46  ;;  %v2831_v14 = vadd.f32 %v2827_v1, %v2823_v43  ;;  %v7472_v38 = vsel %vm369_vm2, %v2718_v27, %v7313_v11 }
 0x32a   : > { %v2811_v61 = vrot.slane %v7472_v38, 7  ;;  %v2886_v21 = vrot.slane %v7400_v23, 1  ;;  %v2855_v1 = vmul.f32 %v2845_v8, %v7116_v29  ;;  %v8336_v23 = vld [vmem:[#allocation52_spill] sm:$0xff]  ;;  %v2887_v32 = vrot.slane %v7472_v38, 1 }
 0x32b   : > { %v2801_v31 = vadd.f32 %v2797_v24, %v2777_v54  ;;  %v2839_v43 = vadd.f32 %v2835_v12, %v2831_v14  ;;  %v2802_v9 = vadd.f32 %v2798_v7, %v2778_v2  ;;  %v8335_v54 = vrot.slane %v7379_v6, 1 }
 0x32c   : > { %v2714_v39 = vpop.permute.xlu1 %2713  ;;  %v2812_v27 = vsel %vm451_vm3, %v2810_v51, %v2811_v61  ;;  %v2800_v12 = vadd.f32 %v2796_v15, %v2776_v10  ;;  %v2828_v14 = vmul.f32 %v7409_v62, %v8332_v20  ;;  %v2883_v51 = vrot.slane %v7418_v58, 1 }
 0x32d   : > { %v2825_v19 = vadd.f32 %v2821_v41, %v2801_v31  ;;  %v2724_v18 = vsel %vm369_vm2, %v2714_v39, %v7299_v25  ;;  %v2859_v55 = vadd.f32 %v2855_v1, %v2839_v43  ;;  %v2848_v46 = vsel %vm652_vm5, %v2846_v45, %v8335_v54  ;;  %v8337_v31 = vld [vmem:[#allocation64_spill] sm:$0xff] }
 0x32e   : > { %v2822_v24 = vmul.f32 %v2812_v27, %v8336_v23  ;;  %v2808_v16 = vrot.slane %v2724_v18, 7  ;;  %v2884_v2 = vrot.slane %v2724_v18, 1  ;;  %v2857_v6 = vmul.f32 %v2848_v46, %v7116_v29 }
 0x32f   : > { %v2833_v7 = vadd.f32 %v2829_v37, %v2825_v19  ;;  %v2879_v3 = vadd.f32 %v2875_v50, %v2859_v55  ;;  %v2838_v45 = vmul.f32 %v7472_v38, %v8337_v31  ;;  %v8338_v61 = vrot.slane %v7418_v58, 7 }
 0x330   : > { %v2826_v8 = vadd.f32 %v2822_v24, %v2802_v9  ;;  %v2684_v10 = vpop.permute.xlu0 %2683  ;;  %v2888_v37 = vsel %vm652_vm5, %v2886_v21, %v2887_v32  ;;  %v2885_v50 = vsel %vm652_vm5, %v2883_v51, %v2884_v2  ;;  %v2853_v29 = vsel %vm652_vm5, %v2844_v34, %v7409_v62  ;;  %v7516_v34 = vpop.permute.xlu2 %2728 }
 0x331   : > { %v2841_v41 = vadd.f32 %v2837_v5, %v2833_v7  ;;  %v2809_v15 = vsel %vm451_vm3, %v8338_v61, %v2808_v16  ;;  %v7502_v5 = vsel %vm303_vm0, %v7357_v13, %v2682_v17  ;;  %v7508_v58 = vsel %vm303_vm0, %v7353_v57, %v2684_v10 }
 0x332   : > { %v2834_v1 = vadd.f32 %v2830_v0, %v2826_v8  ;;  %v2820_v20 = vmul.f32 %v2809_v15, %v8336_v23  ;;  %v2904_v21 = vperm.slane %v7508_v58, 0  ;;  %v2912_v39 = vrot.slane %v7508_v58, 6 }
 0x333   : > { %v2861_v43 = vadd.f32 %v2857_v6, %v2841_v41  ;;  %v2897_v13 = vmul.f32 %v2888_v37, %v7082_v47  ;;  %v2836_v17 = vmul.f32 %v2724_v18, %v8337_v31  ;;  %v2895_v62 = vmul.f32 %v2885_v50, %v7082_v47 }
 0x334   : > { %v2842_v9 = vadd.f32 %v2838_v45, %v2834_v1  ;;  %v2824_v0 = vadd.f32 %v2820_v20, %v2800_v12  ;;  %v2680_v19 = vpop.permute.xlu1 %2679  ;;  %v2920_v54 = vsel %vm809_vm4, %v2904_v21, %v2912_v39  ;;  %v2856_v47 = vmul.f32 %v2853_v29, %v8333_v49 }
 0x335   : > { %v2881_v27 = vadd.f32 %v7436_v4, %v2861_v43  ;;  %v7522_v46 = vsel %vm303_vm0, %v7355_v35, %v2680_v19  ;;  %v2923_v4 = vmul.f32 %v2920_v54, %v7054_v63  ;;  %v2893_v35 = vsel %vm652_vm5, %v2884_v2, %v2724_v18  ;;  %v8339_v2 = vld [vmem:[#allocation28_spill] sm:$0xff] }
 0x336   : > { %v2862_v57 = vadd.f32 %v7456_v48, %v2842_v9  ;;  %v2832_v55 = vadd.f32 %v2828_v14, %v2824_v0  ;;  %v2903_v24 = vperm.slane %v7522_v46, 0  ;;  %v2909_v12 = vrot.slane %v7522_v46, 6 }
 0x337   : > { %v2901_v23 = vadd.f32 %v2897_v13, %v2881_v27  ;;  %v2945_v48 = vmul.f32 %v7428_v52, %v7142_v28  ;;  %v2910_v14 = vrot.slane %v7502_v5, 6  ;;  %v2876_v6 = vmul.f32 %v7405_v22, %v7184_v56 }
 0x338   : > { %v2882_v7 = vadd.f32 %v7439_v44, %v2862_v57  ;;  %v2840_v16 = vadd.f32 %v2836_v17, %v2832_v55  ;;  %v2919_v8 = vsel %vm809_vm4, %v2903_v24, %v2909_v12  ;;  %v2899_v31 = vadd.f32 %v2895_v62, %v2879_v3  ;;  %v2733_v45 = vpop.permute.xlu0 %2732  ;;  %v7556_v9 = vpop.permute.xlu2 %2740 }
 0x339   : > { %v2927_v51 = vadd.f32 %v2923_v4, %v2901_v23  ;;  %v2921_v49 = vmul.f32 %v2919_v8, %v7054_v63  ;;  %v2911_v44 = vsel %vm809_vm4, %v2909_v12, %v2910_v14  ;;  %v2935_v52 = vrot.slane %v7313_v11, 6 }
 0x33a   : > { %v2860_v41 = vadd.f32 %v2856_v47, %v2840_v16  ;;  %v2894_v15 = vsel %vm652_vm5, %v2887_v32, %v7472_v38  ;;  %v2896_v10 = vmul.f32 %v2893_v35, %v8339_v2  ;;  %v2943_v63 = vmul.f32 %v7385_v36, %v7142_v28 }
 0x33b   : > { %v2949_v61 = vadd.f32 %v2945_v48, %v2927_v51  ;;  %v2925_v1 = vadd.f32 %v2921_v49, %v2899_v31  ;;  %v8340_v22 = vrot.slane %v7299_v25, 6  ;;  %v8341_v3 = vrot.slane %v7287_v42, 6 }
 0x33c   : > { %v2880_v18 = vadd.f32 %v2876_v6, %v2860_v41  ;;  %v2686_v37 = vpop.permute.xlu1 %2685  ;;  %v2922_v38 = vmul.f32 %v2911_v44, %v7020_v33  ;;  %v2898_v29 = vmul.f32 %v2894_v15, %v8339_v2  ;;  %v8342_v36 = vrot.slane %v7307_v40, 6 }
 0x33d   : > { %v7544_v56 = vsel %vm303_vm0, %v7372_v59, %v2686_v37  ;;  %v2933_v20 = vsel %vm809_vm4, %v8341_v3, %v8340_v22  ;;  %v2947_v43 = vadd.f32 %v2943_v63, %v2925_v1  ;;  %v3021_v12 = vrot.slane %v7313_v11, 2  ;;  %v8345_v22 = vld [vmem:[#allocation58_spill] sm:$0xff] }
 0x33e   : > { %v2900_v50 = vadd.f32 %v2896_v10, %v2880_v18  ;;  %v2913_v32 = vrot.slane %v7544_v56, 6  ;;  %v2944_v28 = vmul.f32 %v2933_v20, %v7199_v53  ;;  %v2936_v21 = vsel %vm809_vm4, %v8342_v36, %v2935_v52  ;;  %v8343_v18 = vld [vmem:[#allocation92_spill] sm:$0xff] }
 0x33f   : > { %v2902_v19 = vadd.f32 %v2898_v29, %v2882_v7  ;;  %v2946_v62 = vmul.f32 %v2936_v21, %v7199_v53  ;;  %v2999_v24 = vrot.slane %v7544_v56, 2  ;;  %v2998_v7 = vrot.slane %v7508_v58, 2  ;;  %v8344_v10 = vld [vmem:[#allocation76_spill] sm:$0xff] }
 0x340   : > { %v2926_v59 = vadd.f32 %v2922_v38, %v2900_v50  ;;  %v2914_v0 = vsel %vm809_vm4, %v2912_v39, %v2913_v32  ;;  %v2748_v57 = vpop.permute.xlu0 %2747  ;;  %v2746_v47 = vpop.permute.xlu2 %2745  ;;  %v3020_v16 = vrot.slane %v7307_v40, 2  ;;  %v2979_v48 = vmul.f32 %v7508_v58, %v7058_v60 }
 0x341   : > { %v2924_v27 = vmul.f32 %v2914_v0, %v7020_v33  ;;  %v2756_v14 = vsel %vm434_vm7, %v2746_v47, %v2733_v45  ;;  %v3017_v51 = vrot.slane %v7287_v42, 2  ;;  %v2993_v8 = vperm.slane %v7502_v5, 7 }
 0x342   : > { %v2948_v13 = vadd.f32 %v2944_v28, %v2926_v59  ;;  %v3000_v41 = vsel %vm1022_vm6, %v2998_v7, %v2999_v24  ;;  %v3022_v6 = vsel %vm1022_vm6, %v3020_v16, %v3021_v12  ;;  %v3018_v40 = vrot.slane %v7299_v25, 2  ;;  %v8346_v59 = vld [vmem:[#allocation53_spill] sm:$0xff] }
 0x343   : > { %v2928_v17 = vadd.f32 %v2924_v27, %v2902_v19  ;;  %v2996_v58 = vrot.slane %v7502_v5, 2  ;;  %v2995_v44 = vrot.slane %v7522_v46, 2  ;;  %v3009_v2 = vmul.f32 %v3000_v41, %v8343_v18 }
 0x344   : > { %v2737_v55 = vpop.permute.xlu1 %2736  ;;  %v3031_v1 = vmul.f32 %v3022_v6, %v8344_v10  ;;  %v3015_v63 = vperm.slane %v7299_v25, 7  ;;  %v2978_v3 = vmul.f32 %v7502_v5, %v8345_v22  ;;  %v2977_v28 = vmul.f32 %v7522_v46, %v7058_v60  ;;  %v8349_v6 = vld [vmem:[#allocation34_spill] sm:$0xff] }
 0x345   : > { %v7566_v54 = vsel %vm434_vm7, %v2748_v57, %v2737_v55  ;;  %v7568_v23 = vadd.f32 %v2946_v62, %v2928_v17  ;;  %v3005_v38 = vsel %vm1022_vm6, %v2996_v58, %v2993_v8  ;;  %v2997_v25 = vsel %vm1022_vm6, %v2995_v44, %v2996_v58  ;;  %v8347_v62 = vld [vmem:[#allocation35_spill] sm:$0xff] }
 0x346   : > { %v2952_v39 = vperm.slane %v7566_v54, 0  ;;  %v2960_v4 = vrot.slane %v7566_v54, 6  ;;  %v2987_v45 = vmul.f32 %v7566_v54, %v7150_v26  ;;  %v3037_v36 = vperm.slane %v2756_v14, 7  ;;  %v8348_v55 = vld [vmem:[#allocation31_spill] sm:$0xff] }
 0x347   : > { %v3040_v5 = vrot.slane %v2756_v14, 2  ;;  %v3008_v57 = vmul.f32 %v3005_v38, %v8347_v62  ;;  %v2994_v41 = vperm.slane %v7544_v56, 7  ;;  %v8351_v44 = vld [vmem:[#allocation79_spill] sm:$0xff] }
 0x348   : > { %v2968_v33 = vsel %vm809_vm4, %v2952_v39, %v2960_v4  ;;  %v2986_v39 = vmul.f32 %v2756_v14, %v8348_v55 }
 0x349   : > { %v2971_v53 = vmul.f32 %v2968_v33, %v7146_v30  ;;  %v3027_v33 = vsel %vm1022_vm6, %v3018_v40, %v3015_v63 }
 0x34b   : > { %v2975_v35 = vadd.f32 %v2971_v53, %v2949_v61  ;;  %v2958_v61 = vrot.slane %v2756_v14, 6  ;;  %v3049_v14 = vsel %vm1022_vm6, %v3040_v5, %v3037_v36 }
 0x34c   : > { %v2744_v31 = vpop.permute.xlu1 %2743 }
 0x34d   : > { %v2983_v49 = vadd.f32 %v2979_v48, %v2975_v35  ;;  %v2755_v42 = vsel %vm434_vm7, %v2744_v31, %v7516_v34  ;;  %v3019_v34 = vsel %vm1022_vm6, %v3017_v51, %v3018_v40 }
 0x34e   : > { %v2951_v52 = vperm.slane %v2755_v42, 0  ;;  %v2957_v15 = vrot.slane %v2755_v42, 6  ;;  %v3039_v17 = vrot.slane %v2755_v42, 2  ;;  %v2985_v60 = vmul.f32 %v2755_v42, %v7150_v26 }
 0x34f   : > { %v2991_v37 = vadd.f32 %v2987_v45, %v2983_v49  ;;  %v3030_v26 = vmul.f32 %v3027_v33, %v8349_v6  ;;  %v8350_v45 = vld [vmem:[#allocation29_spill] sm:$0xff] }
 0x350   : > { %v2959_v20 = vsel %vm809_vm4, %v2957_v15, %v2958_v61  ;;  %v2967_v50 = vsel %vm809_vm4, %v2951_v52, %v2957_v15  ;;  %v3041_v8 = vsel %vm1022_vm6, %v3039_v17, %v3040_v5  ;;  %v3052_v61 = vmul.f32 %v3049_v14, %v8351_v44 }
 0x351   : > { %v3013_v32 = vadd.f32 %v3009_v2, %v2991_v37  ;;  %v2969_v29 = vmul.f32 %v2967_v50, %v7146_v30  ;;  %v2970_v0 = vmul.f32 %v2959_v20, %v8346_v59  ;;  %v3029_v30 = vmul.f32 %v3019_v34, %v8344_v10 }
 0x352   : > { %v2980_v52 = vmul.f32 %v7544_v56, %v8345_v22  ;;  %v3051_v15 = vmul.f32 %v3041_v8, %v8350_v45 }
 0x353   : > { %v3035_v21 = vadd.f32 %v3031_v1, %v3013_v32  ;;  %v2973_v19 = vadd.f32 %v2969_v29, %v2947_v43  ;;  %v2974_v27 = vadd.f32 %v2970_v0, %v2948_v13  ;;  %v3007_v43 = vmul.f32 %v2997_v25, %v8343_v18 }
 0x354   : > { %v2750_v53 = vpop.permute.xlu1 %2749  ;;  %v3042_v13 = vrot.slane %v7566_v54, 2  ;;  %v3016_v54 = vperm.slane %v7313_v11, 7  ;;  %v3006_v1 = vsel %vm1022_vm6, %v2999_v24, %v2994_v41 }
 0x355   : > { %v2981_v47 = vadd.f32 %v2977_v28, %v2973_v19  ;;  %v2982_v7 = vadd.f32 %v2978_v3, %v2974_v27  ;;  %v2758_v46 = vsel %vm434_vm7, %v2750_v53, %v7556_v9  ;;  %v3010_v56 = vmul.f32 %v3006_v1, %v8347_v62 }
 0x356   : > { %v2961_v16 = vrot.slane %v2758_v46, 6  ;;  %v3043_v48 = vrot.slane %v2758_v46, 2  ;;  %v3038_v37 = vperm.slane %v2758_v46, 7  ;;  %v2988_v22 = vmul.f32 %v2758_v46, %v8348_v55 }
 0x357   : > { %v2989_v35 = vadd.f32 %v2985_v60, %v2981_v47  ;;  %v2990_v51 = vadd.f32 %v2986_v39, %v2982_v7  ;;  %v3028_v50 = vsel %vm1022_vm6, %v3021_v12, %v3016_v54 }
 0x358   : > { %v2962_v9 = vsel %vm809_vm4, %v2960_v4, %v2961_v16  ;;  %v3044_v31 = vsel %vm1022_vm6, %v3042_v13, %v3043_v48  ;;  %v3050_v24 = vsel %vm1022_vm6, %v3043_v48, %v3038_v37  ;;  %v3032_v34 = vmul.f32 %v3028_v50, %v8349_v6 }
 0x359   : > { %v3011_v40 = vadd.f32 %v3007_v43, %v2989_v35  ;;  %v3012_v58 = vadd.f32 %v3008_v57, %v2990_v51  ;;  %v2972_v49 = vmul.f32 %v2962_v9, %v8346_v59  ;;  %v3053_v42 = vmul.f32 %v3044_v31, %v8350_v45 }
 0x35a   : > { %v3054_v12 = vmul.f32 %v3050_v24, %v8351_v44 }
 0x35b   : > { %v3033_v18 = vadd.f32 %v3029_v30, %v3011_v40  ;;  %v3034_v4 = vadd.f32 %v3030_v26, %v3012_v58  ;;  %v2976_v2 = vadd.f32 %v2972_v49, %v7568_v23  ;;  %v3057_v10 = vadd.f32 %v3053_v42, %v3035_v21 }
 0x35d   : > { %v3055_v63 = vadd.f32 %v3051_v15, %v3033_v18  ;;  %v3056_v3 = vadd.f32 %v3052_v61, %v3034_v4  ;;  %v2984_v20 = vadd.f32 %v2980_v52, %v2976_v2  ;;  %3061 = vst [vmem:[%s224_s26 + $0x10] sm:$0xff] %v3057_v10 }
 0x35f   : > { %3059 = vst [vmem:[%s224_s26] sm:$0xff] %v3055_v63  ;;  %v2992_v23 = vadd.f32 %v2988_v22, %v2984_v20 }
 0x360   : > { %3060 = vst [vmem:[%s224_s26 + $0x8] sm:$0xff] %v3056_v3 }
 0x361   : > { %v3014_v38 = vadd.f32 %v3010_v56, %v2992_v23 }
 0x363   : > { %v3036_v11 = vadd.f32 %v3032_v34, %v3014_v38 }
 0x365   : > { %v3058_v32 = vadd.f32 %v3054_v12, %v3036_v11 }
 0x367   : > { %3062 = vst [vmem:[%s224_s26 + $0x18] sm:$0xff] %v3058_v32 }
 0x368   : > { %3512 = shalt.err (!%p3509_p13)
}
 0x369   : > { %s3581_s3 = smov 128   ;;  %s3582_s15 = smov 8  }
 0x36a   : > { %3218 = dma.vmem_to_hbm [thread:$0]  (%p3649_p9), %s3080_s28, 512, %s3082_s29, %s3064_s30, %s3581_s3, %s3581_s3, %s3582_s15  }
 0x36b PF: > { %s3096_s16 = sand.u32 1, %s3551_s9   ;;  %p3228_p0 = pnand %p3195_p12, %p3656_p11 }
 0x36c   : > { %s3097_s18 = scalar_lea.sflag [#allocation5], %s3096_s16 }
 0x36d   : > { %p3229_p1 = pneg %p3228_p0 }
 0x36f   : > { %3546 = dma.done.wait (%p3229_p1), %s3097_s18, 512  }
 0x370   : > { %3548 = vsyncadd (%p3229_p1), %s3097_s18, 4294966784  ;;  %s21_s14 = sadd.s32 1, %s3571_s14   ;;  %s8352_s9 = smov %s3555_s10 }
 0x371   : > { %p18_p2 = scmp.ge.s32.totalorder %s21_s14, 4   ;;  %s8353_s10 = smov %s3559_s11 }
 0x372   : > { %s8354_s11 = smov %s3654_s23  ;;  %s8355_s12 = smov %s3567_s13 }
 0x373   : > { %s8356_s13 = smov %s8358_s17  ;;  %20 = sbr.rel (!%p18_p2) target bundleno = 8 (0x8), region = 120 }
 0x378   :  { %3103 = vsyncpa [#allocation4], 1 }
 0x379   :  { %3105 = vsyncpa [#allocation4 + $0x1], 1 }
 0x37a   :  { %3106 = vsyncpa [#allocation7], 1 }
 0x37b   :  { %3108 = vsyncpa [#allocation7 + $0x1], 1 }
 0x37c   :  { %3109 = vsyncpa [#allocation5], 1 }
 0x37d   :  { %3111 = vsyncpa [#allocation5 + $0x1], 1 }

</bundles_post_ra>
